<compile_context>
chip_gen: v7x
topology: tpu7x:2x2x1
jax: 0.10.0
libtpu: 0.0.40
codegen_flags: <defaults>
</compile_context>

<pallas_src>
import functools

import jax
import jax.numpy as jnp
import numpy as np
from jax.experimental import pallas as pl
from jax.experimental.pallas import tpu as pltpu

# ---- dims implied by the PyTorch module ------------------------------------
BERT_HIDDEN = 768      # BERT last_hidden_state width
CONV_OUT = 128         # Conv1d out_channels
GRU_HIDDEN = 64        # GRU hidden size (bidirectional -> 128 features)
GATE_PAD = 128         # each GRU gate padded to a full 128-lane tile
NUM_INTENTS = 8        # num_intents

# ---- small example dims -----------------------------------------------------
BATCH = 2
SEQ = 8                # must be even (MaxPool1d(kernel_size=2))
VOCAB = 50
VOCAB_PAD = 64         # embedding rows padded so the gather-matmul K is aligned


# =============================================================================
# Fused kernel: embed -> conv+relu+pool -> biGRU -> fc   (one batch per step)
# =============================================================================
def fused_intent_kernel(ids_ref, mask_ref, emb_ref, wc_ref, cb_ref,
                        wih_f_ref, whh_f_ref, bih_f_ref, bhh_f_ref,
                        wih_b_ref, whh_b_ref, bih_b_ref, bhh_b_ref,
                        fcw_ref, fcb_ref, o_ref, *, seq_len):
    S = seq_len
    T = S // 2
    C = CONV_OUT
    HP = GATE_PAD
    L = ids_ref.shape[1]          # round_up(S + 2, 8) halo/zero-padded rows

    # -- embedding lookup fused in: one-hot @ table (table stays in VMEM).
    #    Padded rows carry id = -1 and mask = 0 -> exactly-zero embedding rows,
    #    which double as the conv's zero padding (padding=1).
    ids = ids_ref[0]                                            # (L, 1) int32
    mask = mask_ref[0]                                          # (L, 1) f32
    vocab_iota = jax.lax.broadcasted_iota(jnp.int32, (L, VOCAB_PAD), 1)
    onehot = (ids == vocab_iota).astype(jnp.float32) * mask     # (L, V)
    x_pad = jnp.dot(onehot, emb_ref[...],
                    preferred_element_type=jnp.float32)         # (L, 768)

    # -- Conv1d(k=3, pad=1): ONE (L,768)@(768,3C) matmul against the
    #    tap-concatenated weights; the three 128-lane column groups are then
    #    combined with +0/+1/+2 row-shifted adds on the narrow (L, 3C) result
    #    (the compiler lowers those shifts to XLU sublane rotates) — the wide
    #    768-channel input is never sliced or copied per tap.
    g = jnp.dot(x_pad, wc_ref[...], preferred_element_type=jnp.float32)  # (L, 3C)
    acc = (g[0:S, 0:C] + g[1:S + 1, C:2 * C] + g[2:S + 2, 2 * C:3 * C]
           + cb_ref[...])
    acc = jnp.maximum(acc, 0.0)                                 # bias + ReLU
    y = jnp.max(acc.reshape(T, 2, C), axis=1)                   # MaxPool1d(2) -> (T, C)

    # -- GRU cell (gates ordered [r|z|n]) with the input projection hoisted out
    #    of the time loop; every gate is padded to a full 128-lane tile so the
    #    slices at 0/128/256 are lane-tile aligned (padded lanes stay exactly 0).
    def run_direction(x_seq, wih, whh, bih, bhh, steps):
        gx = jnp.dot(x_seq, wih, preferred_element_type=jnp.float32) + bih  # (steps, 3*HP)
        h = jnp.zeros((1, HP), jnp.float32)
        for t in range(steps):                    # tiny static trip count -> unroll
            gxt = gx[t:t + 1, :]
            gh = jnp.dot(h, whh, preferred_element_type=jnp.float32) + bhh
            r = jax.nn.sigmoid(gxt[:, 0:HP] + gh[:, 0:HP])
            z = jax.nn.sigmoid(gxt[:, HP:2 * HP] + gh[:, HP:2 * HP])
            n = jnp.tanh(gxt[:, 2 * HP:3 * HP] + r * gh[:, 2 * HP:3 * HP])
            h = (1.0 - z) * n + z * h
        return h                                                 # (1, HP)

    h_f = run_direction(y, wih_f_ref[...], whh_f_ref[...],
                        bih_f_ref[...], bhh_f_ref[...], T)
    # Backward direction: the model only consumes output[:, -1, H:], which for
    # the reversed pass is exactly one GRU step on x[T-1] starting from h0 = 0.
    h_b = run_direction(y[T - 1:T, :], wih_b_ref[...], whh_b_ref[...],
                        bih_b_ref[...], bhh_b_ref[...], 1)

    feat = jnp.concatenate([h_f, h_b], axis=-1)                  # (1, 2*HP)
    o_ref[0] = (jnp.dot(feat, fcw_ref[...],
                        preferred_element_type=jnp.float32) + fcb_ref[...])


# =============================================================================
# Parameter packing (logical layout -> kernel layout)
# =============================================================================
def pack_params(p):
    H, HP = GRU_HIDDEN, GATE_PAD

    def pad_gate_cols(w):        # (K, 3H) -> (K, 3*HP): each gate -> 128 lanes
        return jnp.concatenate(
            [jnp.pad(w[:, g * H:(g + 1) * H], ((0, 0), (0, HP - H)))
             for g in range(3)], axis=1)

    def pad_hh(w):               # (H, 3H) -> (HP, 3*HP)
        return pad_gate_cols(jnp.pad(w, ((0, HP - H), (0, 0))))

    fc_w = jnp.concatenate(
        [jnp.pad(p['fc_w'][:H], ((0, HP - H), (0, 0))),
         jnp.pad(p['fc_w'][H:], ((0, HP - H), (0, 0)))], axis=0)   # (2*HP, NI)

    return {
        'embed': jnp.pad(p['embed'], ((0, VOCAB_PAD - VOCAB), (0, 0))),
        'conv_wcat': jnp.concatenate([p['conv_w'][k] for k in range(3)], axis=1),
        'conv_b': p['conv_b'],
        'wih_f': pad_gate_cols(p['wih_f']), 'whh_f': pad_hh(p['whh_f']),
        'bih_f': pad_gate_cols(p['bih_f']), 'bhh_f': pad_gate_cols(p['bhh_f']),
        'wih_b': pad_gate_cols(p['wih_b']), 'whh_b': pad_hh(p['whh_b']),
        'bih_b': pad_gate_cols(p['bih_b']), 'bhh_b': pad_gate_cols(p['bhh_b']),
        'fc_w': fc_w, 'fc_b': p['fc_b'],
    }


# =============================================================================
# Wrapper: one pallas_call for the whole forward pass
# =============================================================================
def intent_recognition_forward(params, input_ids, attention_mask):
    # TODO(synk): pretrained FinBERT encoder cannot be reproduced in-script; its
    # last_hidden_state is replaced by a deterministic embedding lookup fused
    # into the kernel (attention_mask only zeroes padded positions). For a real
    # 30k vocab the in-kernel one-hot gather should become a DMA row gather.
    B, S = input_ids.shape
    L = ((S + 2 + 7) // 8) * 8           # conv halo rows, rounded up to sublanes
    kp = pack_params(params)

    # token ids / mask placed at rows 1..S of an L-row frame (row 0 = conv left
    # pad); extra rows use id=-1 & mask=0 so their embeddings are exactly zero.
    ids_p = jnp.full((B, L, 1), -1, jnp.int32)
    ids_p = ids_p.at[:, 1:S + 1, 0].set(input_ids.astype(jnp.int32))
    mask_p = jnp.zeros((B, L, 1), jnp.float32)
    mask_p = mask_p.at[:, 1:S + 1, 0].set(attention_mask.astype(jnp.float32))

    full2d = lambda shape: pl.BlockSpec(shape, lambda b: (0, 0))

    out = pl.pallas_call(
        functools.partial(fused_intent_kernel, seq_len=S),
        out_shape=jax.ShapeDtypeStruct((B, 1, NUM_INTENTS), jnp.float32),
        grid_spec=pltpu.PrefetchScalarGridSpec(
            num_scalar_prefetch=0,
            grid=(B,),                                   # batch-parallel (v7x: 2 TCs)
            in_specs=[
                pl.BlockSpec((1, L, 1), lambda b: (b, 0, 0)),       # ids
                pl.BlockSpec((1, L, 1), lambda b: (b, 0, 0)),       # mask
                full2d((VOCAB_PAD, BERT_HIDDEN)),                   # embedding table
                full2d((BERT_HIDDEN, 3 * CONV_OUT)),                # conv taps (concat)
                full2d((1, CONV_OUT)),                              # conv bias
                full2d((CONV_OUT, 3 * GATE_PAD)),                   # wih_f
                full2d((GATE_PAD, 3 * GATE_PAD)),                   # whh_f
                full2d((1, 3 * GATE_PAD)),                          # bih_f
                full2d((1, 3 * GATE_PAD)),                          # bhh_f
                full2d((CONV_OUT, 3 * GATE_PAD)),                   # wih_b
                full2d((GATE_PAD, 3 * GATE_PAD)),                   # whh_b
                full2d((1, 3 * GATE_PAD)),                          # bih_b
                full2d((1, 3 * GATE_PAD)),                          # bhh_b
                full2d((2 * GATE_PAD, NUM_INTENTS)),                # fc_w
                full2d((1, NUM_INTENTS)),                           # fc_b
            ],
            out_specs=pl.BlockSpec((1, 1, NUM_INTENTS), lambda b: (b, 0, 0)),
        ),
        compiler_params=pltpu.CompilerParams(
            dimension_semantics=("parallel",)),
    )(ids_p, mask_p, kp['embed'], kp['conv_wcat'], kp['conv_b'],
      kp['wih_f'], kp['whh_f'], kp['bih_f'], kp['bhh_f'],
      kp['wih_b'], kp['whh_b'], kp['bih_b'], kp['bhh_b'],
      kp['fc_w'], kp['fc_b'])
    return out[:, 0, :]


# =============================================================================
# Parameters & pure-JAX reference (for validation)
# =============================================================================
def init_params(key):
    ks = jax.random.split(key, 13)

    def w(k, shape, scale):
        return (scale * jax.random.normal(k, shape)).astype(jnp.float32)

    return {
        'embed':  w(ks[0], (VOCAB, BERT_HIDDEN), 0.02),
        'conv_w': w(ks[1], (3, BERT_HIDDEN, CONV_OUT), 0.02),   # (k, C_in, C_out)
        'conv_b': w(ks[2], (1, CONV_OUT), 0.02),
        # GRU weights stored transposed: W_ih^T (in, 3H), W_hh^T (H, 3H), [r|z|n]
        'wih_f':  w(ks[3], (CONV_OUT, 3 * GRU_HIDDEN), 0.05),
        'whh_f':  w(ks[4], (GRU_HIDDEN, 3 * GRU_HIDDEN), 0.05),
        'bih_f':  w(ks[5], (1, 3 * GRU_HIDDEN), 0.05),
        'bhh_f':  w(ks[6], (1, 3 * GRU_HIDDEN), 0.05),
        'wih_b':  w(ks[7], (CONV_OUT, 3 * GRU_HIDDEN), 0.05),
        'whh_b':  w(ks[8], (GRU_HIDDEN, 3 * GRU_HIDDEN), 0.05),
        'bih_b':  w(ks[9], (1, 3 * GRU_HIDDEN), 0.05),
        'bhh_b':  w(ks[10], (1, 3 * GRU_HIDDEN), 0.05),
        'fc_w':   w(ks[11], (2 * GRU_HIDDEN, NUM_INTENTS), 0.05),
        'fc_b':   w(ks[12], (1, NUM_INTENTS), 0.05),
    }


def reference_forward(params, input_ids, attention_mask):
    seq_out = params['embed'][input_ids] * attention_mask[..., None].astype(jnp.float32)
    B, S, _ = seq_out.shape
    x_pad = jnp.pad(seq_out, ((0, 0), (1, 1), (0, 0)))
    acc = jnp.zeros((B, S, CONV_OUT), jnp.float32)
    for k in range(3):
        acc = acc + jnp.einsum('bsc,co->bso', x_pad[:, k:k + S, :], params['conv_w'][k])
    acc = jnp.maximum(acc + params['conv_b'][None], 0.0)
    pooled = jnp.max(acc.reshape(B, S // 2, 2, CONV_OUT), axis=2)
    H = GRU_HIDDEN

    def step(x_t, h, wih, whh, bih, bhh):
        gx = x_t @ wih + bih
        gh = h @ whh + bhh
        r = jax.nn.sigmoid(gx[:, :H] + gh[:, :H])
        z = jax.nn.sigmoid(gx[:, H:2 * H] + gh[:, H:2 * H])
        n = jnp.tanh(gx[:, 2 * H:] + r * gh[:, 2 * H:])
        return (1.0 - z) * n + z * h

    h_f = jnp.zeros((B, H), jnp.float32)
    for t in range(pooled.shape[1]):
        h_f = step(pooled[:, t], h_f, params['wih_f'], params['whh_f'],
                   params['bih_f'], params['bhh_f'])
    h_b = step(pooled[:, -1], jnp.zeros((B, H), jnp.float32),
               params['wih_b'], params['whh_b'], params['bih_b'], params['bhh_b'])
    feat = jnp.concatenate([h_f, h_b], axis=-1)
    return feat @ params['fc_w'] + params['fc_b']


if __name__ == "__main__":
    key = jax.random.PRNGKey(0)
    k_param, k_ids = jax.random.split(key)
    params = init_params(k_param)

    input_ids = jax.random.randint(k_ids, (BATCH, SEQ), 0, VOCAB, dtype=jnp.int32)
    attention_mask = jnp.ones((BATCH, SEQ), dtype=jnp.int32)

    logits = intent_recognition_forward(params, input_ids, attention_mask)
    logits = jax.block_until_ready(logits)

    ref = jax.block_until_ready(reference_forward(params, input_ids, attention_mask))
    np.testing.assert_allclose(np.asarray(logits), np.asarray(ref),
                               rtol=1e-4, atol=1e-4)
    assert logits.shape == (BATCH, NUM_INTENTS)
    print("KERNEL_OK")
</pallas_src>

<mosaic_0001>
module attributes {stable_mosaic.version = 11 : i64} {
  func.func @fused_intent_kernel(%arg0: i32, %arg1: memref<1x16x1xi32, #tpu.memory_space<vmem>>, %arg2: memref<1x16x1xf32, #tpu.memory_space<vmem>>, %arg3: memref<64x768xf32, #tpu.memory_space<vmem>>, %arg4: memref<768x384xf32, #tpu.memory_space<vmem>>, %arg5: memref<1x128xf32, #tpu.memory_space<vmem>>, %arg6: memref<128x384xf32, #tpu.memory_space<vmem>>, %arg7: memref<128x384xf32, #tpu.memory_space<vmem>>, %arg8: memref<1x384xf32, #tpu.memory_space<vmem>>, %arg9: memref<1x384xf32, #tpu.memory_space<vmem>>, %arg10: memref<128x384xf32, #tpu.memory_space<vmem>>, %arg11: memref<128x384xf32, #tpu.memory_space<vmem>>, %arg12: memref<1x384xf32, #tpu.memory_space<vmem>>, %arg13: memref<1x384xf32, #tpu.memory_space<vmem>>, %arg14: memref<256x8xf32, #tpu.memory_space<vmem>>, %arg15: memref<1x8xf32, #tpu.memory_space<vmem>>, %arg16: memref<1x1x8xf32, #tpu.memory_space<vmem>>) attributes {dimension_semantics = [#tpu.dimension_semantics<parallel>], iteration_bounds = array<i64: 2>, scalar_prefetch = 0 : i64, scratch_operands = 0 : i64, tpu.core_type = #tpu.core_type<tc>, window_params = [{transform_indices = @transform_0, window_bounds = array<i64: 1, 16, 1>}, {transform_indices = @transform_1, window_bounds = array<i64: 1, 16, 1>}, {pipeline_mode = #tpu.pipeline_mode<synchronous>, transform_indices = @transform_2, window_bounds = array<i64: 64, 768>}, {pipeline_mode = #tpu.pipeline_mode<synchronous>, transform_indices = @transform_3, window_bounds = array<i64: 768, 384>}, {pipeline_mode = #tpu.pipeline_mode<synchronous>, transform_indices = @transform_4, window_bounds = array<i64: 1, 128>}, {pipeline_mode = #tpu.pipeline_mode<synchronous>, transform_indices = @transform_5, window_bounds = array<i64: 128, 384>}, {pipeline_mode = #tpu.pipeline_mode<synchronous>, transform_indices = @transform_6, window_bounds = array<i64: 128, 384>}, {pipeline_mode = #tpu.pipeline_mode<synchronous>, transform_indices = @transform_7, window_bounds = array<i64: 1, 384>}, {pipeline_mode = #tpu.pipeline_mode<synchronous>, transform_indices = @transform_8, window_bounds = array<i64: 1, 384>}, {pipeline_mode = #tpu.pipeline_mode<synchronous>, transform_indices = @transform_9, window_bounds = array<i64: 128, 384>}, {pipeline_mode = #tpu.pipeline_mode<synchronous>, transform_indices = @transform_10, window_bounds = array<i64: 128, 384>}, {pipeline_mode = #tpu.pipeline_mode<synchronous>, transform_indices = @transform_11, window_bounds = array<i64: 1, 384>}, {pipeline_mode = #tpu.pipeline_mode<synchronous>, transform_indices = @transform_12, window_bounds = array<i64: 1, 384>}, {pipeline_mode = #tpu.pipeline_mode<synchronous>, transform_indices = @transform_13, window_bounds = array<i64: 256, 8>}, {pipeline_mode = #tpu.pipeline_mode<synchronous>, transform_indices = @transform_14, window_bounds = array<i64: 1, 8>}, {transform_indices = @transform_15, window_bounds = array<i64: 1, 1, 8>}]} {
    %c0 = arith.constant 0 : index
    %c0_0 = arith.constant 0 : index
    %c0_1 = arith.constant 0 : index
    %0 = vector.load %arg1[%c0, %c0_0, %c0_1] : memref<1x16x1xi32, #tpu.memory_space<vmem>>, vector<1x16x1xi32>
    %1 = vector.shape_cast %0 : vector<1x16x1xi32> to vector<16x1xi32>
    %c0_2 = arith.constant 0 : index
    %c0_3 = arith.constant 0 : index
    %c0_4 = arith.constant 0 : index
    %2 = vector.load %arg2[%c0_2, %c0_3, %c0_4] : memref<1x16x1xf32, #tpu.memory_space<vmem>>, vector<1x16x1xf32>
    %3 = vector.shape_cast %2 : vector<1x16x1xf32> to vector<16x1xf32>
    %4 = tpu.iota {dimensions = array<i32: 1>} : vector<16x64xi32>
    %5 = vector.broadcast %1 : vector<16x1xi32> to vector<16x64xi32>
    %6 = arith.cmpi eq, %5, %4 : vector<16x64xi32>
    %7 = arith.extui %6 : vector<16x64xi1> to vector<16x64xi32>
    %8 = arith.sitofp %7 : vector<16x64xi32> to vector<16x64xf32>
    %9 = vector.broadcast %3 : vector<16x1xf32> to vector<16x64xf32>
    %10 = arith.mulf %8, %9 : vector<16x64xf32>
    %c0_5 = arith.constant 0 : index
    %c0_6 = arith.constant 0 : index
    %11 = vector.load %arg3[%c0_5, %c0_6] : memref<64x768xf32, #tpu.memory_space<vmem>>, vector<64x768xf32>
    %cst = arith.constant dense<0.000000e+00> : vector<16x768xf32>
    %12 = tpu.matmul %10, %11, %cst {dimension_numbers = #tpu.dot_dimension_numbers<[1], [0], [0], [1], [0, 0, 1, 1], [], []>} : vector<16x64xf32>, vector<64x768xf32>, vector<16x768xf32> -> vector<16x768xf32>
    %c0_7 = arith.constant 0 : index
    %c0_8 = arith.constant 0 : index
    %13 = vector.load %arg4[%c0_7, %c0_8] : memref<768x384xf32, #tpu.memory_space<vmem>>, vector<768x384xf32>
    %cst_9 = arith.constant dense<0.000000e+00> : vector<16x384xf32>
    %14 = tpu.matmul %12, %13, %cst_9 {dimension_numbers = #tpu.dot_dimension_numbers<[1], [0], [0], [1], [0, 0, 1, 1], [], []>} : vector<16x768xf32>, vector<768x384xf32>, vector<16x384xf32> -> vector<16x384xf32>
    %15 = vector.extract_strided_slice %14 {offsets = [0, 0], sizes = [8, 128], strides = [1, 1]} : vector<16x384xf32> to vector<8x128xf32>
    %16 = vector.extract_strided_slice %14 {offsets = [1, 128], sizes = [8, 128], strides = [1, 1]} : vector<16x384xf32> to vector<8x128xf32>
    %17 = arith.addf %15, %16 : vector<8x128xf32>
    %18 = vector.extract_strided_slice %14 {offsets = [2, 256], sizes = [8, 128], strides = [1, 1]} : vector<16x384xf32> to vector<8x128xf32>
    %19 = arith.addf %17, %18 : vector<8x128xf32>
    %c0_10 = arith.constant 0 : index
    %c0_11 = arith.constant 0 : index
    %20 = vector.load %arg5[%c0_10, %c0_11] : memref<1x128xf32, #tpu.memory_space<vmem>>, vector<1x128xf32>
    %21 = vector.broadcast %20 : vector<1x128xf32> to vector<8x128xf32>
    %22 = arith.addf %19, %21 : vector<8x128xf32>
    %cst_12 = arith.constant 0.000000e+00 : f32
    %23 = vector.broadcast %cst_12 : f32 to vector<8x128xf32>
    %24 = arith.maximumf %22, %23 : vector<8x128xf32>
    %25 = vector.shape_cast %24 : vector<8x128xf32> to vector<4x2x128xf32>
    %cst_13 = arith.constant dense<0xFF800000> : vector<4x128xf32>
    %26 = vector.multi_reduction <maximumf>, %25, %cst_13 [1] : vector<4x2x128xf32> to vector<4x128xf32>
    %c0_14 = arith.constant 0 : index
    %c0_15 = arith.constant 0 : index
    %27 = vector.load %arg6[%c0_14, %c0_15] : memref<128x384xf32, #tpu.memory_space<vmem>>, vector<128x384xf32>
    %c0_16 = arith.constant 0 : index
    %c0_17 = arith.constant 0 : index
    %28 = vector.load %arg7[%c0_16, %c0_17] : memref<128x384xf32, #tpu.memory_space<vmem>>, vector<128x384xf32>
    %c0_18 = arith.constant 0 : index
    %c0_19 = arith.constant 0 : index
    %29 = vector.load %arg8[%c0_18, %c0_19] : memref<1x384xf32, #tpu.memory_space<vmem>>, vector<1x384xf32>
    %c0_20 = arith.constant 0 : index
    %c0_21 = arith.constant 0 : index
    %30 = vector.load %arg9[%c0_20, %c0_21] : memref<1x384xf32, #tpu.memory_space<vmem>>, vector<1x384xf32>
    %cst_22 = arith.constant dense<0.000000e+00> : vector<4x384xf32>
    %31 = tpu.matmul %26, %27, %cst_22 {dimension_numbers = #tpu.dot_dimension_numbers<[1], [0], [0], [1], [0, 0, 1, 1], [], []>} : vector<4x128xf32>, vector<128x384xf32>, vector<4x384xf32> -> vector<4x384xf32>
    %32 = vector.broadcast %29 : vector<1x384xf32> to vector<4x384xf32>
    %33 = arith.addf %31, %32 : vector<4x384xf32>
    %cst_23 = arith.constant 0.000000e+00 : f32
    %34 = vector.broadcast %cst_23 : f32 to vector<1x128xf32>
    %35 = vector.extract_strided_slice %33 {offsets = [0, 0], sizes = [1, 384], strides = [1, 1]} : vector<4x384xf32> to vector<1x384xf32>
    %cst_24 = arith.constant dense<0.000000e+00> : vector<1x384xf32>
    %36 = tpu.matmul %34, %28, %cst_24 {dimension_numbers = #tpu.dot_dimension_numbers<[1], [0], [0], [1], [0, 0, 1, 1], [], []>} : vector<1x128xf32>, vector<128x384xf32>, vector<1x384xf32> -> vector<1x384xf32>
    %37 = arith.addf %36, %30 : vector<1x384xf32>
    %38 = vector.extract_strided_slice %35 {offsets = [0, 0], sizes = [1, 128], strides = [1, 1]} : vector<1x384xf32> to vector<1x128xf32>
    %39 = vector.extract_strided_slice %37 {offsets = [0, 0], sizes = [1, 128], strides = [1, 1]} : vector<1x384xf32> to vector<1x128xf32>
    %40 = arith.addf %38, %39 : vector<1x128xf32>
    %41 = arith.negf %40 : vector<1x128xf32>
    %42 = math.exp %41 : vector<1x128xf32>
    %cst_25 = arith.constant 1.000000e+00 : f32
    %43 = vector.broadcast %cst_25 : f32 to vector<1x128xf32>
    %44 = arith.addf %43, %42 : vector<1x128xf32>
    %45 = arith.divf %43, %44 : vector<1x128xf32>
    %46 = vector.extract_strided_slice %35 {offsets = [0, 128], sizes = [1, 128], strides = [1, 1]} : vector<1x384xf32> to vector<1x128xf32>
    %47 = vector.extract_strided_slice %37 {offsets = [0, 128], sizes = [1, 128], strides = [1, 1]} : vector<1x384xf32> to vector<1x128xf32>
    %48 = arith.addf %46, %47 : vector<1x128xf32>
    %49 = arith.negf %48 : vector<1x128xf32>
    %50 = math.exp %49 : vector<1x128xf32>
    %cst_26 = arith.constant 1.000000e+00 : f32
    %51 = vector.broadcast %cst_26 : f32 to vector<1x128xf32>
    %52 = arith.addf %51, %50 : vector<1x128xf32>
    %53 = arith.divf %51, %52 : vector<1x128xf32>
    %54 = vector.extract_strided_slice %35 {offsets = [0, 256], sizes = [1, 128], strides = [1, 1]} : vector<1x384xf32> to vector<1x128xf32>
    %55 = vector.extract_strided_slice %37 {offsets = [0, 256], sizes = [1, 128], strides = [1, 1]} : vector<1x384xf32> to vector<1x128xf32>
    %56 = arith.mulf %45, %55 : vector<1x128xf32>
    %57 = arith.addf %54, %56 : vector<1x128xf32>
    %58 = math.tanh %57 : vector<1x128xf32>
    %cst_27 = arith.constant 1.000000e+00 : f32
    %59 = vector.broadcast %cst_27 : f32 to vector<1x128xf32>
    %60 = arith.subf %59, %53 : vector<1x128xf32>
    %61 = arith.mulf %60, %58 : vector<1x128xf32>
    %62 = arith.mulf %53, %34 : vector<1x128xf32>
    %63 = arith.addf %61, %62 : vector<1x128xf32>
    %64 = vector.extract_strided_slice %33 {offsets = [1, 0], sizes = [1, 384], strides = [1, 1]} : vector<4x384xf32> to vector<1x384xf32>
    %cst_28 = arith.constant dense<0.000000e+00> : vector<1x384xf32>
    %65 = tpu.matmul %63, %28, %cst_28 {dimension_numbers = #tpu.dot_dimension_numbers<[1], [0], [0], [1], [0, 0, 1, 1], [], []>} : vector<1x128xf32>, vector<128x384xf32>, vector<1x384xf32> -> vector<1x384xf32>
    %66 = arith.addf %65, %30 : vector<1x384xf32>
    %67 = vector.extract_strided_slice %64 {offsets = [0, 0], sizes = [1, 128], strides = [1, 1]} : vector<1x384xf32> to vector<1x128xf32>
    %68 = vector.extract_strided_slice %66 {offsets = [0, 0], sizes = [1, 128], strides = [1, 1]} : vector<1x384xf32> to vector<1x128xf32>
    %69 = arith.addf %67, %68 : vector<1x128xf32>
    %70 = arith.negf %69 : vector<1x128xf32>
    %71 = math.exp %70 : vector<1x128xf32>
    %cst_29 = arith.constant 1.000000e+00 : f32
    %72 = vector.broadcast %cst_29 : f32 to vector<1x128xf32>
    %73 = arith.addf %72, %71 : vector<1x128xf32>
    %74 = arith.divf %72, %73 : vector<1x128xf32>
    %75 = vector.extract_strided_slice %64 {offsets = [0, 128], sizes = [1, 128], strides = [1, 1]} : vector<1x384xf32> to vector<1x128xf32>
    %76 = vector.extract_strided_slice %66 {offsets = [0, 128], sizes = [1, 128], strides = [1, 1]} : vector<1x384xf32> to vector<1x128xf32>
    %77 = arith.addf %75, %76 : vector<1x128xf32>
    %78 = arith.negf %77 : vector<1x128xf32>
    %79 = math.exp %78 : vector<1x128xf32>
    %cst_30 = arith.constant 1.000000e+00 : f32
    %80 = vector.broadcast %cst_30 : f32 to vector<1x128xf32>
    %81 = arith.addf %80, %79 : vector<1x128xf32>
    %82 = arith.divf %80, %81 : vector<1x128xf32>
    %83 = vector.extract_strided_slice %64 {offsets = [0, 256], sizes = [1, 128], strides = [1, 1]} : vector<1x384xf32> to vector<1x128xf32>
    %84 = vector.extract_strided_slice %66 {offsets = [0, 256], sizes = [1, 128], strides = [1, 1]} : vector<1x384xf32> to vector<1x128xf32>
    %85 = arith.mulf %74, %84 : vector<1x128xf32>
    %86 = arith.addf %83, %85 : vector<1x128xf32>
    %87 = math.tanh %86 : vector<1x128xf32>
    %cst_31 = arith.constant 1.000000e+00 : f32
    %88 = vector.broadcast %cst_31 : f32 to vector<1x128xf32>
    %89 = arith.subf %88, %82 : vector<1x128xf32>
    %90 = arith.mulf %89, %87 : vector<1x128xf32>
    %91 = arith.mulf %82, %63 : vector<1x128xf32>
    %92 = arith.addf %90, %91 : vector<1x128xf32>
    %93 = vector.extract_strided_slice %33 {offsets = [2, 0], sizes = [1, 384], strides = [1, 1]} : vector<4x384xf32> to vector<1x384xf32>
    %cst_32 = arith.constant dense<0.000000e+00> : vector<1x384xf32>
    %94 = tpu.matmul %92, %28, %cst_32 {dimension_numbers = #tpu.dot_dimension_numbers<[1], [0], [0], [1], [0, 0, 1, 1], [], []>} : vector<1x128xf32>, vector<128x384xf32>, vector<1x384xf32> -> vector<1x384xf32>
    %95 = arith.addf %94, %30 : vector<1x384xf32>
    %96 = vector.extract_strided_slice %93 {offsets = [0, 0], sizes = [1, 128], strides = [1, 1]} : vector<1x384xf32> to vector<1x128xf32>
    %97 = vector.extract_strided_slice %95 {offsets = [0, 0], sizes = [1, 128], strides = [1, 1]} : vector<1x384xf32> to vector<1x128xf32>
    %98 = arith.addf %96, %97 : vector<1x128xf32>
    %99 = arith.negf %98 : vector<1x128xf32>
    %100 = math.exp %99 : vector<1x128xf32>
    %cst_33 = arith.constant 1.000000e+00 : f32
    %101 = vector.broadcast %cst_33 : f32 to vector<1x128xf32>
    %102 = arith.addf %101, %100 : vector<1x128xf32>
    %103 = arith.divf %101, %102 : vector<1x128xf32>
    %104 = vector.extract_strided_slice %93 {offsets = [0, 128], sizes = [1, 128], strides = [1, 1]} : vector<1x384xf32> to vector<1x128xf32>
    %105 = vector.extract_strided_slice %95 {offsets = [0, 128], sizes = [1, 128], strides = [1, 1]} : vector<1x384xf32> to vector<1x128xf32>
    %106 = arith.addf %104, %105 : vector<1x128xf32>
    %107 = arith.negf %106 : vector<1x128xf32>
    %108 = math.exp %107 : vector<1x128xf32>
    %cst_34 = arith.constant 1.000000e+00 : f32
    %109 = vector.broadcast %cst_34 : f32 to vector<1x128xf32>
    %110 = arith.addf %109, %108 : vector<1x128xf32>
    %111 = arith.divf %109, %110 : vector<1x128xf32>
    %112 = vector.extract_strided_slice %93 {offsets = [0, 256], sizes = [1, 128], strides = [1, 1]} : vector<1x384xf32> to vector<1x128xf32>
    %113 = vector.extract_strided_slice %95 {offsets = [0, 256], sizes = [1, 128], strides = [1, 1]} : vector<1x384xf32> to vector<1x128xf32>
    %114 = arith.mulf %103, %113 : vector<1x128xf32>
    %115 = arith.addf %112, %114 : vector<1x128xf32>
    %116 = math.tanh %115 : vector<1x128xf32>
    %cst_35 = arith.constant 1.000000e+00 : f32
    %117 = vector.broadcast %cst_35 : f32 to vector<1x128xf32>
    %118 = arith.subf %117, %111 : vector<1x128xf32>
    %119 = arith.mulf %118, %116 : vector<1x128xf32>
    %120 = arith.mulf %111, %92 : vector<1x128xf32>
    %121 = arith.addf %119, %120 : vector<1x128xf32>
    %122 = vector.extract_strided_slice %33 {offsets = [3, 0], sizes = [1, 384], strides = [1, 1]} : vector<4x384xf32> to vector<1x384xf32>
    %cst_36 = arith.constant dense<0.000000e+00> : vector<1x384xf32>
    %123 = tpu.matmul %121, %28, %cst_36 {dimension_numbers = #tpu.dot_dimension_numbers<[1], [0], [0], [1], [0, 0, 1, 1], [], []>} : vector<1x128xf32>, vector<128x384xf32>, vector<1x384xf32> -> vector<1x384xf32>
    %124 = arith.addf %123, %30 : vector<1x384xf32>
    %125 = vector.extract_strided_slice %122 {offsets = [0, 0], sizes = [1, 128], strides = [1, 1]} : vector<1x384xf32> to vector<1x128xf32>
    %126 = vector.extract_strided_slice %124 {offsets = [0, 0], sizes = [1, 128], strides = [1, 1]} : vector<1x384xf32> to vector<1x128xf32>
    %127 = arith.addf %125, %126 : vector<1x128xf32>
    %128 = arith.negf %127 : vector<1x128xf32>
    %129 = math.exp %128 : vector<1x128xf32>
    %cst_37 = arith.constant 1.000000e+00 : f32
    %130 = vector.broadcast %cst_37 : f32 to vector<1x128xf32>
    %131 = arith.addf %130, %129 : vector<1x128xf32>
    %132 = arith.divf %130, %131 : vector<1x128xf32>
    %133 = vector.extract_strided_slice %122 {offsets = [0, 128], sizes = [1, 128], strides = [1, 1]} : vector<1x384xf32> to vector<1x128xf32>
    %134 = vector.extract_strided_slice %124 {offsets = [0, 128], sizes = [1, 128], strides = [1, 1]} : vector<1x384xf32> to vector<1x128xf32>
    %135 = arith.addf %133, %134 : vector<1x128xf32>
    %136 = arith.negf %135 : vector<1x128xf32>
    %137 = math.exp %136 : vector<1x128xf32>
    %cst_38 = arith.constant 1.000000e+00 : f32
    %138 = vector.broadcast %cst_38 : f32 to vector<1x128xf32>
    %139 = arith.addf %138, %137 : vector<1x128xf32>
    %140 = arith.divf %138, %139 : vector<1x128xf32>
    %141 = vector.extract_strided_slice %122 {offsets = [0, 256], sizes = [1, 128], strides = [1, 1]} : vector<1x384xf32> to vector<1x128xf32>
    %142 = vector.extract_strided_slice %124 {offsets = [0, 256], sizes = [1, 128], strides = [1, 1]} : vector<1x384xf32> to vector<1x128xf32>
    %143 = arith.mulf %132, %142 : vector<1x128xf32>
    %144 = arith.addf %141, %143 : vector<1x128xf32>
    %145 = math.tanh %144 : vector<1x128xf32>
    %cst_39 = arith.constant 1.000000e+00 : f32
    %146 = vector.broadcast %cst_39 : f32 to vector<1x128xf32>
    %147 = arith.subf %146, %140 : vector<1x128xf32>
    %148 = arith.mulf %147, %145 : vector<1x128xf32>
    %149 = arith.mulf %140, %121 : vector<1x128xf32>
    %150 = arith.addf %148, %149 : vector<1x128xf32>
    %151 = vector.extract_strided_slice %26 {offsets = [3, 0], sizes = [1, 128], strides = [1, 1]} : vector<4x128xf32> to vector<1x128xf32>
    %c0_40 = arith.constant 0 : index
    %c0_41 = arith.constant 0 : index
    %152 = vector.load %arg10[%c0_40, %c0_41] : memref<128x384xf32, #tpu.memory_space<vmem>>, vector<128x384xf32>
    %c0_42 = arith.constant 0 : index
    %c0_43 = arith.constant 0 : index
    %153 = vector.load %arg11[%c0_42, %c0_43] : memref<128x384xf32, #tpu.memory_space<vmem>>, vector<128x384xf32>
    %c0_44 = arith.constant 0 : index
    %c0_45 = arith.constant 0 : index
    %154 = vector.load %arg12[%c0_44, %c0_45] : memref<1x384xf32, #tpu.memory_space<vmem>>, vector<1x384xf32>
    %c0_46 = arith.constant 0 : index
    %c0_47 = arith.constant 0 : index
    %155 = vector.load %arg13[%c0_46, %c0_47] : memref<1x384xf32, #tpu.memory_space<vmem>>, vector<1x384xf32>
    %cst_48 = arith.constant dense<0.000000e+00> : vector<1x384xf32>
    %156 = tpu.matmul %151, %152, %cst_48 {dimension_numbers = #tpu.dot_dimension_numbers<[1], [0], [0], [1], [0, 0, 1, 1], [], []>} : vector<1x128xf32>, vector<128x384xf32>, vector<1x384xf32> -> vector<1x384xf32>
    %157 = arith.addf %156, %154 : vector<1x384xf32>
    %cst_49 = arith.constant 0.000000e+00 : f32
    %158 = vector.broadcast %cst_49 : f32 to vector<1x128xf32>
    %cst_50 = arith.constant dense<0.000000e+00> : vector<1x384xf32>
    %159 = tpu.matmul %158, %153, %cst_50 {dimension_numbers = #tpu.dot_dimension_numbers<[1], [0], [0], [1], [0, 0, 1, 1], [], []>} : vector<1x128xf32>, vector<128x384xf32>, vector<1x384xf32> -> vector<1x384xf32>
    %160 = arith.addf %159, %155 : vector<1x384xf32>
    %161 = vector.extract_strided_slice %157 {offsets = [0, 0], sizes = [1, 128], strides = [1, 1]} : vector<1x384xf32> to vector<1x128xf32>
    %162 = vector.extract_strided_slice %160 {offsets = [0, 0], sizes = [1, 128], strides = [1, 1]} : vector<1x384xf32> to vector<1x128xf32>
    %163 = arith.addf %161, %162 : vector<1x128xf32>
    %164 = arith.negf %163 : vector<1x128xf32>
    %165 = math.exp %164 : vector<1x128xf32>
    %cst_51 = arith.constant 1.000000e+00 : f32
    %166 = vector.broadcast %cst_51 : f32 to vector<1x128xf32>
    %167 = arith.addf %166, %165 : vector<1x128xf32>
    %168 = arith.divf %166, %167 : vector<1x128xf32>
    %169 = vector.extract_strided_slice %157 {offsets = [0, 128], sizes = [1, 128], strides = [1, 1]} : vector<1x384xf32> to vector<1x128xf32>
    %170 = vector.extract_strided_slice %160 {offsets = [0, 128], sizes = [1, 128], strides = [1, 1]} : vector<1x384xf32> to vector<1x128xf32>
    %171 = arith.addf %169, %170 : vector<1x128xf32>
    %172 = arith.negf %171 : vector<1x128xf32>
    %173 = math.exp %172 : vector<1x128xf32>
    %cst_52 = arith.constant 1.000000e+00 : f32
    %174 = vector.broadcast %cst_52 : f32 to vector<1x128xf32>
    %175 = arith.addf %174, %173 : vector<1x128xf32>
    %176 = arith.divf %174, %175 : vector<1x128xf32>
    %177 = vector.extract_strided_slice %157 {offsets = [0, 256], sizes = [1, 128], strides = [1, 1]} : vector<1x384xf32> to vector<1x128xf32>
    %178 = vector.extract_strided_slice %160 {offsets = [0, 256], sizes = [1, 128], strides = [1, 1]} : vector<1x384xf32> to vector<1x128xf32>
    %179 = arith.mulf %168, %178 : vector<1x128xf32>
    %180 = arith.addf %177, %179 : vector<1x128xf32>
    %181 = math.tanh %180 : vector<1x128xf32>
    %cst_53 = arith.constant 1.000000e+00 : f32
    %182 = vector.broadcast %cst_53 : f32 to vector<1x128xf32>
    %183 = arith.subf %182, %176 : vector<1x128xf32>
    %184 = arith.mulf %183, %181 : vector<1x128xf32>
    %185 = arith.mulf %176, %158 : vector<1x128xf32>
    %186 = arith.addf %184, %185 : vector<1x128xf32>
    %187 = tpu.concatenate %150, %186 in 1 : vector<1x128xf32>, vector<1x128xf32> -> vector<1x256xf32>
    %c0_54 = arith.constant 0 : index
    %c0_55 = arith.constant 0 : index
    %188 = vector.load %arg14[%c0_54, %c0_55] : memref<256x8xf32, #tpu.memory_space<vmem>>, vector<256x8xf32>
    %cst_56 = arith.constant dense<0.000000e+00> : vector<1x8xf32>
    %189 = tpu.matmul %187, %188, %cst_56 {dimension_numbers = #tpu.dot_dimension_numbers<[1], [0], [0], [1], [0, 0, 1, 1], [], []>} : vector<1x256xf32>, vector<256x8xf32>, vector<1x8xf32> -> vector<1x8xf32>
    %c0_57 = arith.constant 0 : index
    %c0_58 = arith.constant 0 : index
    %190 = vector.load %arg15[%c0_57, %c0_58] : memref<1x8xf32, #tpu.memory_space<vmem>>, vector<1x8xf32>
    %191 = arith.addf %189, %190 : vector<1x8xf32>
    %c0_59 = arith.constant 0 : index
    %c0_60 = arith.constant 0 : index
    %c0_61 = arith.constant 0 : index
    %192 = vector.load %arg16[%c0_59, %c0_60, %c0_61] : memref<1x1x8xf32, #tpu.memory_space<vmem>>, vector<1x1x8xf32>
    %193 = vector.shape_cast %192 : vector<1x1x8xf32> to vector<1x8xf32>
    %194 = vector.shape_cast %191 : vector<1x8xf32> to vector<1x1x8xf32>
    tpu.vector_store %arg16[%c0_59, %c0_60, %c0_61], %194 {strides = array<i32>} : memref<1x1x8xf32, #tpu.memory_space<vmem>>, vector<1x1x8xf32>,
    return
  }
  func.func @transform_0(%arg0: i32) -> (i32, i32, i32) {
    %c0_i32 = arith.constant 0 : i32
    %c0_i32_0 = arith.constant 0 : i32
    %c0_i32_1 = arith.constant 0 : i32
    return %arg0, %c0_i32, %c0_i32_0 : i32, i32, i32
  }
  func.func @transform_1(%arg0: i32) -> (i32, i32, i32) {
    %c0_i32 = arith.constant 0 : i32
    %c0_i32_0 = arith.constant 0 : i32
    %c0_i32_1 = arith.constant 0 : i32
    return %arg0, %c0_i32, %c0_i32_0 : i32, i32, i32
  }
  func.func @transform_2(%arg0: i32) -> (i32, i32) {
    %c0_i32 = arith.constant 0 : i32
    %c0_i32_0 = arith.constant 0 : i32
    %c0_i32_1 = arith.constant 0 : i32
    return %c0_i32, %c0_i32_0 : i32, i32
  }
  func.func @transform_3(%arg0: i32) -> (i32, i32) {
    %c0_i32 = arith.constant 0 : i32
    %c0_i32_0 = arith.constant 0 : i32
    %c0_i32_1 = arith.constant 0 : i32
    return %c0_i32, %c0_i32_0 : i32, i32
  }
  func.func @transform_4(%arg0: i32) -> (i32, i32) {
    %c0_i32 = arith.constant 0 : i32
    %c0_i32_0 = arith.constant 0 : i32
    %c0_i32_1 = arith.constant 0 : i32
    return %c0_i32, %c0_i32_0 : i32, i32
  }
  func.func @transform_5(%arg0: i32) -> (i32, i32) {
    %c0_i32 = arith.constant 0 : i32
    %c0_i32_0 = arith.constant 0 : i32
    %c0_i32_1 = arith.constant 0 : i32
    return %c0_i32, %c0_i32_0 : i32, i32
  }
  func.func @transform_6(%arg0: i32) -> (i32, i32) {
    %c0_i32 = arith.constant 0 : i32
    %c0_i32_0 = arith.constant 0 : i32
    %c0_i32_1 = arith.constant 0 : i32
    return %c0_i32, %c0_i32_0 : i32, i32
  }
  func.func @transform_7(%arg0: i32) -> (i32, i32) {
    %c0_i32 = arith.constant 0 : i32
    %c0_i32_0 = arith.constant 0 : i32
    %c0_i32_1 = arith.constant 0 : i32
    return %c0_i32, %c0_i32_0 : i32, i32
  }
  func.func @transform_8(%arg0: i32) -> (i32, i32) {
    %c0_i32 = arith.constant 0 : i32
    %c0_i32_0 = arith.constant 0 : i32
    %c0_i32_1 = arith.constant 0 : i32
    return %c0_i32, %c0_i32_0 : i32, i32
  }
  func.func @transform_9(%arg0: i32) -> (i32, i32) {
    %c0_i32 = arith.constant 0 : i32
    %c0_i32_0 = arith.constant 0 : i32
    %c0_i32_1 = arith.constant 0 : i32
    return %c0_i32, %c0_i32_0 : i32, i32
  }
  func.func @transform_10(%arg0: i32) -> (i32, i32) {
    %c0_i32 = arith.constant 0 : i32
    %c0_i32_0 = arith.constant 0 : i32
    %c0_i32_1 = arith.constant 0 : i32
    return %c0_i32, %c0_i32_0 : i32, i32
  }
  func.func @transform_11(%arg0: i32) -> (i32, i32) {
    %c0_i32 = arith.constant 0 : i32
    %c0_i32_0 = arith.constant 0 : i32
    %c0_i32_1 = arith.constant 0 : i32
    return %c0_i32, %c0_i32_0 : i32, i32
  }
  func.func @transform_12(%arg0: i32) -> (i32, i32) {
    %c0_i32 = arith.constant 0 : i32
    %c0_i32_0 = arith.constant 0 : i32
    %c0_i32_1 = arith.constant 0 : i32
    return %c0_i32, %c0_i32_0 : i32, i32
  }
  func.func @transform_13(%arg0: i32) -> (i32, i32) {
    %c0_i32 = arith.constant 0 : i32
    %c0_i32_0 = arith.constant 0 : i32
    %c0_i32_1 = arith.constant 0 : i32
    return %c0_i32, %c0_i32_0 : i32, i32
  }
  func.func @transform_14(%arg0: i32) -> (i32, i32) {
    %c0_i32 = arith.constant 0 : i32
    %c0_i32_0 = arith.constant 0 : i32
    %c0_i32_1 = arith.constant 0 : i32
    return %c0_i32, %c0_i32_0 : i32, i32
  }
  func.func @transform_15(%arg0: i32) -> (i32, i32, i32) {
    %c0_i32 = arith.constant 0 : i32
    %c0_i32_0 = arith.constant 0 : i32
    %c0_i32_1 = arith.constant 0 : i32
    return %arg0, %c0_i32, %c0_i32_0 : i32, i32, i32
  }
}

</mosaic_0001>

<bundles_post_ra>
// kernel: tpu_custom_call.1
= control target key start
LH: loop header
LB: loop body
LE: loop exit
PB: predicated region body
PF: predicated region fallthrough
CT: control target
= control target key end

     0   :  { %s6500_s0 = inlined_call_operand.vmem [shape: s32[2,16,1], index: 0, kind: input, shape index: {}]   ;;  %s6501_s1 = inlined_call_operand.vmem [shape: f32[2,16,1], index: 1, kind: input, shape index: {}]   ;;  %s6502_s2 = inlined_call_operand.hbm [shape: f32[64,768], index: 2, kind: input, shape index: {}]   ;;  %s6503_s3 = inlined_call_operand.hbm [shape: f32[768,384], index: 3, kind: input, shape index: {}]   ;;  %s6504_s4 = inlined_call_operand.hbm [shape: f32[1,128], index: 4, kind: input, shape index: {}]   ;;  %s6505_s5 = inlined_call_operand.hbm [shape: f32[128,384], index: 5, kind: input, shape index: {}]   ;;  %s6506_s6 = inlined_call_operand.hbm [shape: f32[128,384], index: 6, kind: input, shape index: {}]   ;;  %s6507_s7 = inlined_call_operand.hbm [shape: f32[1,384], index: 7, kind: input, shape index: {}]   ;;  %s6508_s8 = inlined_call_operand.hbm [shape: f32[1,384], index: 8, kind: input, shape index: {}]   ;;  %s6509_s9 = inlined_call_operand.hbm [shape: f32[128,384], index: 9, kind: input, shape index: {}]   ;;  %s6510_s10 = inlined_call_operand.hbm [shape: f32[128,384], index: 10, kind: input, shape index: {}]   ;;  %s6511_s11 = inlined_call_operand.hbm [shape: f32[1,384], index: 11, kind: input, shape index: {}]   ;;  %s6512_s12 = inlined_call_operand.hbm [shape: f32[1,384], index: 12, kind: input, shape index: {}]   ;;  %s6513_s13 = inlined_call_operand.vmem [shape: f32[256,8], index: 13, kind: input, shape index: {}]   ;;  %s6514_s14 = inlined_call_operand.hbm [shape: f32[1,8], index: 14, kind: input, shape index: {}]   ;;  %s6515_s15 = inlined_call_operand.hbm [shape: f32[2,1,8], index: 15, kind: output, shape index: {}]  }
   0x1   :  { %6534 = sst [smem:[#allocation39_spill]] %s6501_s1 }
   0x2   :  { %6535 = sst [smem:[#allocation40_spill]] %s6503_s3 }
   0x3   :  { %6536 = sst [smem:[#allocation41_spill]] %s6513_s13 }
   0x4   :  { %6537 = sst [smem:[#allocation42_spill]] %s6515_s15 }
   0x5   :  { %20 = vsyncpa [#allocation3], 0 }
   0x6   :  { %21 = vsyncpa [#allocation6], 0 }
   0x7   :  { %22 = vsyncpa [#allocation9], 0 }
   0x8   :  { %23 = vsyncpa [#allocation12], 0 }
   0x9   :  { %24 = vsyncpa [#allocation15], 0 }
   0xa   :  { %25 = vsyncpa [#allocation18], 0 }
   0xb   :  { %26 = vsyncpa [#allocation21], 0 }
   0xc   :  { %27 = vsyncpa [#allocation4], 0 }
   0xd   :  { %29 = vsyncpa [#allocation4 + $0x1], 0  ;;  %s5615_s18 = smov 0   ;;  %s5617_s19 = smov 0  }
   0xe   :  { %s5619_s20 = smov 0   ;;  %s5621_s21 = smov 0  }
   0xf LB: > { %6538 = sst [smem:[#allocation31_spill]] %s5499_s18  ;;  %s5636_s22 = sadd.s32 4294967295, %s5511_s21   ;;  %s5511_s21 = sphi %s5621_s21, %s6579_s21   ;;  %s5507_s20 = sphi %s5619_s20, %s6582_s20   ;;  %s5503_s19 = sphi %s5617_s19, %s6581_s19   ;;  %s5499_s18 = sphi %s5615_s18, %s6580_s18  }
  0x10   : > { %6539 = sst [smem:[#allocation32_spill]] %s5503_s19  ;;  %s3520_s23 = sadd.s32 4294967294, %s5511_s21  }
  0x11   : > { %6540 = sst [smem:[#allocation33_spill]] %s5507_s20  ;;  %s5640_s24 = sadd.s32 1, %s5511_s21  }
  0x12   : > { %6541 = sst [smem:[#allocation34_spill]] %s5511_s21  ;;  %s367_s25 = sadd.s32 1, %s5507_s20 }
  0x13   : > { %6542 = sst [smem:[#allocation35_spill]] %s5640_s24  ;;  %s364_s26 = ssub.s32 %s5511_s21, %s5640_s24 }
  0x14   : > { %p377_p0 = scmp.ne.s32.totalorder %s5507_s20, %s5503_s19  ;;  %p365_p1 = scmp.eq.s32.totalorder %s364_s26, 0 }
  0x15   : > { %p378_p2 = scmp.eq.s32.totalorder %s5636_s22, 1  ;;  %p383_p3 = scmp.ne.s32.totalorder %s5503_s19, %s5499_s18 }
  0x16   : > { %p384_p4 = scmp.eq.s32.totalorder %s3520_s23, 1  ;;  %p3521_p7 = scmp.ge.s32.totalorder %s5511_s21, 1 }
  0x17   : > { %s5651_s27 = scalar_select %p365_p1, %s5507_s20, %s367_s25  }
  0x18   : > { %p5653_p5 = por %p378_p2, %p377_p0  ;;  %p5657_p6 = por %p384_p4, %p383_p3 }
  0x19   : > { %6543 = sst [smem:[#allocation36_spill]] %s5651_s27  ;;  %p391_p8 = scmp.lt.s32.totalorder %s5511_s21, 3 }
  0x1a   : > { %s6544_s28 = scalar_select %p5653_p5, 1, 0 }
  0x1b   : > { %s6546_s29 = scalar_select %p5657_p6, 1, 0 }
  0x1c   : > { %6545 = sst [smem:[#allocation37_spill]] %s6544_s28  ;;  %p6523_p9 = scmp.eq.s32.totalorder %s5636_s22, 0 }
  0x1d   : > { %6547 = sst [smem:[#allocation38_spill]] %s6546_s29  ;;  %p5664_p10 = pnand %p3521_p7, %p391_p8 }
  0x1e   : > { %s5513_s16 = smov [#allocation5]   ;;  %s5514_s25 = smov [#allocation8]  }
  0x1f   : > { %s6548_s30 = scalar_select %p5664_p10, 1, 0 }
  0x20   : > { %s416_s17 = sshll.u32 %s5513_s16, 4  ;;  %p4914_p11 = pneg %p5664_p10  ;;  %s5670_s17 = int_to_ptr.vmem [resolvable:$true] %s416_s17 }
  0x21   : > { %s440_s26 = sshll.u32 %s5514_s25, 4  ;;  %s5515_s27 = smov [#allocation11]   ;;  %s5678_s26 = int_to_ptr.vmem [resolvable:$true] %s440_s26 }
  0x22   : > { %p5674_p12 = pnand %p6523_p9, %p4914_p11  ;;  %s5680_s20 = sshll.u32 %s5515_s27, 4  ;;  %s468_s20 = int_to_ptr.vmem [resolvable:$true] %s5680_s20 }
  0x23   : > { %s6550_s3 = sld [smem:[#allocation40_spill]] }
  0x24   : > { %p5690_p0 = pneg %p5674_p12 }
  0x29   : > { %s5085_s16 = scalar_lea.hbm %s6550_s3, 36864 }
  0x2a   : > { %p5086_p13 = scmp.ne.s32.totalorder %s6550_s3, %s5085_s16  ;;  %p5092_p3 = scmp.lt.u32.totalorder %s5085_s16, %s6550_s3 }
  0x2c   : > { %p5088_p1 = pnand %p5690_p0, %p5086_p13 }
  0x2e   : > { %p5089_p2 = pneg %p5088_p1 }
  0x30   : > { %p5094_p4 = pnand %p5092_p3, %p5089_p2 }
  0x32   : > { %5097 = shalt.err (!%p5094_p4)
}
  0x33   : > { %s5098_s18 = scalar_lea.vmem %s5670_s17, 36864  ;;  %p5106_p9 = scmp.lt.s32.totalorder %s5670_s17, %s5670_s17 }
  0x34   : > { %p5099_p7 = scmp.ne.s32.totalorder %s5670_s17, %s5098_s18  ;;  %p5107_p6 = scmp.lt.s32.totalorder %s5098_s18, %s5098_s18 }
  0x36   : > { %p5101_p8 = pnand %p5099_p7, %p5690_p0  ;;  %p5108_p13 = por %p5107_p6, %p5106_p9 }
  0x38   : > { %p5102_p11 = pneg %p5101_p8 }
  0x3a   : > { %p5109_p1 = pnand %p5108_p13, %p5102_p11 }
  0x3c   : > { %5112 = shalt.err (!%p5109_p1)
}
  0x3d   : > { %s6530_s21 = smov 384   ;;  %s6532_s24 = smov 24  }
  0x3e   : > { %4920 = dma.hbm_to_vmem [thread:$0]  (!%p5674_p12), %s6550_s3, 36864, %s5670_s17, [#allocation6], %s6530_s21, %s6530_s21, %s6532_s24  }
  0x3f   : > { %s5113_s18 = scalar_lea.hbm %s6505_s5, 6144 }
  0x40   : > { %p5114_p6 = scmp.ne.s32.totalorder %s6505_s5, %s5113_s18  ;;  %p5120_p3 = scmp.lt.u32.totalorder %s5113_s18, %s6505_s5 }
  0x42   : > { %p5116_p9 = pnand %p5114_p6, %p5690_p0 }
  0x44   : > { %p5117_p2 = pneg %p5116_p9 }
  0x46   : > { %p5122_p4 = pnand %p5120_p3, %p5117_p2 }
  0x48   : > { %5125 = shalt.err (!%p5122_p4)
}
  0x49   : > { %s5126_s17 = scalar_lea.vmem %s5678_s26, 6144  ;;  %p5134_p13 = scmp.lt.s32.totalorder %s5678_s26, %s5678_s26 }
  0x4a   : > { %p5127_p7 = scmp.ne.s32.totalorder %s5678_s26, %s5126_s17  ;;  %p5135_p1 = scmp.lt.s32.totalorder %s5126_s17, %s5126_s17 }
  0x4c   : > { %p5129_p8 = pnand %p5127_p7, %p5690_p0  ;;  %p5136_p6 = por %p5135_p1, %p5134_p13 }
  0x4e   : > { %p5130_p11 = pneg %p5129_p8 }
  0x50   : > { %p5137_p9 = pnand %p5136_p6, %p5130_p11 }
  0x52   : > { %5140 = shalt.err (!%p5137_p9)
}
  0x53   : > { %4926 = dma.hbm_to_vmem [thread:$0]  (!%p5674_p12), %s6505_s5, 6144, %s5678_s26, [#allocation9], %s6530_s21, %s6530_s21, %s6532_s24  }
  0x54   : > { %s5141_s29 = scalar_lea.hbm %s6507_s7, 48 }
  0x55   : > { %p5142_p2 = scmp.ne.s32.totalorder %s6507_s7, %s5141_s29  ;;  %p5148_p7 = scmp.lt.u32.totalorder %s5141_s29, %s6507_s7 }
  0x57   : > { %p5144_p3 = pnand %p5142_p2, %p5690_p0 }
  0x59   : > { %p5145_p4 = pneg %p5144_p3 }
  0x5b   : > { %p5150_p8 = pnand %p5148_p7, %p5145_p4 }
  0x5d   : > { %5153 = shalt.err (!%p5150_p8)
}
  0x5e   : > { %s5154_s17 = scalar_lea.vmem %s468_s20, 48  ;;  %s5161_s26 = scalar_lea.vmem %s468_s20, 64 }
  0x5f   : > { %p5155_p11 = scmp.ne.s32.totalorder %s468_s20, %s5154_s17  ;;  %p5162_p6 = scmp.lt.s32.totalorder %s468_s20, %s468_s20 }
  0x60   : > { %p5163_p9 = scmp.lt.s32.totalorder %s5161_s26, %s5154_s17 }
  0x61   : > { %p5157_p13 = pnand %p5155_p11, %p5690_p0 }
  0x62   : > { %p5164_p5 = por %p5163_p9, %p5162_p6 }
  0x63   : > { %p5158_p1 = pneg %p5157_p13 }
  0x65   : > { %p5165_p10 = pnand %p5164_p5, %p5158_p1 }
  0x67   : > { %5168 = shalt.err (!%p5165_p10)
}
  0x68   : > { %4932 = dma.hbm_to_vmem [thread:$0]  (!%p5674_p12), %s6507_s7, 48, %s468_s20, [#allocation12]  }
  0x69   : > { %s5518_s19 = smov [#allocation14]   ;;  %s5519_s29 = smov [#allocation17]  }
  0x6a   : > { %s488_s28 = sshll.u32 %s5518_s19, 4  ;;  %s515_s16 = sshll.u32 %s5519_s29, 4  ;;  %s489_s28 = int_to_ptr.vmem [resolvable:$true] %s488_s28  ;;  %s516_s16 = int_to_ptr.vmem [resolvable:$true] %s515_s16 }
  0x6b   : > { %s5169_s18 = scalar_lea.hbm %s6509_s9, 6144 }
  0x6c   : > { %p5170_p5 = scmp.ne.s32.totalorder %s6509_s9, %s5169_s18  ;;  %p5176_p3 = scmp.lt.u32.totalorder %s5169_s18, %s6509_s9 }
  0x6e   : > { %p5172_p10 = pnand %p5170_p5, %p5690_p0 }
  0x70   : > { %p5173_p2 = pneg %p5172_p10 }
  0x72   : > { %p5178_p4 = pnand %p5176_p3, %p5173_p2 }
  0x74   : > { %5181 = shalt.err (!%p5178_p4)
}
  0x75   : > { %s5182_s20 = scalar_lea.vmem %s489_s28, 6144  ;;  %p5190_p13 = scmp.lt.s32.totalorder %s489_s28, %s489_s28 }
  0x76   : > { %p5183_p7 = scmp.ne.s32.totalorder %s489_s28, %s5182_s20  ;;  %p5191_p1 = scmp.lt.s32.totalorder %s5182_s20, %s5182_s20 }
  0x78   : > { %p5185_p8 = pnand %p5183_p7, %p5690_p0  ;;  %p5192_p6 = por %p5191_p1, %p5190_p13 }
  0x7a   : > { %p5186_p11 = pneg %p5185_p8 }
  0x7c   : > { %p5193_p9 = pnand %p5192_p6, %p5186_p11 }
  0x7e   : > { %5196 = shalt.err (!%p5193_p9)
}
  0x7f   : > { %s6552_s13 = smov 384   ;;  %s5197_s27 = scalar_lea.hbm %s6511_s11, 48 }
  0x80   : > { %4938 = dma.hbm_to_vmem [thread:$0]  (!%p5674_p12), %s6509_s9, 6144, %s489_s28, [#allocation15], %s6552_s13, %s6552_s13, %s6532_s24  }
  0x81   : > { %p5198_p5 = scmp.ne.s32.totalorder %s6511_s11, %s5197_s27  ;;  %p5204_p3 = scmp.lt.u32.totalorder %s5197_s27, %s6511_s11 }
  0x83   : > { %p5200_p10 = pnand %p5198_p5, %p5690_p0 }
  0x85   : > { %p5201_p2 = pneg %p5200_p10 }
  0x87   : > { %p5206_p4 = pnand %p5204_p3, %p5201_p2 }
  0x89   : > { %5209 = shalt.err (!%p5206_p4)
}
  0x8a   : > { %s5210_s20 = scalar_lea.vmem %s516_s16, 48  ;;  %s5217_s28 = scalar_lea.vmem %s516_s16, 64 }
  0x8b   : > { %p5211_p7 = scmp.ne.s32.totalorder %s516_s16, %s5210_s20  ;;  %p5218_p13 = scmp.lt.s32.totalorder %s516_s16, %s516_s16 }
  0x8c   : > { %p5219_p1 = scmp.lt.s32.totalorder %s5217_s28, %s5210_s20 }
  0x8d   : > { %p5213_p8 = pnand %p5211_p7, %p5690_p0 }
  0x8e   : > { %p5220_p6 = por %p5219_p1, %p5218_p13 }
  0x8f   : > { %p5214_p11 = pneg %p5213_p8 }
  0x91   : > { %p5221_p9 = pnand %p5220_p6, %p5214_p11 }
  0x93   : > { %5224 = shalt.err (!%p5221_p9)
}
  0x94   : > { %4944 = dma.hbm_to_vmem [thread:$0]  (!%p5674_p12), %s6511_s11, 48, %s516_s16, [#allocation18]  }
  0x95   : > { %s5520_s29 = smov [#allocation2]   ;;  %s5225_s17 = scalar_lea.hbm %s6502_s2, 6144 }
  0x96   : > { %s403_s25 = sshll.u32 %s5520_s29, 4  ;;  %p5226_p5 = scmp.ne.s32.totalorder %s6502_s2, %s5225_s17  ;;  %s404_s25 = int_to_ptr.vmem [resolvable:$true] %s403_s25 }
  0x97   : > { %p5232_p3 = scmp.lt.u32.totalorder %s5225_s17, %s6502_s2 }
  0x98   : > { %p5228_p10 = pnand %p5226_p5, %p5690_p0 }
  0x9a   : > { %p5229_p2 = pneg %p5228_p10 }
  0x9c   : > { %p5234_p4 = pnand %p5232_p3, %p5229_p2 }
  0x9e   : > { %5237 = shalt.err (!%p5234_p4)
}
  0x9f   : > { %s5238_s16 = scalar_lea.vmem %s404_s25, 6144  ;;  %p5246_p13 = scmp.lt.s32.totalorder %s404_s25, %s404_s25 }
  0xa0   : > { %p5239_p7 = scmp.ne.s32.totalorder %s404_s25, %s5238_s16  ;;  %p5247_p1 = scmp.lt.s32.totalorder %s5238_s16, %s5238_s16 }
  0xa2   : > { %p5241_p8 = pnand %p5239_p7, %p5690_p0  ;;  %p5248_p6 = por %p5247_p1, %p5246_p13 }
  0xa4   : > { %p5242_p11 = pneg %p5241_p8 }
  0xa6   : > { %p5249_p9 = pnand %p5248_p6, %p5242_p11 }
  0xa8   : > { %5252 = shalt.err (!%p5249_p9)
}
  0xa9   : > { %s5521_s21 = smov 768   ;;  %s5522_s19 = smov 48  }
  0xaa   : > { %4917 = dma.hbm_to_vmem [thread:$0]  (!%p5674_p12), %s6502_s2, 6144, %s404_s25, [#allocation3], %s5521_s21, %s5521_s21, %s5522_s19  }
  0xab   : > { %s5523_s18 = smov [#allocation7]   ;;  %s5524_s26 = smov [#allocation10]  }
  0xac   : > { %s430_s17 = sshll.u32 %s5523_s18, 4  ;;  %s453_s1 = sshll.u32 %s5524_s26, 4  ;;  %s431_s17 = int_to_ptr.vmem [resolvable:$true] %s430_s17  ;;  %s5816_s1 = int_to_ptr.vmem [resolvable:$true] %s453_s1 }
  0xad   : > { %s5253_s16 = scalar_lea.hbm %s6504_s4, 16 }
  0xae   : > { %p5254_p5 = scmp.ne.s32.totalorder %s6504_s4, %s5253_s16  ;;  %p5260_p3 = scmp.lt.u32.totalorder %s5253_s16, %s6504_s4 }
  0xb0   : > { %p5256_p10 = pnand %p5254_p5, %p5690_p0 }
  0xb2   : > { %p5257_p2 = pneg %p5256_p10 }
  0xb4   : > { %p5262_p4 = pnand %p5260_p3, %p5257_p2 }
  0xb6   : > { %5265 = shalt.err (!%p5262_p4)
}
  0xb7   : > { %s5266_s21 = scalar_lea.vmem %s431_s17, 16  ;;  %s5273_s19 = scalar_lea.vmem %s431_s17, 32 }
  0xb8   : > { %p5267_p7 = scmp.ne.s32.totalorder %s431_s17, %s5266_s21  ;;  %p5274_p13 = scmp.lt.s32.totalorder %s431_s17, %s431_s17 }
  0xb9   : > { %p5275_p1 = scmp.lt.s32.totalorder %s5273_s19, %s5266_s21 }
  0xba   : > { %p5269_p8 = pnand %p5267_p7, %p5690_p0 }
  0xbb   : > { %p5276_p6 = por %p5275_p1, %p5274_p13 }
  0xbc   : > { %p5270_p11 = pneg %p5269_p8 }
  0xbe   : > { %p5277_p9 = pnand %p5276_p6, %p5270_p11 }
  0xc0   : > { %5280 = shalt.err (!%p5277_p9)
}
  0xc1   : > { %4923 = dma.hbm_to_vmem [thread:$0]  (!%p5674_p12), %s6504_s4, 16, %s431_s17, [#allocation6]  }
  0xc2   : > { %s5281_s26 = scalar_lea.hbm %s6506_s6, 6144 }
  0xc3   : > { %p5282_p5 = scmp.ne.s32.totalorder %s6506_s6, %s5281_s26  ;;  %p5288_p3 = scmp.lt.u32.totalorder %s5281_s26, %s6506_s6 }
  0xc5   : > { %p5284_p10 = pnand %p5282_p5, %p5690_p0 }
  0xc7   : > { %p5285_p2 = pneg %p5284_p10 }
  0xc9   : > { %p5290_p4 = pnand %p5288_p3, %p5285_p2 }
  0xcb   : > { %5293 = shalt.err (!%p5290_p4)
}
  0xcc   : > { %s5294_s17 = scalar_lea.vmem %s5816_s1, 6144  ;;  %p5302_p13 = scmp.lt.s32.totalorder %s5816_s1, %s5816_s1 }
  0xcd   : > { %p5295_p7 = scmp.ne.s32.totalorder %s5816_s1, %s5294_s17  ;;  %p5303_p1 = scmp.lt.s32.totalorder %s5294_s17, %s5294_s17 }
  0xcf   : > { %p5297_p8 = pnand %p5295_p7, %p5690_p0  ;;  %p5304_p6 = por %p5303_p1, %p5302_p13 }
  0xd1   : > { %p5298_p11 = pneg %p5297_p8 }
  0xd3   : > { %p5305_p9 = pnand %p5304_p6, %p5298_p11 }
  0xd5   : > { %5308 = shalt.err (!%p5305_p9)
}
  0xd6   : > { %s6553_s25 = smov 24   ;;  %s5525_s3 = smov [#allocation13]  }
  0xd7   : > { %4929 = dma.hbm_to_vmem [thread:$0]  (!%p5674_p12), %s6506_s6, 6144, %s5816_s1, [#allocation9], %s6552_s13, %s6552_s13, %s6553_s25  }
  0xd8   : > { %s478_s24 = sshll.u32 %s5525_s3, 4  ;;  %s5526_s27 = smov [#allocation16]   ;;  %s479_s24 = int_to_ptr.vmem [resolvable:$true] %s478_s24 }
  0xd9   : > { %s501_s18 = sshll.u32 %s5526_s27, 4  ;;  %s5309_s28 = scalar_lea.hbm %s6508_s8, 48  ;;  %s5862_s18 = int_to_ptr.vmem [resolvable:$true] %s501_s18 }
  0xda   : > { %p5310_p5 = scmp.ne.s32.totalorder %s6508_s8, %s5309_s28  ;;  %p5316_p3 = scmp.lt.u32.totalorder %s5309_s28, %s6508_s8 }
  0xdc   : > { %p5312_p10 = pnand %p5310_p5, %p5690_p0 }
  0xde   : > { %p5313_p2 = pneg %p5312_p10 }
  0xe0   : > { %p5318_p4 = pnand %p5316_p3, %p5313_p2 }
  0xe2   : > { %5321 = shalt.err (!%p5318_p4)
}
  0xe3   : > { %s5322_s21 = scalar_lea.vmem %s479_s24, 48  ;;  %s5329_s19 = scalar_lea.vmem %s479_s24, 64 }
  0xe4   : > { %p5323_p7 = scmp.ne.s32.totalorder %s479_s24, %s5322_s21  ;;  %p5330_p13 = scmp.lt.s32.totalorder %s479_s24, %s479_s24 }
  0xe5   : > { %p5331_p1 = scmp.lt.s32.totalorder %s5329_s19, %s5322_s21 }
  0xe6   : > { %p5325_p8 = pnand %p5323_p7, %p5690_p0 }
  0xe7   : > { %p5332_p6 = por %p5331_p1, %p5330_p13 }
  0xe8   : > { %p5326_p11 = pneg %p5325_p8 }
  0xea   : > { %p5333_p9 = pnand %p5332_p6, %p5326_p11 }
  0xec   : > { %5336 = shalt.err (!%p5333_p9)
}
  0xed   : > { %4935 = dma.hbm_to_vmem [thread:$0]  (!%p5674_p12), %s6508_s8, 48, %s479_s24, [#allocation12]  }
  0xee   : > { %s5337_s28 = scalar_lea.hbm %s6510_s10, 6144 }
  0xef   : > { %p5338_p5 = scmp.ne.s32.totalorder %s6510_s10, %s5337_s28  ;;  %p5344_p3 = scmp.lt.u32.totalorder %s5337_s28, %s6510_s10 }
  0xf1   : > { %p5340_p10 = pnand %p5338_p5, %p5690_p0 }
  0xf3   : > { %p5341_p2 = pneg %p5340_p10 }
  0xf5   : > { %p5346_p4 = pnand %p5344_p3, %p5341_p2 }
  0xf7   : > { %5349 = shalt.err (!%p5346_p4)
}
  0xf8   : > { %s5350_s24 = scalar_lea.vmem %s5862_s18, 6144  ;;  %p5358_p13 = scmp.lt.s32.totalorder %s5862_s18, %s5862_s18 }
  0xf9   : > { %p5351_p7 = scmp.ne.s32.totalorder %s5862_s18, %s5350_s24  ;;  %p5359_p1 = scmp.lt.s32.totalorder %s5350_s24, %s5350_s24 }
  0xfb   : > { %p5353_p8 = pnand %p5351_p7, %p5690_p0  ;;  %p5360_p6 = por %p5359_p1, %p5358_p13 }
  0xfd   : > { %p5354_p11 = pneg %p5353_p8 }
  0xff   : > { %p5361_p9 = pnand %p5360_p6, %p5354_p11 }
 0x101   : > { %5364 = shalt.err (!%p5361_p9)
}
 0x102   : > { %4941 = dma.hbm_to_vmem [thread:$0]  (!%p5674_p12), %s6510_s10, 6144, %s5862_s18, [#allocation15], %s6552_s13, %s6552_s13, %s6553_s25  }
 0x103   : > { %s5527_s3 = smov [#allocation19]   ;;  %s5528_s26 = smov [#allocation20]  }
 0x104   : > { %s526_s27 = sshll.u32 %s5527_s3, 4  ;;  %s540_s20 = sshll.u32 %s5528_s26, 4  ;;  %s527_s27 = int_to_ptr.vmem [resolvable:$true] %s526_s27  ;;  %s5908_s20 = int_to_ptr.vmem [resolvable:$true] %s540_s20 }
 0x105   : > { %s5365_s29 = scalar_lea.hbm %s6512_s12, 48 }
 0x106   : > { %p5366_p5 = scmp.ne.s32.totalorder %s6512_s12, %s5365_s29  ;;  %p5372_p3 = scmp.lt.u32.totalorder %s5365_s29, %s6512_s12 }
 0x108   : > { %p5368_p10 = pnand %p5366_p5, %p5690_p0 }
 0x10a   : > { %p5369_p2 = pneg %p5368_p10 }
 0x10c   : > { %p5374_p4 = pnand %p5372_p3, %p5369_p2 }
 0x10e   : > { %5377 = shalt.err (!%p5374_p4)
}
 0x10f   : > { %s5378_s25 = scalar_lea.vmem %s527_s27, 48  ;;  %s5385_s18 = scalar_lea.vmem %s527_s27, 64 }
 0x110   : > { %p5379_p7 = scmp.ne.s32.totalorder %s527_s27, %s5378_s25  ;;  %p5386_p13 = scmp.lt.s32.totalorder %s527_s27, %s527_s27 }
 0x111   : > { %p5387_p1 = scmp.lt.s32.totalorder %s5385_s18, %s5378_s25 }
 0x112   : > { %p5381_p8 = pnand %p5379_p7, %p5690_p0 }
 0x113   : > { %p5388_p6 = por %p5387_p1, %p5386_p13 }
 0x114   : > { %p5382_p11 = pneg %p5381_p8 }
 0x116   : > { %p5389_p9 = pnand %p5388_p6, %p5382_p11 }
 0x118   : > { %5392 = shalt.err (!%p5389_p9)
}
 0x119   : > { %4947 = dma.hbm_to_vmem [thread:$0]  (!%p5674_p12), %s6512_s12, 48, %s527_s27, [#allocation18]  }
 0x11a   : > { %s5393_s28 = scalar_lea.hbm %s6514_s14, 16 }
 0x11b   : > { %p5394_p5 = scmp.ne.s32.totalorder %s6514_s14, %s5393_s28  ;;  %p5400_p3 = scmp.lt.u32.totalorder %s5393_s28, %s6514_s14 }
 0x11d   : > { %p5396_p10 = pnand %p5394_p5, %p5690_p0 }
 0x11f   : > { %p5397_p2 = pneg %p5396_p10 }
 0x121   : > { %p5402_p4 = pnand %p5400_p3, %p5397_p2 }
 0x123   : > { %5405 = shalt.err (!%p5402_p4)
}
 0x124   : > { %s5406_s27 = scalar_lea.vmem %s5908_s20, 16  ;;  %s5413_s24 = scalar_lea.vmem %s5908_s20, 32 }
 0x125   : > { %p5407_p7 = scmp.ne.s32.totalorder %s5908_s20, %s5406_s27  ;;  %p5414_p13 = scmp.lt.s32.totalorder %s5908_s20, %s5908_s20 }
 0x126   : > { %p5415_p1 = scmp.lt.s32.totalorder %s5413_s24, %s5406_s27 }
 0x127   : > { %p5409_p8 = pnand %p5407_p7, %p5690_p0 }
 0x128   : > { %p5416_p6 = por %p5415_p1, %p5414_p13 }
 0x129   : > { %p5410_p11 = pneg %p5409_p8 }
 0x12b   : > { %p5417_p9 = pnand %p5416_p6, %p5410_p11 }
 0x12d   : > { %5420 = shalt.err (!%p5417_p9)
}
 0x12e   : > { %4950 = dma.hbm_to_vmem [thread:$0]  (!%p5674_p12), %s6514_s14, 16, %s5908_s20, [#allocation21]  }
 0x12f   : > { %p6554_p5 = scmp.ne.s32.totalorder %s6548_s30, 0 }
 0x130   : > { %p6555_p0 = scmp.eq.s32.totalorder (!%p6554_p5), %s5636_s22, 0 }
 0x131   : > { %569 = sbr.rel (%p6554_p5) target bundleno = 2472 (0x9a8), region = 80 }
 0x138   : > { %5466 = dma.done.wait (%p6555_p0), [#allocation3], 6144   ;;  %p6556_p10 = pmov %p6555_p0 }
 0x139   : > { %p6557_p2 = pmov %p6555_p0 }
 0x13a   : > { %5468 = vsyncadd (%p6556_p10), [#allocation3], 4294961152 }
 0x13b   : > { %5470 = dma.done.wait (%p6557_p2), [#allocation6], 36880   ;;  %p6558_p3 = pmov %p6555_p0 }
 0x13c   : > { %p6559_p4 = pmov %p6555_p0 }
 0x13d   : > { %5472 = vsyncadd (%p6558_p3), [#allocation6], 4294930416 }
 0x13e   : > { %5474 = dma.done.wait (%p6559_p4), [#allocation9], 12288   ;;  %p6560_p12 = pmov %p6555_p0 }
 0x13f   : > { %p6561_p7 = pmov %p6555_p0 }
 0x140   : > { %5476 = vsyncadd (%p6560_p12), [#allocation9], 4294955008 }
 0x141   : > { %5478 = dma.done.wait (%p6561_p7), [#allocation12], 96   ;;  %p6562_p8 = pmov %p6555_p0 }
 0x142   : > { %p6563_p11 = pmov %p6555_p0 }
 0x143   : > { %5480 = vsyncadd (%p6562_p8), [#allocation12], 4294967200 }
 0x144   : > { %5482 = dma.done.wait (%p6563_p11), [#allocation15], 12288   ;;  %p6564_p13 = pmov %p6555_p0 }
 0x145   : > { %p6565_p1 = pmov %p6555_p0 }
 0x146   : > { %5484 = vsyncadd (%p6564_p13), [#allocation15], 4294955008 }
 0x147   : > { %5486 = dma.done.wait (%p6565_p1), [#allocation18], 96   ;;  %p6566_p6 = pmov %p6555_p0 }
 0x148   : > { %p6567_p9 = pmov %p6555_p0 }
 0x149   : > { %5488 = vsyncadd (%p6566_p6), [#allocation18], 4294967200 }
 0x14a   : > { %5490 = dma.done.wait (%p6567_p9), [#allocation21], 16   ;;  %p6568_p5 = pmov %p6555_p0 }
 0x14b   : > { %p665_p0 = scmp.lt.s32.totalorder %s5636_s22, 1  ;;  %v5529_v0 = vmov 0   ;;  %s6569_s3 = sld [smem:[#allocation39_spill]]  ;;  %v706_v5 = vld [vmem:[#allocation2 + $0x8] sm:$0xff]  ;;  %v712_v6 = vld [vmem:[#allocation2 + $0x38] sm:$0xff]  ;;  %v705_v8 = vld [vmem:[#allocation2] sm:$0xff]  ;;  %v679_v60 = vlaneseq }
 0x14c   : > { %5492 = vsyncadd (%p6568_p5), [#allocation21], 4294967280  ;;  %5033 = vset.pattern.permute.xlu0 %v5529_v0  ;;  %5034 = vset.pattern.permute.xlu1 %v5529_v0  ;;  %v4090_v7 = vpack.c.bf16 %v712_v6, %v706_v5  ;;  %v711_v9 = vld [vmem:[#allocation2 + $0x30] sm:$0xff]  ;;  %v708_v10 = vld [vmem:[#allocation2 + $0x18] sm:$0xff]  ;;  %v5530_v11 = vmov 0.0   ;;  %vm753_vm2 = vcmask 523264  }
 0x14d   : > { %s666_s15 = scalar_select %p665_p0, %s5636_s22, 1  ;;  %824 = vmatprep.mubr.f32.mxu0 %v5530_v11  ;;  %901 = vmatprep.mubr.f32.mxu1 %v5530_v11  ;;  %v4092_v12 = vpack.c.bf16 %v711_v9, %v705_v8  ;;  %v714_v13 = vld [vmem:[#allocation2 + $0x48] sm:$0xff]  ;;  %v707_v14 = vld [vmem:[#allocation2 + $0x10] sm:$0xff]  ;;  %v713_v15 = vld [vmem:[#allocation2 + $0x40] sm:$0xff]  ;;  %v680_v61 = vand.u32 127, %v679_v60  ;;  %vm5532_vm3 = vmmov 0  }
 0x14e   : > { %4091 = vmatprep.subr.bf16.mxu0 %v4090_v7  ;;  %v4106_v16 = vpack.c.bf16 %v714_v13, %v708_v10  ;;  %v4108_v17 = vpack.c.bf16 %v713_v15, %v707_v14  ;;  %v718_v18 = vld [vmem:[#allocation2 + $0x68] sm:$0xff]  ;;  %v724_v19 = vld [vmem:[#allocation2 + $0x98] sm:$0xff]  ;;  %v717_v20 = vld [vmem:[#allocation2 + $0x60] sm:$0xff]  ;;  %vm1742_vm4 = vcmask 1045504   ;;  %vm1734_vm5 = vcmask 1046528   ;;  %s6570_s29 = sld [smem:[#allocation41_spill]] }
 0x14f   : > { %s3575_s30 = sshll.u32 %s666_s15, 4  ;;  %v4094_v21 = vpack.c.bf16 %v724_v19, %v718_v18  ;;  %v723_v22 = vld [vmem:[#allocation2 + $0x90] sm:$0xff]  ;;  %v720_v23 = vld [vmem:[#allocation2 + $0x78] sm:$0xff]  ;;  %v726_v24 = vld [vmem:[#allocation2 + $0xa8] sm:$0xff]  ;;  %4093 = vmatpush1.bf16.msra.mxu0 %v4092_v12  ;;  %vm1779_vm6 = vcmask 1041408   ;;  %vm1926_vm7 = vcmask 1041409  }
 0x150   : > { %s669_s18 = scalar_lea.vmem %s6500_s0, %s3575_s30  ;;  %4107 = vmatprep.subr.bf16.mxu1 %v4106_v16  ;;  %v4096_v25 = vpack.c.bf16 %v723_v22, %v717_v20  ;;  %v4110_v26 = vpack.c.bf16 %v726_v24, %v720_v23  ;;  %v719_v27 = vld [vmem:[#allocation2 + $0x70] sm:$0xff]  ;;  %v725_v28 = vld [vmem:[#allocation2 + $0xa0] sm:$0xff]  ;;  %v730_v29 = vld [vmem:[#allocation2 + $0xc8] sm:$0xff]  ;;  %vm1928_vm8 = vcmask 1042434   ;;  %vm1930_vm9 = vcmask 1043459   ;;  %s6571_s21 = sld [smem:[#allocation32_spill]] }
 0x151   : > { %s674_s26 = scalar_lea.vmem %s6569_s3, %s3575_s30  ;;  %v675_v1 = vld [vmem:[%s669_s18] sm:$0xff]  ;;  %v676_v2 = vld [vmem:[%s669_s18 + $0x8] sm:$0xff]  ;;  %4109 = vmatpush1.bf16.msra.mxu1 %v4108_v17  ;;  %4095 = vmatprep.subr.bf16.mxu0 %v4094_v21  ;;  %v4112_v30 = vpack.c.bf16 %v725_v28, %v719_v27  ;;  %v736_v31 = vld [vmem:[#allocation2 + $0xf8] sm:$0xff]  ;;  %s6572_s3 = sld [smem:[#allocation37_spill]]  ;;  %vm3321_vm10 = vcmask 57344  }
 0x152   : > { %v677_v3 = vld [vmem:[%s674_s26] sm:$0xff]  ;;  %682 = vperm.xlu0 %5033, %v675_v1   ;;  %685 = vperm.xlu1 %5034, %v676_v2   ;;  %v678_v4 = vld [vmem:[%s674_s26 + $0x8] sm:$0xff]  ;;  %v735_v33 = vld [vmem:[#allocation2 + $0xf0] sm:$0xff]  ;;  %v4098_v34 = vpack.c.bf16 %v736_v31, %v730_v29  ;;  %s3572_s26 = sshll.u32 %s5636_s22, 4  ;;  %s6573_s27 = sld [smem:[#allocation42_spill]] }
 0x153   : > { %v729_v32 = vld [vmem:[#allocation2 + $0xc0] sm:$0xff]  ;;  %4111 = vmatprep.subr.bf16.mxu1 %v4110_v26  ;;  %v732_v35 = vld [vmem:[#allocation2 + $0xd8] sm:$0xff]  ;;  %v738_v36 = vld [vmem:[#allocation2 + $0x108] sm:$0xff]  ;;  %4097 = vmatpush1.bf16.msra.mxu0 %v4096_v25  ;;  %s5534_s22 = smov [#allocation22]  }
 0x154   : > { %v731_v37 = vld [vmem:[#allocation2 + $0xd0] sm:$0xff]  ;;  %v4114_v38 = vpack.c.bf16 %v738_v36, %v732_v35  ;;  %v737_v39 = vld [vmem:[#allocation2 + $0x100] sm:$0xff]  ;;  %v742_v40 = vld [vmem:[#allocation2 + $0x128] sm:$0xff]  ;;  %v4100_v42 = vpack.c.bf16 %v735_v33, %v729_v32  ;;  %4099 = vmatprep.subr.bf16.mxu0 %v4098_v34  ;;  %s5425_s15 = sshll.u32 %s5534_s22, 4  ;;  %s5426_s15 = int_to_ptr.vmem [resolvable:$false] %s5425_s15 }
 0x155   : > { %v748_v41 = vld [vmem:[#allocation2 + $0x158] sm:$0xff]  ;;  %v741_v43 = vld [vmem:[#allocation2 + $0x120] sm:$0xff]  ;;  %4113 = vmatpush1.bf16.msra.mxu1 %v4112_v30  ;;  %v4116_v45 = vpack.c.bf16 %v737_v39, %v731_v37  ;;  %v747_v47 = vld [vmem:[#allocation2 + $0x150] sm:$0xff]  ;;  %s5427_s30 = scalar_lea.vmem %s5426_s15, 32 }
 0x156   : > { %695 = vperm.xlu0 %5033, %v677_v3   ;;  %700 = vperm.xlu1 %5034, %v678_v4   ;;  %v744_v44 = vld [vmem:[#allocation2 + $0x138] sm:$0xff]  ;;  %v4102_v46 = vpack.c.bf16 %v748_v41, %v742_v40  ;;  %v750_v48 = vld [vmem:[#allocation2 + $0x168] sm:$0xff]  ;;  %v743_v49 = vld [vmem:[#allocation2 + $0x130] sm:$0xff]  ;;  %v4104_v54 = vpack.c.bf16 %v747_v47, %v741_v43  ;;  %s663_s19 = sand.u32 1, %s6571_s21  }
 0x157   : > { %4115 = vmatprep.subr.bf16.mxu1 %v4114_v38  ;;  %v4118_v50 = vpack.c.bf16 %v750_v48, %v744_v44  ;;  %v749_v51 = vld [vmem:[#allocation2 + $0x160] sm:$0xff]  ;;  %v710_v52 = vld [vmem:[#allocation2 + $0x28] sm:$0xff]  ;;  %v716_v53 = vld [vmem:[#allocation2 + $0x58] sm:$0xff]  ;;  %4101 = vmatpush1.bf16.msra.mxu0 %v4100_v42  ;;  %s664_s28 = scalar_lea.vmem [#allocation22], %s663_s19  ;;  %s3324_s13 = scalar_lea.sflag [#allocation4], %s663_s19 }
 0x158   : > { %4103 = vmatprep.subr.bf16.mxu0 %v4102_v46  ;;  %v4120_v55 = vpack.c.bf16 %v749_v51, %v743_v49  ;;  %v4122_v56 = vpack.c.bf16 %v716_v53, %v710_v52  ;;  %v992_v57 = vld [vmem:[#allocation5 + $0x8] sm:$0xff]  ;;  %v995_v58 = vld [vmem:[#allocation5 + $0x20] sm:$0xff]  ;;  %v715_v1 = vld [vmem:[#allocation2 + $0x50] sm:$0xff]  ;;  %s3336_s16 = sshll.u32 %s664_s28, 4  ;;  %s6458_s24 = scalar_lea.hbm %s6573_s27, %s3572_s26  ;;  %s6460_s16 = int_to_ptr.vmem [resolvable:$true] %s3336_s16 }
 0x159   : > { %4117 = vmatpush1.bf16.msra.mxu1 %v4116_v45  ;;  %v4138_v59 = vpack.c.bf16 %v995_v58, %v992_v57  ;;  %v709_v0 = vld [vmem:[#allocation2 + $0x20] sm:$0xff]  ;;  %v722_v2 = vld [vmem:[#allocation2 + $0x88] sm:$0xff]  ;;  %v728_v3 = vld [vmem:[#allocation2 + $0xb8] sm:$0xff]  ;;  %s5421_s25 = scalar_lea.vmem %s6460_s16, 16  ;;  %p6574_p2 = scmp.ne.s32.totalorder %s6572_s3, 0 }
 0x15a   : > { %4119 = vmatprep.subr.bf16.mxu1 %v4118_v50  ;;  %v991_v4 = vld [vmem:[#allocation5] sm:$0xff]  ;;  %v994_v5 = vld [vmem:[#allocation5 + $0x18] sm:$0xff]  ;;  %v4124_v8 = vpack.c.bf16 %v715_v1, %v709_v0  ;;  %v4126_v13 = vpack.c.bf16 %v728_v3, %v722_v2  ;;  %v727_v15 = vld [vmem:[#allocation2 + $0xb0] sm:$0xff]  ;;  %p5422_p10 = scmp.ne.s32.totalorder %s6460_s16, %s5421_s25  ;;  %p5428_p12 = scmp.lt.s32.totalorder %s6460_s16, %s5426_s15 }
 0x15b   : > { %4105 = vmatpush1.bf16.msra.mxu0 %v4104_v54  ;;  %v721_v14 = vld [vmem:[#allocation2 + $0x80] sm:$0xff]  ;;  %v734_v16 = vld [vmem:[#allocation2 + $0xe8] sm:$0xff]  ;;  %v740_v17 = vld [vmem:[#allocation2 + $0x118] sm:$0xff]  ;;  %v4140_v18 = vpack.c.bf16 %v994_v5, %v991_v4  ;;  %p5429_p7 = scmp.lt.s32.totalorder %s5427_s30, %s5421_s25 }
 0x15c   : > { %4123 = vmatprep.subr.bf16.mxu0 %v4122_v56  ;;  %v998_v19 = vld [vmem:[#allocation5 + $0x38] sm:$0xff]  ;;  %v1001_v20 = vld [vmem:[#allocation5 + $0x50] sm:$0xff]  ;;  %v1000_v23 = vld [vmem:[#allocation5 + $0x48] sm:$0xff]  ;;  %v4128_v24 = vpack.c.bf16 %v727_v15, %v721_v14  ;;  %v4130_v27 = vpack.c.bf16 %v740_v17, %v734_v16  ;;  %p5423_p3 = pnand %p5422_p10, %p6574_p2 }
 0x15d   : > { %4121 = vmatpush1.bf16.msra.mxu1 %v4120_v55  ;;  %v997_v22 = vld [vmem:[#allocation5 + $0x30] sm:$0xff]  ;;  %v1004_v25 = vld [vmem:[#allocation5 + $0x68] sm:$0xff]  ;;  %v1007_v26 = vld [vmem:[#allocation5 + $0x80] sm:$0xff]  ;;  %v4142_v30 = vpack.c.bf16 %v1001_v20, %v998_v19  ;;  %p5430_p8 = por %p5429_p7, %p5428_p12 }
 0x15e   : > { %4139 = vmatprep.subr.bf16.mxu1 %v4138_v59  ;;  %v733_v28 = vld [vmem:[#allocation2 + $0xe0] sm:$0xff]  ;;  %v739_v29 = vld [vmem:[#allocation2 + $0x110] sm:$0xff]  ;;  %v746_v31 = vld [vmem:[#allocation2 + $0x148] sm:$0xff]  ;;  %v4144_v33 = vpack.c.bf16 %v1000_v23, %v997_v22  ;;  %v4146_v34 = vpack.c.bf16 %v1007_v26, %v1004_v25  ;;  %p5424_p4 = pneg %p5423_p3 }
 0x15f   : > { %v752_v32 = vld [vmem:[#allocation2 + $0x178] sm:$0xff]  ;;  %v1003_v35 = vld [vmem:[#allocation5 + $0x60] sm:$0xff]  ;;  %v4132_v37 = vpack.c.bf16 %v739_v29, %v733_v28  ;;  %v1013_v39 = vld [vmem:[#allocation5 + $0xb0] sm:$0xff] }
 0x160   : > { %v1006_v36 = vld [vmem:[#allocation5 + $0x78] sm:$0xff]  ;;  %v4134_v40 = vpack.c.bf16 %v752_v32, %v746_v31  ;;  %v745_v41 = vld [vmem:[#allocation2 + $0x140] sm:$0xff]  ;;  %v751_v42 = vld [vmem:[#allocation2 + $0x170] sm:$0xff]  ;;  %p5431_p11 = pnand %p5430_p8, %p5424_p4 }
 0x161   : > { %v1010_v38 = vld [vmem:[#allocation5 + $0x98] sm:$0xff]  ;;  %v4148_v43 = vpack.c.bf16 %v1006_v36, %v1003_v35  ;;  %v1041_v44 = vld [vmem:[#allocation5 + $0x190] sm:$0xff]  ;;  %v1044_v45 = vld [vmem:[#allocation5 + $0x1a8] sm:$0xff]  ;;  %v4136_v49 = vpack.c.bf16 %v751_v42, %v745_v41 }
 0x162   : > { %v4150_v46 = vpack.c.bf16 %v1013_v39, %v1010_v38  ;;  %v1009_v47 = vld [vmem:[#allocation5 + $0x90] sm:$0xff]  ;;  %v1012_v48 = vld [vmem:[#allocation5 + $0xa8] sm:$0xff]  ;;  %v1019_v51 = vld [vmem:[#allocation5 + $0xe0] sm:$0xff]  ;;  %v4330_v52 = vpack.c.bf16 %v1044_v45, %v1041_v44 }
 0x163   : > { %v1016_v50 = vld [vmem:[#allocation5 + $0xc8] sm:$0xff]  ;;  %v993_v53 = vld [vmem:[#allocation5 + $0x10] sm:$0xff]  ;;  %v4152_v55 = vpack.c.bf16 %v1012_v48, %v1009_v47  ;;  %v1047_v56 = vld [vmem:[#allocation5 + $0x1c0] sm:$0xff] }
 0x164   : > { %v996_v54 = vld [vmem:[#allocation5 + $0x28] sm:$0xff]  ;;  %v1050_v57 = vld [vmem:[#allocation5 + $0x1d8] sm:$0xff]  ;;  %v4154_v58 = vpack.c.bf16 %v1019_v51, %v1016_v50  ;;  %v1015_v59 = vld [vmem:[#allocation5 + $0xc0] sm:$0xff] }
 0x165   : > { %v4332_v0 = vpack.c.bf16 %v996_v54, %v993_v53  ;;  %v4334_v1 = vpack.c.bf16 %v1050_v57, %v1047_v56  ;;  %v999_v2 = vld [vmem:[#allocation5 + $0x40] sm:$0xff]  ;;  %v1002_v3 = vld [vmem:[#allocation5 + $0x58] sm:$0xff]  ;;  %v1053_v5 = vld [vmem:[#allocation5 + $0x1f0] sm:$0xff] }
 0x166   : > { %v4336_v14 = vpack.c.bf16 %v1002_v3, %v999_v2  ;;  %v1005_v16 = vld [vmem:[#allocation5 + $0x70] sm:$0xff]  ;;  %v1008_v17 = vld [vmem:[#allocation5 + $0x88] sm:$0xff]  ;;  %v1059_v19 = vld [vmem:[#allocation5 + $0x220] sm:$0xff] }
 0x167   : > { %v1062_v20 = vld [vmem:[#allocation5 + $0x238] sm:$0xff]  ;;  %v1027_v22 = vld [vmem:[#allocation5 + $0x120] sm:$0xff]  ;;  %v1037_v25 = vld [vmem:[#allocation5 + $0x170] sm:$0xff]  ;;  %v4340_v26 = vpack.c.bf16 %v1008_v17, %v1005_v16 }
 0x168   : > { %v1030_v23 = vld [vmem:[#allocation5 + $0x138] sm:$0xff]  ;;  %v1011_v28 = vld [vmem:[#allocation5 + $0xa0] sm:$0xff]  ;;  %v1065_v31 = vld [vmem:[#allocation5 + $0x250] sm:$0xff] }
 0x169   : > { %v1014_v29 = vld [vmem:[#allocation5 + $0xb8] sm:$0xff]  ;;  %v1068_v32 = vld [vmem:[#allocation5 + $0x268] sm:$0xff]  ;;  %v1043_v36 = vld [vmem:[#allocation5 + $0x1a0] sm:$0xff] }
 0x16a   : > { %v1040_v35 = vld [vmem:[#allocation5 + $0x188] sm:$0xff]  ;;  %v4346_v38 = vpack.c.bf16 %v1068_v32, %v1065_v31  ;;  %v1017_v39 = vld [vmem:[#allocation5 + $0xd0] sm:$0xff]  ;;  %v1071_v42 = vld [vmem:[#allocation5 + $0x280] sm:$0xff] }
 0x16b   : > { %v4170_v44 = vpack.c.bf16 %v1043_v36, %v1040_v35  ;;  %v1039_v45 = vld [vmem:[#allocation5 + $0x180] sm:$0xff]  ;;  %v1046_v47 = vld [vmem:[#allocation5 + $0x1b8] sm:$0xff]  ;;  %v1049_v48 = vld [vmem:[#allocation5 + $0x1d0] sm:$0xff] }
 0x16c   : > { %v1023_v51 = vld [vmem:[#allocation5 + $0x100] sm:$0xff]  ;;  %v1077_v54 = vld [vmem:[#allocation5 + $0x2b0] sm:$0xff]  ;;  %v4174_v56 = vpack.c.bf16 %v1049_v48, %v1046_v47  ;;  %v1072_v32 = vld [vmem:[#allocation5 + $0x288] sm:$0xff] }
 0x16d   : > { %v1045_v57 = vld [vmem:[#allocation5 + $0x1b0] sm:$0xff]  ;;  %v1083_v3 = vld [vmem:[#allocation5 + $0x2e0] sm:$0xff] }
 0x16e   : > { %v1069_v31 = vld [vmem:[#allocation5 + $0x270] sm:$0xff]  ;;  %v1075_v36 = vld [vmem:[#allocation5 + $0x2a0] sm:$0xff] }
 0x16f   : > { %v1137_v47 = vld [vmem:[#allocation5 + $0x490] sm:$0xff] }
 0x1d1   : > { %v683_v62 = vpop.permute.xlu0 %682  ;;  %v686_v63 = vpop.permute.xlu1 %685 }
 0x1d2   : > { %vm687_vm0 = vcmp.eq.s32.totalorder %v683_v62, %v680_v61  ;;  %vm688_vm1 = vcmp.eq.s32.totalorder %v686_v63, %v680_v61  ;;  %v1018_v61 = vld [vmem:[#allocation5 + $0xd8] sm:$0xff]  ;;  %v1025_v63 = vld [vmem:[#allocation5 + $0x110] sm:$0xff] }
 0x1d3   : > { %v3552_v6 = vsel %vm687_vm0, 1.0, %v5530_v11  ;;  %v3553_v9 = vsel %vm688_vm1, 1.0, %v5530_v11  ;;  %v1022_v62 = vld [vmem:[#allocation5 + $0xf8] sm:$0xff]  ;;  %v4156_v4 = vpack.c.bf16 %v1018_v61, %v1015_v59  ;;  %v1052_v59 = vld [vmem:[#allocation5 + $0x1e8] sm:$0xff]  ;;  %v1055_v61 = vld [vmem:[#allocation5 + $0x200] sm:$0xff] }
 0x1d5   : > { %v696_v7 = vpop.permute.xlu0 %695  ;;  %v701_v10 = vpop.permute.xlu1 %700 }
 0x1d6   : > { %v5995_v12 = vmul.f32 %v3552_v6, %v696_v7  ;;  %v6001_v21 = vmul.f32 %v3553_v9, %v701_v10  ;;  %v1056_v6 = vld [vmem:[#allocation5 + $0x208] sm:$0xff]  ;;  %v4158_v7 = vpack.c.bf16 %v1025_v63, %v1022_v62 }
 0x1d7   : > { %v1024_v9 = vld [vmem:[#allocation5 + $0x108] sm:$0xff]  ;;  %v4338_v15 = vpack.c.bf16 %v1056_v6, %v1053_v5  ;;  %v4178_v5 = vpack.c.bf16 %v1055_v61, %v1052_v59  ;;  %v1051_v6 = vld [vmem:[#allocation5 + $0x1e0] sm:$0xff] }
 0x1d8   : > { %3554 = vmatmul.mubr.msk.f32.vlgmr.msra.gmra.mrb[0].mxu0 %vm753_vm2, %v5995_v12  ;;  %3556 = vmatmul.mubr.msk.f32.vlgmr.msra.gmra.mrb[0].mxu1 %vm753_vm2, %v5995_v12  ;;  %v1028_v10 = vld [vmem:[#allocation5 + $0x128] sm:$0xff] }
 0x1d9   : > { %4125 = vmatpush1.bf16.msra.mxu0 %v4124_v8  ;;  %830 = vmatprep.mubr.f32.mxu0 %v5530_v11  ;;  %v1021_v8 = vld [vmem:[#allocation5 + $0xf0] sm:$0xff] }
 0x1da   : > { %4127 = vmatprep.subr.bf16.mxu0 %v4126_v13  ;;  %907 = vmatprep.mubr.f32.mxu1 %v5530_v11  ;;  %v1031_v13 = vld [vmem:[#allocation5 + $0x140] sm:$0xff] }
 0x1db   : > { %4141 = vmatpush1.bf16.msra.mxu1 %v4140_v18  ;;  %v4160_v18 = vpack.c.bf16 %v1024_v9, %v1021_v8  ;;  %v1058_v8 = vld [vmem:[#allocation5 + $0x218] sm:$0xff]  ;;  %v1061_v9 = vld [vmem:[#allocation5 + $0x230] sm:$0xff] }
 0x1dc   : > { %3555 = vmatmul.mubr.msk.f32.gmra.mrb[2].mxu0 %vm753_vm2, %v6001_v21  ;;  %3557 = vmatmul.mubr.msk.f32.gmra.mrb[2].mxu1 %vm753_vm2, %v6001_v21  ;;  %v4182_v17 = vpack.c.bf16 %v1061_v9, %v1058_v8  ;;  %v1100_v8 = vld [vmem:[#allocation5 + $0x368] sm:$0xff]  ;;  %v1103_v9 = vld [vmem:[#allocation5 + $0x380] sm:$0xff] }
 0x1dd   : > { %4129 = vmatpush1.bf16.msra.mxu0 %v4128_v24  ;;  %978 = vmatprep.mubr.f32.mxu0 %v5530_v11  ;;  %v1034_v24 = vld [vmem:[#allocation5 + $0x158] sm:$0xff] }
 0x1de   : > { %4131 = vmatprep.subr.bf16.mxu0 %v4130_v27  ;;  %4143 = vmatprep.subr.bf16.mxu1 %v4142_v30  ;;  %v4342_v27 = vpack.c.bf16 %v1062_v20, %v1059_v19  ;;  %v4164_v30 = vpack.c.bf16 %v1030_v23, %v1027_v22  ;;  %v1060_v19 = vld [vmem:[#allocation5 + $0x228] sm:$0xff] }
 0x1df   : > { %4145 = vmatpush1.bf16.msra.mxu1 %v4144_v33  ;;  %v4166_v33 = vpack.c.bf16 %v1037_v25, %v1034_v24  ;;  %v1064_v20 = vld [vmem:[#allocation5 + $0x248] sm:$0xff]  ;;  %v1063_v25 = vld [vmem:[#allocation5 + $0x240] sm:$0xff] }
 0x1e0   : > { %4147 = vmatprep.subr.bf16.mxu1 %v4146_v34  ;;  %v1033_v34 = vld [vmem:[#allocation5 + $0x150] sm:$0xff] }
 0x1e1   : > { %4133 = vmatpush1.bf16.msra.mxu0 %v4132_v37  ;;  %v4344_v37 = vpack.c.bf16 %v1014_v29, %v1011_v28  ;;  %v1073_v28 = vld [vmem:[#allocation5 + $0x290] sm:$0xff] }
 0x1e2   : > { %4135 = vmatprep.subr.bf16.mxu0 %v4134_v40  ;;  %v1020_v40 = vld [vmem:[#allocation5 + $0xe8] sm:$0xff] }
 0x1e3   : > { %4149 = vmatpush1.bf16.msra.mxu1 %v4148_v43  ;;  %v1074_v43 = vld [vmem:[#allocation5 + $0x298] sm:$0xff] }
 0x1e4   : > { %4151 = vmatprep.subr.bf16.mxu1 %v4150_v46  ;;  %v1042_v46 = vld [vmem:[#allocation5 + $0x198] sm:$0xff]  ;;  %v4350_v50 = vpack.c.bf16 %v1074_v43, %v1071_v42  ;;  %v1081_v42 = vld [vmem:[#allocation5 + $0x2d0] sm:$0xff]  ;;  %v1084_v43 = vld [vmem:[#allocation5 + $0x2e8] sm:$0xff] }
 0x1e5   : > { %4137 = vmatpush1.bf16.msra.mxu0 %v4136_v49  ;;  %v4348_v49 = vpack.c.bf16 %v1020_v40, %v1017_v39  ;;  %v4172_v53 = vpack.c.bf16 %v1042_v46, %v1039_v45  ;;  %v1085_v39 = vld [vmem:[#allocation5 + $0x2f0] sm:$0xff]  ;;  %v1088_v45 = vld [vmem:[#allocation5 + $0x308] sm:$0xff]  ;;  %v1091_v46 = vld [vmem:[#allocation5 + $0x320] sm:$0xff] }
 0x1e6   : > { %4331 = vmatprep.subr.bf16.mxu0 %v4330_v52  ;;  %v1026_v52 = vld [vmem:[#allocation5 + $0x118] sm:$0xff]  ;;  %v4202_v48 = vpack.c.bf16 %v1091_v46, %v1088_v45 }
 0x1e7   : > { %4153 = vmatpush1.bf16.msra.mxu1 %v4152_v55  ;;  %v1080_v55 = vld [vmem:[#allocation5 + $0x2c8] sm:$0xff]  ;;  %v4352_v62 = vpack.c.bf16 %v1026_v52, %v1023_v51  ;;  %v1087_v51 = vld [vmem:[#allocation5 + $0x300] sm:$0xff]  ;;  %v1090_v52 = vld [vmem:[#allocation5 + $0x318] sm:$0xff] }
 0x1e8   : > { %3558 = vmatmul.mubr.msk.f32.vlgmr.msra.gmra.mrb[4].mxu0 %vm753_vm2, %v5995_v12  ;;  %4155 = vmatprep.subr.bf16.mxu1 %v4154_v58  ;;  %v4162_v12 = vpack.c.bf16 %v1031_v13, %v1028_v10  ;;  %v1048_v58 = vld [vmem:[#allocation5 + $0x1c8] sm:$0xff]  ;;  %v4354_v63 = vpack.c.bf16 %v1080_v55, %v1077_v54  ;;  %v1094_v55 = vld [vmem:[#allocation5 + $0x338] sm:$0xff] }
 0x1e9   : > { %984 = vmatprep.mubr.f32.mxu0 %v5530_v11  ;;  %4333 = vmatpush3.bf16.msra.mxu0 %v4332_v0  ;;  %v1029_v0 = vld [vmem:[#allocation5 + $0x130] sm:$0xff]  ;;  %v4176_v2 = vpack.c.bf16 %v1048_v58, %v1045_v57  ;;  %v1092_v54 = vld [vmem:[#allocation5 + $0x328] sm:$0xff]  ;;  %v1143_v57 = vld [vmem:[#allocation5 + $0x4c0] sm:$0xff] }
 0x1ea   : > { %4335 = vmatprep.subr.bf16.mxu0 %v4334_v1  ;;  %v1032_v1 = vld [vmem:[#allocation5 + $0x148] sm:$0xff]  ;;  %v1146_v58 = vld [vmem:[#allocation5 + $0x4d8] sm:$0xff] }
 0x1eb   : > { %4157 = vmatpush1.bf16.msra.mxu1 %v4156_v4  ;;  %v1086_v4 = vld [vmem:[#allocation5 + $0x2f8] sm:$0xff]  ;;  %v4356_v10 = vpack.c.bf16 %v1032_v1, %v1029_v0  ;;  %v1093_v0 = vld [vmem:[#allocation5 + $0x330] sm:$0xff] }
 0x1ec   : > { %3559 = vmatmul.mubr.msk.f32.gmra.mrb[6].mxu0 %vm753_vm2, %v6001_v21  ;;  %4159 = vmatprep.subr.bf16.mxu1 %v4158_v7  ;;  %v1036_v21 = vld [vmem:[#allocation5 + $0x168] sm:$0xff]  ;;  %v1054_v7 = vld [vmem:[#allocation5 + $0x1f8] sm:$0xff]  ;;  %v4358_v13 = vpack.c.bf16 %v1086_v4, %v1083_v3  ;;  %v4366_v4 = vpack.c.bf16 %v1146_v58, %v1143_v57 }
 0x1ed   : > { %4337 = vmatpush3.bf16.msra.mxu0 %v4336_v14  ;;  %v4168_v41 = vpack.c.bf16 %v1036_v21, %v1033_v34  ;;  %v1035_v14 = vld [vmem:[#allocation5 + $0x160] sm:$0xff]  ;;  %v4180_v16 = vpack.c.bf16 %v1054_v7, %v1051_v6  ;;  %v4192_v21 = vpack.c.bf16 %v1072_v32, %v1069_v31  ;;  %v1098_v7 = vld [vmem:[#allocation5 + $0x358] sm:$0xff]  ;;  %v1105_v32 = vld [vmem:[#allocation5 + $0x390] sm:$0xff] }
 0x1ee   : > { %4339 = vmatprep.subr.bf16.mxu0 %v4338_v15  ;;  %v1038_v15 = vld [vmem:[#allocation5 + $0x178] sm:$0xff]  ;;  %v1079_v34 = vld [vmem:[#allocation5 + $0x2c0] sm:$0xff]  ;;  %v1120_v57 = vld [vmem:[#allocation5 + $0x408] sm:$0xff] }
 0x1ef   : > { %4161 = vmatpush1.bf16.msra.mxu1 %v4160_v18  ;;  %v1057_v18 = vld [vmem:[#allocation5 + $0x210] sm:$0xff]  ;;  %v4360_v22 = vpack.c.bf16 %v1038_v15, %v1035_v14  ;;  %v1095_v6 = vld [vmem:[#allocation5 + $0x340] sm:$0xff] }
 0x1f0   : > { %4163 = vmatprep.subr.bf16.mxu1 %v4162_v12  ;;  %v1067_v12 = vld [vmem:[#allocation5 + $0x260] sm:$0xff]  ;;  %v4184_v23 = vpack.c.bf16 %v1060_v19, %v1057_v18  ;;  %v1102_v18 = vld [vmem:[#allocation5 + $0x378] sm:$0xff] }
 0x1f1   : > { %4341 = vmatpush3.bf16.msra.mxu0 %v4340_v26  ;;  %v4186_v24 = vpack.c.bf16 %v1067_v12, %v1064_v20  ;;  %v1066_v26 = vld [vmem:[#allocation5 + $0x258] sm:$0xff]  ;;  %v1101_v12 = vld [vmem:[#allocation5 + $0x370] sm:$0xff] }
 0x1f2   : > { %4343 = vmatprep.subr.bf16.mxu0 %v4342_v27  ;;  %v1070_v27 = vld [vmem:[#allocation5 + $0x278] sm:$0xff]  ;;  %v4188_v29 = vpack.c.bf16 %v1066_v26, %v1063_v25  ;;  %v4210_v25 = vpack.c.bf16 %v1103_v9, %v1100_v8 }
 0x1f3   : > { %4165 = vmatpush1.bf16.msra.mxu1 %v4164_v30  ;;  %v4190_v30 = vpack.c.bf16 %v1073_v28, %v1070_v27  ;;  %v1109_v27 = vld [vmem:[#allocation5 + $0x3b0] sm:$0xff]  ;;  %v1155_v28 = vld [vmem:[#allocation5 + $0x520] sm:$0xff]  ;;  %v1126_v8 = vld [vmem:[#allocation5 + $0x438] sm:$0xff] }
 0x1f4   : > { %4167 = vmatprep.subr.bf16.mxu1 %v4166_v33  ;;  %v1076_v33 = vld [vmem:[#allocation5 + $0x2a8] sm:$0xff] }
 0x1f5   : > { %4345 = vmatpush3.bf16.msra.mxu0 %v4344_v37  ;;  %v4194_v35 = vpack.c.bf16 %v1079_v34, %v1076_v33  ;;  %v1078_v37 = vld [vmem:[#allocation5 + $0x2b8] sm:$0xff]  ;;  %v1108_v33 = vld [vmem:[#allocation5 + $0x3a8] sm:$0xff] }
 0x1f6   : > { %4347 = vmatprep.subr.bf16.mxu0 %v4346_v38  ;;  %v1082_v38 = vld [vmem:[#allocation5 + $0x2d8] sm:$0xff]  ;;  %v4196_v40 = vpack.c.bf16 %v1078_v37, %v1075_v36  ;;  %v1112_v37 = vld [vmem:[#allocation5 + $0x3c8] sm:$0xff] }
 0x1f7   : > { %4169 = vmatpush1.bf16.msra.mxu1 %v4168_v41  ;;  %v4198_v41 = vpack.c.bf16 %v1085_v39, %v1082_v38  ;;  %v1110_v36 = vld [vmem:[#allocation5 + $0x3b8] sm:$0xff]  ;;  %v1115_v38 = vld [vmem:[#allocation5 + $0x3e0] sm:$0xff]  ;;  %v1161_v39 = vld [vmem:[#allocation5 + $0x550] sm:$0xff] }
 0x1f8   : > { %4171 = vmatprep.subr.bf16.mxu1 %v4170_v44  ;;  %v4200_v44 = vpack.c.bf16 %v1084_v43, %v1081_v42  ;;  %v1111_v43 = vld [vmem:[#allocation5 + $0x3c0] sm:$0xff]  ;;  %v4218_v45 = vpack.c.bf16 %v1115_v38, %v1112_v37 }
 0x1f9   : > { %4349 = vmatpush3.bf16.msra.mxu0 %v4348_v49  ;;  %v1140_v49 = vld [vmem:[#allocation5 + $0x4a8] sm:$0xff] }
 0x1fa   : > { %4351 = vmatprep.subr.bf16.mxu0 %v4350_v50  ;;  %v4362_v50 = vpack.c.bf16 %v1140_v49, %v1137_v47  ;;  %v1113_v47 = vld [vmem:[#allocation5 + $0x3d0] sm:$0xff]  ;;  %v1118_v49 = vld [vmem:[#allocation5 + $0x3f8] sm:$0xff] }
 0x1fb   : > { %4173 = vmatpush1.bf16.msra.mxu1 %v4172_v53  ;;  %v1089_v53 = vld [vmem:[#allocation5 + $0x310] sm:$0xff] }
 0x1fc   : > { %4175 = vmatprep.subr.bf16.mxu1 %v4174_v56  ;;  %v1097_v56 = vld [vmem:[#allocation5 + $0x350] sm:$0xff] }
 0x1fd   : > { %4353 = vmatpush3.bf16.msra.mxu0 %v4352_v62  ;;  %v4204_v62 = vpack.c.bf16 %v1090_v52, %v1087_v51  ;;  %v4206_v3 = vpack.c.bf16 %v1097_v56, %v1094_v55  ;;  %v1167_v51 = vld [vmem:[#allocation5 + $0x580] sm:$0xff]  ;;  %v1170_v52 = vld [vmem:[#allocation5 + $0x598] sm:$0xff]  ;;  %v1117_v56 = vld [vmem:[#allocation5 + $0x3f0] sm:$0xff] }
 0x1fe   : > { %4355 = vmatprep.subr.bf16.mxu0 %v4354_v63  ;;  %v4364_v63 = vpack.c.bf16 %v1092_v54, %v1089_v53 }
 0x1ff   : > { %4177 = vmatpush1.bf16.msra.mxu1 %v4176_v2 }
 0x200   : > { %4179 = vmatprep.subr.bf16.mxu1 %v4178_v5  ;;  %v1096_v5 = vld [vmem:[#allocation5 + $0x348] sm:$0xff] }
 0x201   : > { %4357 = vmatpush3.bf16.msra.mxu0 %v4356_v10  ;;  %v1149_v10 = vld [vmem:[#allocation5 + $0x4f0] sm:$0xff]  ;;  %v4208_v15 = vpack.c.bf16 %v1096_v5, %v1093_v0  ;;  %v1122_v0 = vld [vmem:[#allocation5 + $0x418] sm:$0xff]  ;;  %v4224_v5 = vpack.c.bf16 %v1120_v57, %v1117_v56  ;;  %v1151_v56 = vld [vmem:[#allocation5 + $0x500] sm:$0xff] }
 0x202   : > { %4359 = vmatprep.subr.bf16.mxu0 %v4358_v13  ;;  %v1152_v13 = vld [vmem:[#allocation5 + $0x508] sm:$0xff]  ;;  %v1245_v57 = vld [vmem:[#allocation5 + $0x7f0] sm:$0xff] }
 0x203   : > { %4181 = vmatpush1.bf16.msra.mxu1 %v4180_v16  ;;  %v4368_v16 = vpack.c.bf16 %v1098_v7, %v1095_v6  ;;  %v4370_v26 = vpack.c.bf16 %v1152_v13, %v1149_v10  ;;  %v1123_v7 = vld [vmem:[#allocation5 + $0x420] sm:$0xff] }
 0x204   : > { %4183 = vmatprep.subr.bf16.mxu1 %v4182_v17  ;;  %v1099_v17 = vld [vmem:[#allocation5 + $0x360] sm:$0xff] }
 0x205   : > { %4361 = vmatpush3.bf16.msra.mxu0 %v4360_v22  ;;  %v1104_v22 = vld [vmem:[#allocation5 + $0x388] sm:$0xff] }
 0x206   : > { %4363 = vmatprep.subr.bf16.mxu0 %v4362_v50  ;;  %v4372_v31 = vpack.c.bf16 %v1104_v22, %v1101_v12  ;;  %v1121_v50 = vld [vmem:[#allocation5 + $0x410] sm:$0xff]  ;;  %v1182_v12 = vld [vmem:[#allocation5 + $0x5f8] sm:$0xff]  ;;  %v4228_v22 = vpack.c.bf16 %v1126_v8, %v1123_v7  ;;  %v1251_v8 = vld [vmem:[#allocation5 + $0x820] sm:$0xff] }
 0x207   : > { %4185 = vmatpush1.bf16.msra.mxu1 %v4184_v23  ;;  %v1106_v23 = vld [vmem:[#allocation5 + $0x398] sm:$0xff]  ;;  %v1157_v7 = vld [vmem:[#allocation5 + $0x530] sm:$0xff] }
 0x208   : > { %4187 = vmatprep.subr.bf16.mxu1 %v4186_v24  ;;  %v4214_v34 = vpack.c.bf16 %v1109_v27, %v1106_v23 }
 0x20b   : > { %4189 = vmatpush1.bf16.msra.mxu1 %v4188_v29  ;;  %v1158_v29 = vld [vmem:[#allocation5 + $0x538] sm:$0xff] }
 0x20c   : > { %4191 = vmatprep.subr.bf16.mxu1 %v4190_v30  ;;  %v4212_v30 = vpack.c.bf16 %v1102_v18, %v1099_v17  ;;  %v1133_v18 = vld [vmem:[#allocation5 + $0x470] sm:$0xff] }
 0x20f   : > { %4193 = vmatpush1.bf16.msra.mxu1 %v4192_v21  ;;  %v4374_v21 = vpack.c.bf16 %v1158_v29, %v1155_v28  ;;  %v1131_v29 = vld [vmem:[#allocation5 + $0x460] sm:$0xff] }
 0x210   : > { %4195 = vmatprep.subr.bf16.mxu1 %v4194_v35  ;;  %v1107_v35 = vld [vmem:[#allocation5 + $0x3a0] sm:$0xff] }
 0x211   : > { %v4376_v42 = vpack.c.bf16 %v1110_v36, %v1107_v35  ;;  %v1135_v36 = vld [vmem:[#allocation5 + $0x480] sm:$0xff] }
 0x213   : > { %4197 = vmatpush1.bf16.msra.mxu1 %v4196_v40  ;;  %v1164_v40 = vld [vmem:[#allocation5 + $0x568] sm:$0xff] }
 0x214   : > { %4199 = vmatprep.subr.bf16.mxu1 %v4198_v41  ;;  %v4216_v41 = vpack.c.bf16 %v1108_v33, %v1105_v32  ;;  %v4378_v46 = vpack.c.bf16 %v1164_v40, %v1161_v39  ;;  %v1139_v32 = vld [vmem:[#allocation5 + $0x4a0] sm:$0xff]  ;;  %v1233_v33 = vld [vmem:[#allocation5 + $0x790] sm:$0xff]  ;;  %v1138_v39 = vld [vmem:[#allocation5 + $0x498] sm:$0xff] }
 0x215   : > { %v1185_v40 = vld [vmem:[#allocation5 + $0x610] sm:$0xff] }
 0x217   : > { %4201 = vmatpush1.bf16.msra.mxu1 %v4200_v44  ;;  %v1114_v44 = vld [vmem:[#allocation5 + $0x3d8] sm:$0xff] }
 0x218   : > { %4203 = vmatprep.subr.bf16.mxu1 %v4202_v48  ;;  %v1116_v48 = vld [vmem:[#allocation5 + $0x3e8] sm:$0xff]  ;;  %v4220_v54 = vpack.c.bf16 %v1114_v44, %v1111_v43  ;;  %v1145_v43 = vld [vmem:[#allocation5 + $0x4d0] sm:$0xff]  ;;  %v1239_v44 = vld [vmem:[#allocation5 + $0x7c0] sm:$0xff] }
 0x219   : > { %v4380_v55 = vpack.c.bf16 %v1116_v48, %v1113_v47  ;;  %v1141_v48 = vld [vmem:[#allocation5 + $0x4b0] sm:$0xff] }
 0x2ab   : > { %v826_v59 = vpop.f32.mrb[0].mxu0  ;;  %v6015_v61 = vpop.f32.mrb[0].mxu1 }
 0x2ac   : > { %v828_v1 = vpop.f32.mrb[1].mxu0  ;;  %v905_v2 = vpop.f32.mrb[1].mxu1 }
 0x2ad   : > { %1343 = vmatprep.mubr.f32.mxu1 %v828_v1  ;;  %1571 = vmatprep.mubr.f32.mxu0 %v828_v1  ;;  %v1124_v1 = vld [vmem:[#allocation5 + $0x428] sm:$0xff] }
 0x2ae   : > { %1344 = vmatmul.mubr.f32.vlgmr.msra.gmra.mrb[4].mxu1 %v826_v59  ;;  %1572 = vmatmul.mubr.f32.vlgmr.msra.gmra.mrb[8].mxu0 %v826_v59  ;;  %v4222_v59 = vpack.c.bf16 %v1121_v50, %v1118_v49  ;;  %v1144_v50 = vld [vmem:[#allocation5 + $0x4c8] sm:$0xff] }
 0x2af   : > { %4205 = vmatpush1.bf16.msra.mxu1 %v4204_v62  ;;  %4365 = vmatpush3.bf16.msra.mxu0 %v4364_v63  ;;  %v832_v14 = vpop.f32.mrb[2].mxu0  ;;  %v6017_v19 = vpop.f32.mrb[2].mxu1  ;;  %v4382_v62 = vpack.c.bf16 %v1170_v52, %v1167_v51  ;;  %v1119_v63 = vld [vmem:[#allocation5 + $0x400] sm:$0xff]  ;;  %v1194_v52 = vld [vmem:[#allocation5 + $0x658] sm:$0xff] }
 0x2b0   : > { %v834_v20 = vpop.f32.mrb[3].mxu0  ;;  %4207 = vmatprep.subr.bf16.mxu1 %v4206_v3  ;;  %4367 = vmatprep.subr.bf16.mxu0 %v4366_v4  ;;  %v6019_v24 = vpop.f32.mrb[3].mxu1  ;;  %v1173_v3 = vld [vmem:[#allocation5 + $0x5b0] sm:$0xff]  ;;  %v1176_v4 = vld [vmem:[#allocation5 + $0x5c8] sm:$0xff]  ;;  %v4384_v6 = vpack.c.bf16 %v1122_v0, %v1119_v63  ;;  %v1191_v51 = vld [vmem:[#allocation5 + $0x640] sm:$0xff] }
 0x2b1   : > { %1349 = vmatprep.mubr.f32.mxu1 %v834_v20  ;;  %1576 = vmatprep.mubr.f32.mxu0 %v834_v20  ;;  %v4386_v13 = vpack.c.bf16 %v1176_v4, %v1173_v3  ;;  %v1179_v20 = vld [vmem:[#allocation5 + $0x5e0] sm:$0xff]  ;;  %v4400_v63 = vpack.c.bf16 %v1194_v52, %v1191_v51  ;;  %v1197_v3 = vld [vmem:[#allocation5 + $0x670] sm:$0xff]  ;;  %v1200_v4 = vld [vmem:[#allocation5 + $0x688] sm:$0xff] }
 0x2b2   : > { %1350 = vmatmul.mubr.f32.gmra.mrb[6].mxu1 %v832_v14  ;;  %1577 = vmatmul.mubr.f32.gmra.mrb[10].mxu0 %v832_v14  ;;  %v1125_v14 = vld [vmem:[#allocation5 + $0x430] sm:$0xff]  ;;  %v4390_v28 = vpack.c.bf16 %v1182_v12, %v1179_v20  ;;  %v1147_v0 = vld [vmem:[#allocation5 + $0x4e0] sm:$0xff] }
 0x2b3   : > { %4209 = vmatpush1.bf16.msra.mxu1 %v4208_v15  ;;  %4369 = vmatpush3.bf16.msra.mxu0 %v4368_v16  ;;  %v1128_v15 = vld [vmem:[#allocation5 + $0x448] sm:$0xff]  ;;  %v1130_v16 = vld [vmem:[#allocation5 + $0x458] sm:$0xff]  ;;  %v1203_v12 = vld [vmem:[#allocation5 + $0x6a0] sm:$0xff] }
 0x2b4   : > { %1419 = vmatprep.mubr.f32.mxu1 %v905_v2  ;;  %1646 = vmatprep.mubr.f32.mxu0 %v905_v2  ;;  %v1127_v2 = vld [vmem:[#allocation5 + $0x440] sm:$0xff]  ;;  %v4388_v23 = vpack.c.bf16 %v1128_v15, %v1125_v14  ;;  %v4230_v27 = vpack.c.bf16 %v1133_v18, %v1130_v16  ;;  %v4404_v14 = vpack.c.bf16 %v1200_v4, %v1197_v3  ;;  %v1153_v15 = vld [vmem:[#allocation5 + $0x510] sm:$0xff]  ;;  %v1156_v16 = vld [vmem:[#allocation5 + $0x528] sm:$0xff] }
 0x2b5   : > { %4211 = vmatprep.subr.bf16.mxu1 %v4210_v25  ;;  %4371 = vmatprep.subr.bf16.mxu0 %v4370_v26  ;;  %v4226_v10 = vpack.c.bf16 %v1127_v2, %v1124_v1  ;;  %v1129_v25 = vld [vmem:[#allocation5 + $0x450] sm:$0xff]  ;;  %v1132_v26 = vld [vmem:[#allocation5 + $0x468] sm:$0xff]  ;;  %v1150_v1 = vld [vmem:[#allocation5 + $0x4f8] sm:$0xff] }
 0x2b7   : > { %4213 = vmatpush1.bf16.msra.mxu1 %v4212_v30  ;;  %4373 = vmatpush3.bf16.msra.mxu0 %v4372_v31  ;;  %v1134_v30 = vld [vmem:[#allocation5 + $0x478] sm:$0xff]  ;;  %v1136_v31 = vld [vmem:[#allocation5 + $0x488] sm:$0xff] }
 0x2b8   : > { %4215 = vmatprep.subr.bf16.mxu1 %v4214_v34  ;;  %4375 = vmatprep.subr.bf16.mxu0 %v4374_v21  ;;  %v1236_v34 = vld [vmem:[#allocation5 + $0x7a8] sm:$0xff]  ;;  %v4232_v21 = vpack.c.bf16 %v1132_v26, %v1129_v25  ;;  %v4392_v35 = vpack.c.bf16 %v1134_v30, %v1131_v29  ;;  %v4234_v37 = vpack.c.bf16 %v1139_v32, %v1136_v31  ;;  %v1163_v25 = vld [vmem:[#allocation5 + $0x560] sm:$0xff]  ;;  %v1257_v26 = vld [vmem:[#allocation5 + $0x850] sm:$0xff] }
 0x2b9   : > { %v4394_v38 = vpack.c.bf16 %v1236_v34, %v1233_v33  ;;  %v1159_v30 = vld [vmem:[#allocation5 + $0x540] sm:$0xff]  ;;  %v1162_v31 = vld [vmem:[#allocation5 + $0x558] sm:$0xff]  ;;  %v1209_v34 = vld [vmem:[#allocation5 + $0x6d0] sm:$0xff] }
 0x2bb   : > { %v6021_v53 = vpop.f32.mrb[4].mxu0  ;;  %4217 = vmatpush1.bf16.msra.mxu1 %v4216_v41  ;;  %4377 = vmatpush3.bf16.msra.mxu0 %v4376_v42  ;;  %v1188_v41 = vld [vmem:[#allocation5 + $0x628] sm:$0xff]  ;;  %v1142_v42 = vld [vmem:[#allocation5 + $0x4b8] sm:$0xff] }
 0x2bc   : > { %v6023_v58 = vpop.f32.mrb[5].mxu0  ;;  %4219 = vmatprep.subr.bf16.mxu1 %v4218_v45  ;;  %4379 = vmatprep.subr.bf16.mxu0 %v4378_v46  ;;  %v1242_v45 = vld [vmem:[#allocation5 + $0x7d8] sm:$0xff]  ;;  %v4236_v46 = vpack.c.bf16 %v1138_v39, %v1135_v36  ;;  %v4396_v47 = vpack.c.bf16 %v1188_v41, %v1185_v40  ;;  %v4238_v49 = vpack.c.bf16 %v1145_v43, %v1142_v42  ;;  %v1169_v36 = vld [vmem:[#allocation5 + $0x590] sm:$0xff]  ;;  %v1168_v42 = vld [vmem:[#allocation5 + $0x588] sm:$0xff] }
 0x2bd   : > { %v4252_v39 = vpack.c.bf16 %v1162_v31, %v1159_v30  ;;  %v1165_v41 = vld [vmem:[#allocation5 + $0x570] sm:$0xff]  ;;  %v1196_v30 = vld [vmem:[#allocation5 + $0x668] sm:$0xff]  ;;  %v1199_v31 = vld [vmem:[#allocation5 + $0x680] sm:$0xff] }
 0x2be   : > { %v4256_v51 = vpack.c.bf16 %v1168_v42, %v1165_v41 }
 0x2bf   : > { %4221 = vmatpush1.bf16.msra.mxu1 %v4220_v54  ;;  %4381 = vmatpush3.bf16.msra.mxu0 %v4380_v55  ;;  %v6025_v9 = vpop.f32.mrb[6].mxu0  ;;  %v4398_v54 = vpack.c.bf16 %v1242_v45, %v1239_v44  ;;  %v1148_v55 = vld [vmem:[#allocation5 + $0x4e8] sm:$0xff]  ;;  %v1215_v45 = vld [vmem:[#allocation5 + $0x700] sm:$0xff] }
 0x2c0   : > { %4223 = vmatprep.subr.bf16.mxu1 %v4222_v59  ;;  %4383 = vmatprep.subr.bf16.mxu0 %v4382_v62  ;;  %v6027_v17 = vpop.f32.mrb[7].mxu0  ;;  %v1248_v59 = vld [vmem:[#allocation5 + $0x808] sm:$0xff]  ;;  %v4240_v62 = vpack.c.bf16 %v1144_v50, %v1141_v48  ;;  %v4242_v2 = vpack.c.bf16 %v1151_v56, %v1148_v55  ;;  %v1175_v48 = vld [vmem:[#allocation5 + $0x5c0] sm:$0xff]  ;;  %v1174_v55 = vld [vmem:[#allocation5 + $0x5b8] sm:$0xff] }
 0x2c1   : > { %v1272_v50 = vld [vmem:[#allocation5 + $0x8c8] sm:$0xff] }
 0x2c3   : > { %4225 = vmatpush1.bf16.msra.mxu1 %v4224_v5  ;;  %4385 = vmatpush3.bf16.msra.mxu0 %v4384_v6  ;;  %v1154_v5 = vld [vmem:[#allocation5 + $0x518] sm:$0xff]  ;;  %v4402_v6 = vpack.c.bf16 %v1248_v59, %v1245_v57  ;;  %v1221_v59 = vld [vmem:[#allocation5 + $0x730] sm:$0xff] }
 0x2c4   : > { %4227 = vmatprep.subr.bf16.mxu1 %v4226_v10  ;;  %4387 = vmatprep.subr.bf16.mxu0 %v4386_v13  ;;  %v1254_v10 = vld [vmem:[#allocation5 + $0x838] sm:$0xff]  ;;  %v4244_v13 = vpack.c.bf16 %v1150_v1, %v1147_v0  ;;  %v4246_v18 = vpack.c.bf16 %v1157_v7, %v1154_v5  ;;  %v1181_v0 = vld [vmem:[#allocation5 + $0x5f0] sm:$0xff]  ;;  %v1275_v1 = vld [vmem:[#allocation5 + $0x8e0] sm:$0xff] }
 0x2c5   : > { %v4406_v20 = vpack.c.bf16 %v1254_v10, %v1251_v8  ;;  %v1177_v5 = vld [vmem:[#allocation5 + $0x5d0] sm:$0xff]  ;;  %v1180_v8 = vld [vmem:[#allocation5 + $0x5e8] sm:$0xff]  ;;  %v1227_v10 = vld [vmem:[#allocation5 + $0x760] sm:$0xff] }
 0x2c7   : > { %4229 = vmatpush1.bf16.msra.mxu1 %v4228_v22  ;;  %4389 = vmatpush3.bf16.msra.mxu0 %v4388_v23  ;;  %v1206_v22 = vld [vmem:[#allocation5 + $0x6b8] sm:$0xff]  ;;  %v1160_v23 = vld [vmem:[#allocation5 + $0x548] sm:$0xff] }
 0x2c8   : > { %4231 = vmatprep.subr.bf16.mxu1 %v4230_v27  ;;  %4391 = vmatprep.subr.bf16.mxu0 %v4390_v28  ;;  %v1260_v27 = vld [vmem:[#allocation5 + $0x868] sm:$0xff]  ;;  %v4248_v28 = vpack.c.bf16 %v1156_v16, %v1153_v15  ;;  %v4408_v29 = vpack.c.bf16 %v1206_v22, %v1203_v12  ;;  %v4250_v32 = vpack.c.bf16 %v1163_v25, %v1160_v23  ;;  %v1187_v15 = vld [vmem:[#allocation5 + $0x620] sm:$0xff]  ;;  %v1186_v22 = vld [vmem:[#allocation5 + $0x618] sm:$0xff] }
 0x2c9   : > { %v4410_v33 = vpack.c.bf16 %v1260_v27, %v1257_v26  ;;  %v4264_v16 = vpack.c.bf16 %v1180_v8, %v1177_v5  ;;  %v1183_v12 = vld [vmem:[#allocation5 + $0x600] sm:$0xff]  ;;  %v1190_v23 = vld [vmem:[#allocation5 + $0x638] sm:$0xff]  ;;  %v1193_v25 = vld [vmem:[#allocation5 + $0x650] sm:$0xff] }
 0x2ca   : > { %v4268_v26 = vpack.c.bf16 %v1186_v22, %v1183_v12  ;;  %v4270_v27 = vpack.c.bf16 %v1193_v25, %v1190_v23  ;;  %v1231_v5 = vld [vmem:[#allocation5 + $0x780] sm:$0xff]  ;;  %v1241_v8 = vld [vmem:[#allocation5 + $0x7d0] sm:$0xff]  ;;  %v1246_v23 = vld [vmem:[#allocation5 + $0x7f8] sm:$0xff] }
 0x2cb   : > { %4233 = vmatpush1.bf16.msra.mxu1 %v4232_v21  ;;  %4393 = vmatpush3.bf16.msra.mxu0 %v4392_v35  ;;  %v1212_v21 = vld [vmem:[#allocation5 + $0x6e8] sm:$0xff]  ;;  %v1166_v35 = vld [vmem:[#allocation5 + $0x578] sm:$0xff]  ;;  %v1243_v22 = vld [vmem:[#allocation5 + $0x7e0] sm:$0xff] }
 0x2cc   : > { %4235 = vmatprep.subr.bf16.mxu1 %v4234_v37  ;;  %4395 = vmatprep.subr.bf16.mxu0 %v4394_v38  ;;  %v1263_v37 = vld [vmem:[#allocation5 + $0x880] sm:$0xff]  ;;  %v1266_v38 = vld [vmem:[#allocation5 + $0x898] sm:$0xff]  ;;  %v4412_v40 = vpack.c.bf16 %v1212_v21, %v1209_v34  ;;  %v4254_v43 = vpack.c.bf16 %v1169_v36, %v1166_v35  ;;  %v1205_v36 = vld [vmem:[#allocation5 + $0x6b0] sm:$0xff] }
 0x2cd   : > { %v4414_v44 = vpack.c.bf16 %v1266_v38, %v1263_v37  ;;  %v1195_v34 = vld [vmem:[#allocation5 + $0x660] sm:$0xff]  ;;  %v1198_v21 = vld [vmem:[#allocation5 + $0x678] sm:$0xff]  ;;  %v1201_v37 = vld [vmem:[#allocation5 + $0x690] sm:$0xff] }
 0x2ce   : > { %1647 = vmatmul.mubr.f32.vlgmr.msra.gmra.mrb[12].mxu0 %v6015_v61  ;;  %v1202_v35 = vld [vmem:[#allocation5 + $0x698] sm:$0xff]  ;;  %v1204_v38 = vld [vmem:[#allocation5 + $0x6a8] sm:$0xff] }
 0x2cf   : > { %4237 = vmatpush1.bf16.msra.mxu1 %v4236_v46  ;;  %4397 = vmatpush3.bf16.msra.mxu0 %v4396_v47  ;;  %v1218_v46 = vld [vmem:[#allocation5 + $0x718] sm:$0xff]  ;;  %v1172_v47 = vld [vmem:[#allocation5 + $0x5a8] sm:$0xff]  ;;  %v4280_v41 = vpack.c.bf16 %v1204_v38, %v1201_v37  ;;  %v1261_v38 = vld [vmem:[#allocation5 + $0x870] sm:$0xff] }
 0x2d0   : > { %1651 = vmatprep.mubr.f32.mxu0 %v6019_v24  ;;  %4239 = vmatprep.subr.bf16.mxu1 %v4238_v49  ;;  %v1269_v49 = vld [vmem:[#allocation5 + $0x8b0] sm:$0xff]  ;;  %v4416_v52 = vpack.c.bf16 %v1218_v46, %v1215_v45  ;;  %v4258_v56 = vpack.c.bf16 %v1175_v48, %v1172_v47  ;;  %v1216_v48 = vld [vmem:[#allocation5 + $0x708] sm:$0xff]  ;;  %v1250_v25 = vld [vmem:[#allocation5 + $0x818] sm:$0xff] }
 0x2d1   : > { %4399 = vmatprep.subr.bf16.mxu0 %v4398_v54  ;;  %v1171_v54 = vld [vmem:[#allocation5 + $0x5a0] sm:$0xff]  ;;  %v4418_v57 = vpack.c.bf16 %v1272_v50, %v1269_v49  ;;  %v1217_v45 = vld [vmem:[#allocation5 + $0x710] sm:$0xff]  ;;  %v1220_v49 = vld [vmem:[#allocation5 + $0x728] sm:$0xff] }
 0x2d2   : > { %1652 = vmatmul.mubr.f32.gmra.mrb[14].mxu0 %v6017_v19  ;;  %v4260_v3 = vpack.c.bf16 %v1174_v55, %v1171_v54  ;;  %v1213_v47 = vld [vmem:[#allocation5 + $0x6f0] sm:$0xff]  ;;  %v1223_v50 = vld [vmem:[#allocation5 + $0x740] sm:$0xff]  ;;  %v1222_v55 = vld [vmem:[#allocation5 + $0x738] sm:$0xff] }
 0x2d3   : > { %4241 = vmatpush1.bf16.msra.mxu1 %v4240_v62  ;;  %4401 = vmatpush3.bf16.msra.mxu0 %v4400_v63  ;;  %v1224_v62 = vld [vmem:[#allocation5 + $0x748] sm:$0xff]  ;;  %v1178_v63 = vld [vmem:[#allocation5 + $0x5d8] sm:$0xff]  ;;  %v1219_v54 = vld [vmem:[#allocation5 + $0x720] sm:$0xff] }
 0x2d4   : > { %1721 = vmatprep.mubr.f32.mxu0 %v6023_v58  ;;  %4243 = vmatprep.subr.bf16.mxu1 %v4242_v2  ;;  %v1278_v2 = vld [vmem:[#allocation5 + $0x8f8] sm:$0xff]  ;;  %v4420_v4 = vpack.c.bf16 %v1224_v62, %v1221_v59  ;;  %v4292_v59 = vpack.c.bf16 %v1222_v55, %v1219_v54  ;;  %v1809_v55 = vld [vmem:[#allocation8 + $0x8] sm:$0xff] }
 0x2d5   : > { %4403 = vmatprep.subr.bf16.mxu0 %v4402_v6  ;;  %v4262_v6 = vpack.c.bf16 %v1181_v0, %v1178_v63  ;;  %v4422_v7 = vpack.c.bf16 %v1278_v2, %v1275_v1  ;;  %v1225_v63 = vld [vmem:[#allocation5 + $0x750] sm:$0xff]  ;;  %v1228_v0 = vld [vmem:[#allocation5 + $0x768] sm:$0xff]  ;;  %v1235_v2 = vld [vmem:[#allocation5 + $0x7a0] sm:$0xff] }
 0x2d6   : > { %v1232_v1 = vld [vmem:[#allocation5 + $0x788] sm:$0xff] }
 0x2d7   : > { %4245 = vmatpush1.bf16.msra.mxu1 %v4244_v13  ;;  %4405 = vmatpush3.bf16.msra.mxu0 %v4404_v14  ;;  %v1230_v13 = vld [vmem:[#allocation5 + $0x778] sm:$0xff]  ;;  %v1184_v14 = vld [vmem:[#allocation5 + $0x608] sm:$0xff] }
 0x2d8   : > { %4247 = vmatprep.subr.bf16.mxu1 %v4246_v18  ;;  %4407 = vmatprep.subr.bf16.mxu0 %v4406_v20  ;;  %v4424_v18 = vpack.c.bf16 %v1230_v13, %v1227_v10  ;;  %v4266_v20 = vpack.c.bf16 %v1187_v15, %v1184_v14  ;;  %v1237_v14 = vld [vmem:[#allocation5 + $0x7b0] sm:$0xff]  ;;  %v1240_v15 = vld [vmem:[#allocation5 + $0x7c8] sm:$0xff] }
 0x2db   : > { %4249 = vmatpush1.bf16.msra.mxu1 %v4248_v28  ;;  %4409 = vmatpush3.bf16.msra.mxu0 %v4408_v29  ;;  %v1189_v28 = vld [vmem:[#allocation5 + $0x630] sm:$0xff]  ;;  %v1192_v29 = vld [vmem:[#allocation5 + $0x648] sm:$0xff] }
 0x2dc   : > { %4251 = vmatprep.subr.bf16.mxu1 %v4250_v32  ;;  %4411 = vmatprep.subr.bf16.mxu0 %v4410_v33  ;;  %v4272_v32 = vpack.c.bf16 %v1192_v29, %v1189_v28  ;;  %v4274_v33 = vpack.c.bf16 %v1199_v31, %v1196_v30  ;;  %v1249_v29 = vld [vmem:[#allocation5 + $0x810] sm:$0xff]  ;;  %v1252_v30 = vld [vmem:[#allocation5 + $0x828] sm:$0xff] }
 0x2dd   : > { %v1256_v31 = vld [vmem:[#allocation5 + $0x848] sm:$0xff] }
 0x2df   : > { %4253 = vmatpush1.bf16.msra.mxu1 %v4252_v39  ;;  %4413 = vmatpush3.bf16.msra.mxu0 %v4412_v40  ;;  %v1208_v39 = vld [vmem:[#allocation5 + $0x6c8] sm:$0xff]  ;;  %v1211_v40 = vld [vmem:[#allocation5 + $0x6e0] sm:$0xff] }
 0x2e0   : > { %4255 = vmatprep.subr.bf16.mxu1 %v4254_v43  ;;  %4415 = vmatprep.subr.bf16.mxu0 %v4414_v44  ;;  %v4282_v42 = vpack.c.bf16 %v1211_v40, %v1208_v39  ;;  %v1207_v43 = vld [vmem:[#allocation5 + $0x6c0] sm:$0xff]  ;;  %v1214_v44 = vld [vmem:[#allocation5 + $0x6f8] sm:$0xff]  ;;  %v1264_v39 = vld [vmem:[#allocation5 + $0x888] sm:$0xff] }
 0x2e1   : > { %v1268_v40 = vld [vmem:[#allocation5 + $0x8a8] sm:$0xff] }
 0x2e3   : > { %4257 = vmatpush1.bf16.msra.mxu1 %v4256_v51  ;;  %4417 = vmatpush3.bf16.msra.mxu0 %v4416_v52  ;;  %v4288_v51 = vpack.c.bf16 %v1216_v48, %v1213_v47  ;;  %v4290_v52 = vpack.c.bf16 %v1223_v50, %v1220_v49  ;;  %v1273_v48 = vld [vmem:[#allocation5 + $0x8d0] sm:$0xff]  ;;  %v1276_v49 = vld [vmem:[#allocation5 + $0x8e8] sm:$0xff] }
 0x2e4   : > { %4259 = vmatprep.subr.bf16.mxu1 %v4258_v56  ;;  %4419 = vmatprep.subr.bf16.mxu0 %v4418_v57  ;;  %v1226_v56 = vld [vmem:[#allocation5 + $0x758] sm:$0xff]  ;;  %v1229_v57 = vld [vmem:[#allocation5 + $0x770] sm:$0xff]  ;;  %v4328_v50 = vpack.c.bf16 %v1276_v49, %v1273_v48 }
 0x2e5   : > { %v4294_v62 = vpack.c.bf16 %v1229_v57, %v1226_v56  ;;  %v1812_v56 = vld [vmem:[#allocation8 + $0x20] sm:$0xff] }
 0x2e6   : > { %v4426_v57 = vpack.c.bf16 %v1812_v56, %v1809_v55 }
 0x2e7   : > { %4261 = vmatpush1.bf16.msra.mxu1 %v4260_v3  ;;  %4421 = vmatpush3.bf16.msra.mxu0 %v4420_v4  ;;  %v4296_v3 = vpack.c.bf16 %v1228_v0, %v1225_v63  ;;  %v4298_v4 = vpack.c.bf16 %v1235_v2, %v1232_v1 }
 0x2e8   : > { %4263 = vmatprep.subr.bf16.mxu1 %v4262_v6  ;;  %4423 = vmatprep.subr.bf16.mxu0 %v4422_v7  ;;  %v1234_v6 = vld [vmem:[#allocation5 + $0x798] sm:$0xff] }
 0x2e9   : > { %v1238_v7 = vld [vmem:[#allocation5 + $0x7b8] sm:$0xff]  ;;  %v4300_v10 = vpack.c.bf16 %v1234_v6, %v1231_v5  ;;  %v1821_v6 = vld [vmem:[#allocation8 + $0x68] sm:$0xff] }
 0x2ea   : > { %v4302_v13 = vpack.c.bf16 %v1241_v8, %v1238_v7  ;;  %v1824_v7 = vld [vmem:[#allocation8 + $0x80] sm:$0xff] }
 0x2eb   : > { %4265 = vmatpush1.bf16.msra.mxu1 %v4264_v16  ;;  %4425 = vmatpush3.bf16.msra.mxu0 %v4424_v18  ;;  %v1244_v16 = vld [vmem:[#allocation5 + $0x7e8] sm:$0xff]  ;;  %v1247_v18 = vld [vmem:[#allocation5 + $0x800] sm:$0xff]  ;;  %v4434_v8 = vpack.c.bf16 %v1824_v7, %v1821_v6  ;;  %v1870_v6 = vld [vmem:[#allocation10 + $0x70] sm:$0xff] }
 0x2ec   : > { %4267 = vmatprep.subr.bf16.mxu1 %v4266_v20  ;;  %v4304_v20 = vpack.c.bf16 %v1240_v15, %v1237_v14  ;;  %v4306_v12 = vpack.c.bf16 %v1247_v18, %v1244_v16  ;;  %4427 = vmatprep.subr.bf16.mxu0 %v4426_v57  ;;  %v1827_v15 = vld [vmem:[#allocation8 + $0x98] sm:$0xff]  ;;  %v1830_v16 = vld [vmem:[#allocation8 + $0xb0] sm:$0xff]  ;;  %v1873_v7 = vld [vmem:[#allocation10 + $0x88] sm:$0xff] }
 0x2ed   : > { %v4438_v18 = vpack.c.bf16 %v1830_v16, %v1827_v15  ;;  %v1882_v15 = vld [vmem:[#allocation10 + $0xd0] sm:$0xff]  ;;  %v1885_v16 = vld [vmem:[#allocation10 + $0xe8] sm:$0xff] }
 0x2ee   : > { %1420 = vmatmul.mubr.f32.vlgmr.msra.gmra.mrb[4].mxu1 %v6015_v61  ;;  %1722 = vmatmul.mubr.f32.vlgmr.msra.gmra.mrb[16].mxu0 %v6021_v53  ;;  %v4276_v61 = vpack.c.bf16 %v1198_v21, %v1195_v34  ;;  %v1255_v21 = vld [vmem:[#allocation5 + $0x840] sm:$0xff] }
 0x2ef   : > { %1425 = vmatprep.mubr.f32.mxu1 %v6019_v24  ;;  %4269 = vmatpush1.bf16.msra.mxu1 %v4268_v26  ;;  %v4278_v24 = vpack.c.bf16 %v1205_v36, %v1202_v35  ;;  %v1253_v26 = vld [vmem:[#allocation5 + $0x830] sm:$0xff]  ;;  %v1258_v35 = vld [vmem:[#allocation5 + $0x858] sm:$0xff] }
 0x2f0   : > { %1726 = vmatprep.mubr.f32.mxu0 %v6027_v17  ;;  %4271 = vmatprep.subr.bf16.mxu1 %v4270_v27  ;;  %v4308_v27 = vpack.c.bf16 %v1246_v23, %v1243_v22  ;;  %v4310_v28 = vpack.c.bf16 %v1253_v26, %v1250_v25  ;;  %v1262_v36 = vld [vmem:[#allocation5 + $0x878] sm:$0xff]  ;;  %v1833_v23 = vld [vmem:[#allocation8 + $0xc8] sm:$0xff]  ;;  %v1836_v25 = vld [vmem:[#allocation8 + $0xe0] sm:$0xff] }
 0x2f1   : > { %v4442_v26 = vpack.c.bf16 %v1836_v25, %v1833_v23  ;;  %v1894_v23 = vld [vmem:[#allocation10 + $0x130] sm:$0xff]  ;;  %v1897_v25 = vld [vmem:[#allocation10 + $0x148] sm:$0xff] }
 0x2f2   : > { %1426 = vmatmul.mubr.f32.gmra.mrb[6].mxu1 %v6017_v19  ;;  %1727 = vmatmul.mubr.f32.gmra.mrb[18].mxu0 %v6025_v9  ;;  %v1210_v19 = vld [vmem:[#allocation5 + $0x6d8] sm:$0xff] }
 0x2f3   : > { %4273 = vmatpush1.bf16.msra.mxu1 %v4272_v32  ;;  %1495 = vmatprep.mubr.f32.mxu1 %v6023_v58  ;;  %v4284_v46 = vpack.c.bf16 %v1210_v19, %v1207_v43  ;;  %v4286_v58 = vpack.c.bf16 %v1217_v45, %v1214_v44  ;;  %v1259_v32 = vld [vmem:[#allocation5 + $0x860] sm:$0xff]  ;;  %v1270_v44 = vld [vmem:[#allocation5 + $0x8b8] sm:$0xff] }
 0x2f4   : > { %4275 = vmatprep.subr.bf16.mxu1 %v4274_v33  ;;  %1997 = vmatprep.mubr.f32.mxu0 %v5530_v11  ;;  %v4312_v33 = vpack.c.bf16 %v1252_v30, %v1249_v29  ;;  %v4314_v34 = vpack.c.bf16 %v1259_v32, %v1256_v31  ;;  %v1267_v19 = vld [vmem:[#allocation5 + $0x8a0] sm:$0xff]  ;;  %v1274_v45 = vld [vmem:[#allocation5 + $0x8d8] sm:$0xff] }
 0x2f5   : > { %v1839_v30 = vld [vmem:[#allocation8 + $0xf8] sm:$0xff]  ;;  %v1842_v31 = vld [vmem:[#allocation8 + $0x110] sm:$0xff] }
 0x2f6   : > { %v4446_v32 = vpack.c.bf16 %v1842_v31, %v1839_v30 }
 0x2f7   : > { %4277 = vmatpush1.bf16.msra.mxu1 %v4276_v61  ;;  %v1265_v61 = vld [vmem:[#allocation5 + $0x890] sm:$0xff] }
 0x2f8   : > { %4279 = vmatprep.subr.bf16.mxu1 %v4278_v24  ;;  %v4316_v24 = vpack.c.bf16 %v1258_v35, %v1255_v21  ;;  %v4318_v37 = vpack.c.bf16 %v1265_v61, %v1262_v36  ;;  %v1845_v35 = vld [vmem:[#allocation8 + $0x128] sm:$0xff]  ;;  %v1848_v36 = vld [vmem:[#allocation8 + $0x140] sm:$0xff] }
 0x2f9   : > { %v1844_v61 = vld [vmem:[#allocation8 + $0x120] sm:$0xff] }
 0x2fb   : > { %4281 = vmatpush1.bf16.msra.mxu1 %v4280_v41  ;;  %v1271_v41 = vld [vmem:[#allocation5 + $0x8c0] sm:$0xff] }
 0x2fc   : > { %4283 = vmatprep.subr.bf16.mxu1 %v4282_v42  ;;  %v4320_v42 = vpack.c.bf16 %v1264_v39, %v1261_v38  ;;  %v4322_v43 = vpack.c.bf16 %v1271_v41, %v1268_v40  ;;  %v1851_v38 = vld [vmem:[#allocation8 + $0x158] sm:$0xff]  ;;  %v1854_v39 = vld [vmem:[#allocation8 + $0x170] sm:$0xff]  ;;  %v5531_v40 = vmov 0.0|0.0  }
 0x2ff   : > { %4285 = vmatpush1.bf16.msra.mxu1 %v4284_v46  ;;  %v1277_v46 = vld [vmem:[#allocation5 + $0x8f0] sm:$0xff] }
 0x300   : > { %4287 = vmatprep.subr.bf16.mxu1 %v4286_v58  ;;  %v4324_v58 = vpack.c.bf16 %v1270_v44, %v1267_v19  ;;  %v4326_v47 = vpack.c.bf16 %v1277_v46, %v1274_v45  ;;  %v1853_v19 = vld [vmem:[#allocation8 + $0x168] sm:$0xff] }
 0x303   : > { %4289 = vmatpush1.bf16.msra.mxu1 %v4288_v51 }
 0x304   : > { %4291 = vmatprep.subr.bf16.mxu1 %v4290_v52 }
 0x307   : > { %4293 = vmatpush1.bf16.msra.mxu1 %v4292_v59  ;;  %v1808_v59 = vld [vmem:[#allocation8] sm:$0xff] }
 0x308   : > { %4295 = vmatprep.subr.bf16.mxu1 %v4294_v62  ;;  %v1811_v62 = vld [vmem:[#allocation8 + $0x18] sm:$0xff] }
 0x309   : > { %v4428_v0 = vpack.c.bf16 %v1811_v62, %v1808_v59 }
 0x30b   : > { %4297 = vmatpush1.bf16.msra.mxu1 %v4296_v3  ;;  %4429 = vmatpush1.bf16.msra.mxu0 %v4428_v0 }
 0x30c   : > { %4299 = vmatprep.subr.bf16.mxu1 %v4298_v4  ;;  %v1817_v4 = vld [vmem:[#allocation8 + $0x48] sm:$0xff] }
 0x30f   : > { %4301 = vmatpush1.bf16.msra.mxu1 %v4300_v10  ;;  %v1820_v10 = vld [vmem:[#allocation8 + $0x60] sm:$0xff] }
 0x310   : > { %4303 = vmatprep.subr.bf16.mxu1 %v4302_v13  ;;  %v1823_v13 = vld [vmem:[#allocation8 + $0x78] sm:$0xff] }
 0x311   : > { %v4436_v14 = vpack.c.bf16 %v1823_v13, %v1820_v10  ;;  %v1876_v10 = vld [vmem:[#allocation10 + $0xa0] sm:$0xff]  ;;  %v1879_v13 = vld [vmem:[#allocation10 + $0xb8] sm:$0xff] }
 0x313   : > { %4305 = vmatpush1.bf16.msra.mxu1 %v4304_v20  ;;  %v1826_v20 = vld [vmem:[#allocation8 + $0x90] sm:$0xff] }
 0x314   : > { %4307 = vmatprep.subr.bf16.mxu1 %v4306_v12  ;;  %v1829_v12 = vld [vmem:[#allocation8 + $0xa8] sm:$0xff] }
 0x315   : > { %v4440_v22 = vpack.c.bf16 %v1829_v12, %v1826_v20  ;;  %v1888_v20 = vld [vmem:[#allocation10 + $0x100] sm:$0xff]  ;;  %v1891_v12 = vld [vmem:[#allocation10 + $0x118] sm:$0xff] }
 0x317   : > { %4309 = vmatpush1.bf16.msra.mxu1 %v4308_v27  ;;  %v1832_v27 = vld [vmem:[#allocation8 + $0xc0] sm:$0xff] }
 0x318   : > { %4311 = vmatprep.subr.bf16.mxu1 %v4310_v28  ;;  %v1835_v28 = vld [vmem:[#allocation8 + $0xd8] sm:$0xff] }
 0x319   : > { %v4444_v29 = vpack.c.bf16 %v1835_v28, %v1832_v27  ;;  %v1900_v27 = vld [vmem:[#allocation10 + $0x160] sm:$0xff]  ;;  %v1903_v28 = vld [vmem:[#allocation10 + $0x178] sm:$0xff] }
 0x31b   : > { %4313 = vmatpush1.bf16.msra.mxu1 %v4312_v33  ;;  %v1838_v33 = vld [vmem:[#allocation8 + $0xf0] sm:$0xff] }
 0x31c   : > { %4315 = vmatprep.subr.bf16.mxu1 %v4314_v34  ;;  %v1841_v34 = vld [vmem:[#allocation8 + $0x108] sm:$0xff] }
 0x31d   : > { %v4448_v21 = vpack.c.bf16 %v1841_v34, %v1838_v33  ;;  %v5533_v34 = vmov 1983009808  }
 0x31f   : > { %4317 = vmatpush1.bf16.msra.mxu1 %v4316_v24  ;;  %v4450_v24 = vpack.c.bf16 %v1848_v36, %v1845_v35 }
 0x320   : > { %4319 = vmatprep.subr.bf16.mxu1 %v4318_v37  ;;  %v1847_v37 = vld [vmem:[#allocation8 + $0x138] sm:$0xff] }
 0x321   : > { %v4452_v41 = vpack.c.bf16 %v1847_v37, %v1844_v61 }
 0x323   : > { %4321 = vmatpush1.bf16.msra.mxu1 %v4320_v42  ;;  %v4454_v42 = vpack.c.bf16 %v1854_v39, %v1851_v38  ;;  %v3560_v39 = vld [vmem:[#allocation7] ss:$0 sm:$0xff] }
 0x324   : > { %4323 = vmatprep.subr.bf16.mxu1 %v4322_v43  ;;  %v1850_v43 = vld [vmem:[#allocation8 + $0x150] sm:$0xff] }
 0x325   : > { %v4456_v44 = vpack.c.bf16 %v1853_v19, %v1850_v43 }
 0x327   : > { %4325 = vmatpush1.bf16.msra.mxu1 %v4324_v58 }
 0x328   : > { %4327 = vmatprep.subr.bf16.mxu1 %v4326_v47 }
 0x32b   : > { %4329 = vmatpush1.bf16.msra.mxu1 %v4328_v50 }
 0x32c   : > { %4514 = vmatprep.subr.bf16.mxu1 %v5531_v40 }
 0x32e   : > { %1496 = vmatmul.mubr.f32.vlgmr.msra.gmra.mrb[4].mxu1 %v6021_v53  ;;  %v1815_v53 = vld [vmem:[#allocation8 + $0x38] sm:$0xff] }
 0x32f   : > { %1501 = vmatprep.mubr.f32.mxu1 %v6027_v17  ;;  %v1818_v17 = vld [vmem:[#allocation8 + $0x50] sm:$0xff] }
 0x330   : > { %v4430_v3 = vpack.c.bf16 %v1818_v17, %v1815_v53  ;;  %v1858_v17 = vld [vmem:[#allocation10 + $0x10] sm:$0xff] }
 0x332   : > { %1502 = vmatmul.mubr.f32.gmra.mrb[6].mxu1 %v6025_v9  ;;  %v1814_v9 = vld [vmem:[#allocation8 + $0x30] sm:$0xff]  ;;  %4431 = vmatprep.subr.bf16.mxu0 %v4430_v3  ;;  %v1861_v3 = vld [vmem:[#allocation10 + $0x28] sm:$0xff] }
 0x333   : > { %v4432_v5 = vpack.c.bf16 %v1817_v4, %v1814_v9  ;;  %3912 = vmatprep.mubr.msk.f32.mxu1 %vm5532_vm3, %v5530_v11  ;;  %v6054_v9 = vpack.c.bf16 %v1861_v3, %v1858_v17  ;;  %v1867_v4 = vld [vmem:[#allocation10 + $0x58] sm:$0xff] }
 0x335   : > { %4433 = vmatpush1.bf16.msra.mxu0 %v4432_v5  ;;  %4516 = vmatpush3.bf16.msra.mxu1 %v6054_v9 }
 0x336   : > { %4435 = vmatprep.subr.bf16.mxu0 %v4434_v8  ;;  %4517 = vmatprep.subr.bf16.mxu1 %v5531_v40  ;;  %v6061_v8 = vpack.c.bf16 %v1873_v7, %v1870_v6 }
 0x339   : > { %4437 = vmatpush1.bf16.msra.mxu0 %v4436_v14  ;;  %v6065_v14 = vpack.c.bf16 %v1879_v13, %v1876_v10  ;;  %v1810_v13 = vld [vmem:[#allocation8 + $0x10] sm:$0xff] }
 0x33a   : > { %4439 = vmatprep.subr.bf16.mxu0 %v4438_v18  ;;  %v6069_v18 = vpack.c.bf16 %v1885_v16, %v1882_v15  ;;  %v1813_v15 = vld [vmem:[#allocation8 + $0x28] sm:$0xff] }
 0x33d   : > { %4441 = vmatpush1.bf16.msra.mxu0 %v4440_v22  ;;  %v6073_v22 = vpack.c.bf16 %v1891_v12, %v1888_v20 }
 0x33e   : > { %4443 = vmatprep.subr.bf16.mxu0 %v4442_v26  ;;  %v6077_v26 = vpack.c.bf16 %v1897_v25, %v1894_v23 }
 0x341   : > { %4445 = vmatpush1.bf16.msra.mxu0 %v4444_v29  ;;  %v6081_v29 = vpack.c.bf16 %v1903_v28, %v1900_v27  ;;  %v4459_v28 = vpack.c.bf16 %v1813_v15, %v1810_v13  ;;  %v1874_v13 = vld [vmem:[#allocation10 + $0x90] sm:$0xff]  ;;  %v1877_v15 = vld [vmem:[#allocation10 + $0xa8] sm:$0xff] }
 0x342   : > { %4447 = vmatprep.subr.bf16.mxu0 %v4446_v32 }
 0x345   : > { %4449 = vmatpush1.bf16.msra.mxu0 %v4448_v21  ;;  %v1760_v21 = vunpack.c.l.s4 %v5533_v34 }
 0x346   : > { %4451 = vmatprep.subr.bf16.mxu0 %v4450_v24  ;;  %v6094_v24 = vshrl.u32 %v679_v60, 7 }
 0x347   : > { %v1761_v38 = vunpack.c.0.s8 %v1760_v21  ;;  %v1822_v21 = vld [vmem:[#allocation8 + $0x70] sm:$0xff] }
 0x349   : > { %4453 = vmatpush1.bf16.msra.mxu0 %v4452_v41  ;;  %v1764_v43 = vsub.s32 %v1761_v38, %v6094_v24 }
 0x34a   : > { %4455 = vmatprep.subr.bf16.mxu0 %v4454_v42 }
 0x34d   : > { %4457 = vmatpush1.bf16.msra.mxu0 %v4456_v44 }
 0x34e   : > { %4458 = vmatprep.subr.bf16.mxu0 %v5531_v40 }
 0x381   : > { %v3609_v51 = vpop.f32.mrb[8].mxu0 }
 0x382   : > { %v3610_v52 = vpop.f32.mrb[9].mxu0 }
 0x383   : > { %v6044_v54 = vadd.f32 %v3610_v52, %v3609_v51 }
 0x385   : > { %v3612_v63 = vpop.f32.mrb[10].mxu0 }
 0x386   : > { %v3613_v1 = vpop.f32.mrb[11].mxu0 }
 0x387   : > { %v6046_v2 = vadd.f32 %v3613_v1, %v3612_v63 }
 0x3a1   : > { %v3647_v45 = vpop.f32.mrb[12].mxu0 }
 0x3a2   : > { %v3648_v46 = vpop.f32.mrb[13].mxu0 }
 0x3a3   : > { %v3649_v58 = vadd.f32 %v3648_v46, %v3647_v45 }
 0x3a5   : > { %v1649_v47 = vadd.f32 %v3649_v58, %v6044_v54  ;;  %v3650_v48 = vpop.f32.mrb[14].mxu0 }
 0x3a6   : > { %v3651_v49 = vpop.f32.mrb[15].mxu0 }
 0x3a7   : > { %v3652_v50 = vadd.f32 %v3651_v49, %v3650_v48 }
 0x3a9   : > { %v1654_v51 = vadd.f32 %v3652_v50, %v6046_v2  ;;  %v1864_v2 = vld [vmem:[#allocation10 + $0x40] sm:$0xff] }
 0x3aa   : > { %v6058_v5 = vpack.c.bf16 %v1867_v4, %v1864_v2 }
 0x3ac   : > { %4519 = vmatpush3.bf16.msra.mxu1 %v6058_v5 }
 0x3ad   : > { %4520 = vmatprep.subr.bf16.mxu1 %v5531_v40 }
 0x3b0   : > { %4522 = vmatpush3.bf16.msra.mxu1 %v6061_v8 }
 0x3b1   : > { %4523 = vmatprep.subr.bf16.mxu1 %v5531_v40 }
 0x3b4   : > { %4525 = vmatpush3.bf16.msra.mxu1 %v6065_v14 }
 0x3b5   : > { %4526 = vmatprep.subr.bf16.mxu1 %v5531_v40 }
 0x3b8   : > { %4528 = vmatpush3.bf16.msra.mxu1 %v6069_v18 }
 0x3b9   : > { %4529 = vmatprep.subr.bf16.mxu1 %v5531_v40 }
 0x3bc   : > { %4531 = vmatpush3.bf16.msra.mxu1 %v6073_v22 }
 0x3bd   : > { %4532 = vmatprep.subr.bf16.mxu1 %v5531_v40 }
 0x3c0   : > { %4534 = vmatpush3.bf16.msra.mxu1 %v6077_v26 }
 0x3c1   : > { %v3685_v52 = vpop.f32.mrb[16].mxu0  ;;  %4535 = vmatprep.subr.bf16.mxu1 %v5531_v40 }
 0x3c2   : > { %v3686_v55 = vpop.f32.mrb[17].mxu0 }
 0x3c3   : > { %v3687_v56 = vadd.f32 %v3686_v55, %v3685_v52 }
 0x3c4   : > { %4537 = vmatpush3.bf16.msra.mxu1 %v6081_v29 }
 0x3c5   : > { %v1724_v57 = vadd.f32 %v3687_v56, %v1649_v47  ;;  %v3688_v59 = vpop.f32.mrb[18].mxu0  ;;  %4570 = vmatprep.subr.bf16.mxu1 %v5531_v40 }
 0x3c6   : > { %v3689_v62 = vpop.f32.mrb[19].mxu0 }
 0x3c7   : > { %v3690_v63 = vadd.f32 %v3689_v62, %v3688_v59  ;;  %v1743_v1 = vrot.slane %v1724_v57, 2  ;;  %3913 = vmatmul.mubr.f32.vlgmr.msra.gmra.mrb[8].mxu1 %v5530_v11 }
 0x3c8   : > { %4572 = vmatpush3.bf16.msra.mxu1 %v6054_v9  ;;  %3947 = vmatprep.mubr.msk.f32.mxu1 %vm5532_vm3, %v5530_v11 }
 0x3c9   : > { %v1729_v0 = vadd.f32 %v3690_v63, %v1654_v51  ;;  %4573 = vmatprep.subr.bf16.mxu1 %v5531_v40 }
 0x3cb   : > { %v1744_v54 = vrot.slane %v1729_v0, 2 }
 0x3cc   : > { %4575 = vmatpush3.bf16.msra.mxu1 %v6058_v5 }
 0x3cd   : > { %v1745_v53 = vsel %vm1742_vm4, %v1743_v1, %v1744_v54  ;;  %4576 = vmatprep.subr.bf16.mxu1 %v5531_v40 }
 0x3d0   : > { %4578 = vmatpush3.bf16.msra.mxu1 %v6061_v8 }
 0x3d1   : > { %4579 = vmatprep.subr.bf16.mxu1 %v5531_v40 }
 0x3d4   : > { %4581 = vmatpush3.bf16.msra.mxu1 %v6065_v14 }
 0x3d5   : > { %4582 = vmatprep.subr.bf16.mxu1 %v5531_v40 }
 0x3d8   : > { %4584 = vmatpush3.bf16.msra.mxu1 %v6069_v18 }
 0x3d9   : > { %4585 = vmatprep.subr.bf16.mxu1 %v5531_v40 }
 0x3dc   : > { %4587 = vmatpush3.bf16.msra.mxu1 %v6073_v22 }
 0x3dd   : > { %4588 = vmatprep.subr.bf16.mxu1 %v5531_v40 }
 0x3e0   : > { %4590 = vmatpush3.bf16.msra.mxu1 %v6077_v26 }
 0x3e1   : > { %4591 = vmatprep.subr.bf16.mxu1 %v5531_v40 }
 0x3e4   : > { %4593 = vmatpush3.bf16.msra.mxu1 %v6081_v29 }
 0x3e5   : > { %4626 = vmatprep.subr.bf16.mxu1 %v5531_v40 }
 0x401   : > { %v1497_v30 = vpop.f32.mrb[4].mxu1 }
 0x402   : > { %v1499_v31 = vpop.f32.mrb[5].mxu1 }
 0x403   : > { %v1735_v35 = vrot.slane %v1499_v31, 1  ;;  %v1816_v31 = vld [vmem:[#allocation8 + $0x40] sm:$0xff] }
 0x405   : > { %v1503_v32 = vpop.f32.mrb[6].mxu1 }
 0x406   : > { %v1504_v33 = vpop.f32.mrb[7].mxu1  ;;  %v1819_v32 = vld [vmem:[#allocation8 + $0x58] sm:$0xff] }
 0x407   : > { %v1736_v36 = vrot.slane %v1504_v33, 1  ;;  %v4462_v34 = vpack.c.bf16 %v1819_v32, %v1816_v31  ;;  %v1890_v31 = vld [vmem:[#allocation10 + $0x110] sm:$0xff] }
 0x409   : > { %v1737_v61 = vsel %vm1734_vm5, %v1735_v35, %v1736_v36  ;;  %v1825_v35 = vld [vmem:[#allocation8 + $0x88] sm:$0xff] }
 0x40a   : > { %v1739_v37 = vadd.f32 %v1737_v61, %v1497_v30  ;;  %v4465_v36 = vpack.c.bf16 %v1825_v35, %v1822_v21  ;;  %v1828_v61 = vld [vmem:[#allocation8 + $0xa0] sm:$0xff]  ;;  %v1889_v21 = vld [vmem:[#allocation10 + $0x108] sm:$0xff] }
 0x40b   : > { %v1893_v35 = vld [vmem:[#allocation10 + $0x128] sm:$0xff] }
 0x40c   : > { %v1747_v41 = vadd.f32 %v1745_v53, %v1739_v37  ;;  %v1831_v37 = vld [vmem:[#allocation8 + $0xb8] sm:$0xff] }
 0x40d   : > { %v4468_v38 = vpack.c.bf16 %v1831_v37, %v1828_v61 }
 0x40e   : > { %v1755_v42 = vadd.f32 %v3560_v39, %v1747_v41  ;;  %v1834_v39 = vld [vmem:[#allocation8 + $0xd0] sm:$0xff]  ;;  %v1837_v41 = vld [vmem:[#allocation8 + $0xe8] sm:$0xff] }
 0x410   : > { %v1756_v19 = vmax.f32 %v1755_v42, 0.0  ;;  %v4471_v42 = vpack.c.bf16 %v1837_v41, %v1834_v39  ;;  %v1895_v39 = vld [vmem:[#allocation10 + $0x138] sm:$0xff] }
 0x411   : > { %v1899_v41 = vld [vmem:[#allocation10 + $0x158] sm:$0xff] }
 0x412   : > { %v1758_v44 = vcombine.high %v1756_v19, %v1756_v19  ;;  %v1765_v60 = vrot.slane %v1756_v19, %v1764_v43  ;;  %v1843_v19 = vld [vmem:[#allocation8 + $0x118] sm:$0xff] }
 0x414   : > { %v1772_v45 = vrot.slane %v1758_v44, %v1764_v43  ;;  %v1773_v46 = vcombine.high %v1765_v60, %v1765_v60  ;;  %v1780_v58 = vsel %vm1779_vm6, %v1765_v60, -inf  ;;  %v1840_v43 = vld [vmem:[#allocation8 + $0x100] sm:$0xff]  ;;  %v1846_v60 = vld [vmem:[#allocation8 + $0x130] sm:$0xff] }
 0x415   : > { %v1781_v47 = vrot.slane %v1780_v58, 4  ;;  %v4474_v44 = vpack.c.bf16 %v1843_v19, %v1840_v43 }
 0x416   : > { %v1774_v48 = vcombine.high %v1772_v45, %v1772_v45  ;;  %v1787_v49 = vsel %vm1779_vm6, %v1773_v46, -inf  ;;  %v1794_v50 = vsel %vm1779_vm6, %v1772_v45, -inf  ;;  %v1849_v45 = vld [vmem:[#allocation8 + $0x148] sm:$0xff] }
 0x417   : > { %v1782_v51 = vmax.f32 %v1780_v58, %v1781_v47  ;;  %v1788_v52 = vrot.slane %v1787_v49, 4  ;;  %v1795_v55 = vrot.slane %v1794_v50, 4  ;;  %v4477_v46 = vpack.c.bf16 %v1849_v45, %v1846_v60  ;;  %v1852_v58 = vld [vmem:[#allocation8 + $0x160] sm:$0xff]  ;;  %v1855_v47 = vld [vmem:[#allocation8 + $0x178] sm:$0xff]  ;;  %v1901_v60 = vld [vmem:[#allocation10 + $0x168] sm:$0xff] }
 0x418   : > { %v1801_v56 = vsel %vm1779_vm6, %v1774_v48, -inf  ;;  %v1857_v48 = vld [vmem:[#allocation10 + $0x8] sm:$0xff] }
 0x419   : > { %v1783_v57 = vrot.slane %v1782_v51, 2  ;;  %v1789_v59 = vmax.f32 %v1787_v49, %v1788_v52  ;;  %v1796_v62 = vmax.f32 %v1794_v50, %v1795_v55  ;;  %v1802_v63 = vrot.slane %v1801_v56, 4  ;;  %v1860_v49 = vld [vmem:[#allocation10 + $0x20] sm:$0xff]  ;;  %v1859_v55 = vld [vmem:[#allocation10 + $0x18] sm:$0xff] }
 0x41a   : > { %v4480_v50 = vpack.c.bf16 %v1855_v47, %v1852_v58  ;;  %v1856_v52 = vld [vmem:[#allocation10] sm:$0xff] }
 0x41b   : > { %v1784_v0 = vmax.f32 %v1782_v51, %v1783_v57  ;;  %v1790_v1 = vrot.slane %v1789_v59, 2  ;;  %v1797_v54 = vrot.slane %v1796_v62, 2  ;;  %v1803_v53 = vmax.f32 %v1801_v56, %v1802_v63  ;;  %v1863_v56 = vld [vmem:[#allocation10 + $0x38] sm:$0xff]  ;;  %v1866_v57 = vld [vmem:[#allocation10 + $0x50] sm:$0xff] }
 0x41c   : > { %v6125_v51 = vpack.c.bf16 %v1860_v49, %v1857_v48  ;;  %v1862_v63 = vld [vmem:[#allocation10 + $0x30] sm:$0xff] }
 0x41d   : > { %v1785_v17 = vrot.slane %v1784_v0, 1  ;;  %v1791_v3 = vmax.f32 %v1789_v59, %v1790_v1  ;;  %v1798_v2 = vmax.f32 %v1796_v62, %v1797_v54  ;;  %v1804_v4 = vrot.slane %v1803_v53, 2  ;;  %v1869_v1 = vld [vmem:[#allocation10 + $0x68] sm:$0xff]  ;;  %v1872_v54 = vld [vmem:[#allocation10 + $0x80] sm:$0xff] }
 0x41e   : > { %v6127_v59 = vpack.c.bf16 %v1859_v55, %v1856_v52  ;;  %v6130_v62 = vpack.c.bf16 %v1866_v57, %v1863_v56  ;;  %v6194_v52 = vsub.s32 0, %v6094_v24  ;;  %v1904_v55 = vld [vmem:[#allocation11] sm:$0x7]  ;;  %v1905_v56 = vld [vmem:[#allocation13] sm:$0x7]  ;;  %v6197_v57 = vsub.s32 1, %v6094_v24 }
 0x41f   : > { %v1792_v6 = vrot.slane %v1791_v3, 1  ;;  %v1799_v7 = vrot.slane %v1798_v2, 1  ;;  %v1805_v10 = vmax.f32 %v1803_v53, %v1804_v4  ;;  %v1786_v16 = vmax.f32 %v1784_v0, %v1785_v17  ;;  %v1865_v0 = vld [vmem:[#allocation10 + $0x48] sm:$0xff]  ;;  %v1875_v4 = vld [vmem:[#allocation10 + $0x98] sm:$0xff] }
 0x420   : > { %v6133_v53 = vpack.c.bf16 %v1865_v0, %v1862_v63  ;;  %v6137_v17 = vpack.c.bf16 %v1872_v54, %v1869_v1  ;;  %v1910_v63 = vrot.slane %v1904_v55, %v6194_v52  ;;  %v6201_v0 = vrot.slane %v1905_v56, %v6194_v52 }
 0x421   : > { %v1793_v20 = vmax.f32 %v1791_v3, %v1792_v6  ;;  %v1800_v12 = vmax.f32 %v1798_v2, %v1799_v7  ;;  %v1806_v23 = vrot.slane %v1805_v10, 1  ;;  %v1868_v3 = vld [vmem:[#allocation10 + $0x60] sm:$0xff]  ;;  %v1871_v2 = vld [vmem:[#allocation10 + $0x78] sm:$0xff]  ;;  %v1878_v6 = vld [vmem:[#allocation10 + $0xb0] sm:$0xff]  ;;  %v6204_v1 = vrot.slane %v1905_v56, %v6197_v57 }
 0x422   : > { %v6140_v7 = vpack.c.bf16 %v1871_v2, %v1868_v3  ;;  %v1914_v54 = vrot.slane %v1904_v55, %v6197_v57 }
 0x423   : > { %v6113_v25 = vmax.f32 %v1805_v10, %v1806_v23  ;;  %v1927_v27 = vsel %vm1926_vm7, %v1793_v20, %v1786_v16  ;;  %v6143_v10 = vpack.c.bf16 %v1878_v6, %v1875_v4  ;;  %v1881_v16 = vld [vmem:[#allocation10 + $0xc8] sm:$0xff]  ;;  %v1884_v20 = vld [vmem:[#allocation10 + $0xe0] sm:$0xff] }
 0x424   : > { %v1929_v30 = vsel %vm1928_vm8, %v1800_v12, %v1927_v27  ;;  %v6146_v12 = vpack.c.bf16 %v1877_v15, %v1874_v13  ;;  %v6149_v23 = vpack.c.bf16 %v1884_v20, %v1881_v16  ;;  %v1880_v27 = vld [vmem:[#allocation10 + $0xc0] sm:$0xff] }
 0x425   : > { %v1931_v33 = vsel %vm1930_vm9, %v6113_v25, %v1929_v30  ;;  %v1887_v30 = vld [vmem:[#allocation10 + $0xf8] sm:$0xff] }
 0x426   : > { %1998 = vmatmul.mubr.f32.vlgmr.msra.gmra.mrb[20].mxu0 %v1931_v33 }
 0x427   : > { %4460 = vmatpush3.bf16.msra.mxu0 %v4459_v28  ;;  %3877 = vmatprep.mubr.msk.f32.mxu0 %vm5532_vm3, %v5530_v11  ;;  %v1883_v28 = vld [vmem:[#allocation10 + $0xd8] sm:$0xff] }
 0x428   : > { %4461 = vmatprep.subr.bf16.mxu0 %v5531_v40  ;;  %v6152_v32 = vpack.c.bf16 %v1883_v28, %v1880_v27 }
 0x42b   : > { %4463 = vmatpush3.bf16.msra.mxu0 %v4462_v34  ;;  %v1886_v34 = vld [vmem:[#allocation10 + $0xf0] sm:$0xff] }
 0x42c   : > { %4464 = vmatprep.subr.bf16.mxu0 %v5531_v40  ;;  %v6158_v61 = vpack.c.bf16 %v1889_v21, %v1886_v34  ;;  %v6216_v34 = vsub.s32 2, %v6094_v24 }
 0x42e   : > { %v6219_v21 = vrot.slane %v1905_v56, %v6216_v34 }
 0x42f   : > { %4466 = vmatpush3.bf16.msra.mxu0 %v4465_v36  ;;  %v1896_v36 = vld [vmem:[#allocation10 + $0x140] sm:$0xff] }
 0x430   : > { %4467 = vmatprep.subr.bf16.mxu0 %v5531_v40  ;;  %v6161_v37 = vpack.c.bf16 %v1896_v36, %v1893_v35  ;;  %v1918_v36 = vrot.slane %v1904_v55, %v6216_v34 }
 0x433   : > { %4469 = vmatpush3.bf16.msra.mxu0 %v4468_v38  ;;  %v1892_v38 = vld [vmem:[#allocation10 + $0x120] sm:$0xff] }
 0x434   : > { %4470 = vmatprep.subr.bf16.mxu0 %v5531_v40  ;;  %v6164_v43 = vpack.c.bf16 %v1895_v39, %v1892_v38 }
 0x437   : > { %4472 = vmatpush3.bf16.msra.mxu0 %v4471_v42  ;;  %v1902_v42 = vld [vmem:[#allocation10 + $0x170] sm:$0xff] }
 0x438   : > { %4473 = vmatprep.subr.bf16.mxu0 %v5531_v40  ;;  %v6167_v19 = vpack.c.bf16 %v1902_v42, %v1899_v41 }
 0x43b   : > { %4475 = vmatpush3.bf16.msra.mxu0 %v4474_v44  ;;  %v1898_v44 = vld [vmem:[#allocation10 + $0x150] sm:$0xff] }
 0x43c   : > { %4476 = vmatprep.subr.bf16.mxu0 %v5531_v40  ;;  %v6170_v45 = vpack.c.bf16 %v1901_v60, %v1898_v44 }
 0x43f   : > { %4478 = vmatpush3.bf16.msra.mxu0 %v4477_v46 }
 0x440   : > { %4479 = vmatprep.subr.bf16.mxu0 %v5531_v40 }
 0x443   : > { %4481 = vmatpush3.bf16.msra.mxu0 %v4480_v50 }
 0x444   : > { %4483 = vmatprep.subr.bf16.mxu0 %v6125_v51 }
 0x446   : > { %3878 = vmatmul.mubr.f32.vlgmr.msra.gmra.mrb[22].mxu0 %v1931_v33  ;;  %v6155_v33 = vpack.c.bf16 %v1890_v31, %v1887_v30 }
 0x447   : > { %4485 = vmatpush1.bf16.msra.mxu0 %v6127_v59  ;;  %2154 = vmatprep.mubr.f32.mxu0 %v5530_v11 }
 0x448   : > { %4487 = vmatprep.subr.bf16.mxu0 %v6130_v62 }
 0x44b   : > { %4489 = vmatpush1.bf16.msra.mxu0 %v6133_v53 }
 0x44c   : > { %4491 = vmatprep.subr.bf16.mxu0 %v6137_v17 }
 0x44f   : > { %4493 = vmatpush1.bf16.msra.mxu0 %v6140_v7 }
 0x450   : > { %4495 = vmatprep.subr.bf16.mxu0 %v6143_v10 }
 0x453   : > { %4497 = vmatpush1.bf16.msra.mxu0 %v6146_v12 }
 0x454   : > { %4499 = vmatprep.subr.bf16.mxu0 %v6149_v23 }
 0x457   : > { %4501 = vmatpush1.bf16.msra.mxu0 %v6152_v32 }
 0x458   : > { %4503 = vmatprep.subr.bf16.mxu0 %v6155_v33 }
 0x45b   : > { %4505 = vmatpush1.bf16.msra.mxu0 %v6158_v61 }
 0x45c   : > { %4507 = vmatprep.subr.bf16.mxu0 %v6161_v37 }
 0x45f   : > { %4509 = vmatpush1.bf16.msra.mxu0 %v6164_v43 }
 0x460   : > { %4511 = vmatprep.subr.bf16.mxu0 %v6167_v19 }
 0x463   : > { %4513 = vmatpush1.bf16.msra.mxu0 %v6170_v45 }
 0x464   : > { %4539 = vmatprep.subr.bf16.mxu0 %v6125_v51 }
 0x466   : > { %2155 = vmatmul.mubr.f32.vlgmr.msra.gmra.mrb[24].mxu0 %v5530_v11 }
 0x467   : > { %4541 = vmatpush1.bf16.msra.mxu0 %v6127_v59  ;;  %2316 = vmatprep.mubr.f32.mxu0 %v5530_v11 }
 0x468   : > { %4543 = vmatprep.subr.bf16.mxu0 %v6130_v62 }
 0x46b   : > { %4545 = vmatpush1.bf16.msra.mxu0 %v6133_v53 }
 0x46c   : > { %4547 = vmatprep.subr.bf16.mxu0 %v6137_v17 }
 0x46f   : > { %4549 = vmatpush1.bf16.msra.mxu0 %v6140_v7 }
 0x470   : > { %4551 = vmatprep.subr.bf16.mxu0 %v6143_v10 }
 0x473   : > { %4553 = vmatpush1.bf16.msra.mxu0 %v6146_v12 }
 0x474   : > { %4555 = vmatprep.subr.bf16.mxu0 %v6149_v23 }
 0x477   : > { %4557 = vmatpush1.bf16.msra.mxu0 %v6152_v32 }
 0x478   : > { %4559 = vmatprep.subr.bf16.mxu0 %v6155_v33 }
 0x47b   : > { %4561 = vmatpush1.bf16.msra.mxu0 %v6158_v61 }
 0x47c   : > { %4563 = vmatprep.subr.bf16.mxu0 %v6161_v37 }
 0x47f   : > { %4565 = vmatpush1.bf16.msra.mxu0 %v6164_v43 }
 0x480   : > { %4567 = vmatprep.subr.bf16.mxu0 %v6167_v19 }
 0x483   : > { %4569 = vmatpush1.bf16.msra.mxu0 %v6170_v45 }
 0x484   : > { %4595 = vmatprep.subr.bf16.mxu0 %v6125_v51 }
 0x49a   : > { %v2227_v46 = vpop.f32.mrb[8].mxu1 }
 0x49b   : > { %v3914_v58 = vpop.f32.mrb[9].mxu1  ;;  %v2228_v39 = vadd.f32 %v2227_v46, %v6219_v21 }
 0x4f9   : > { %v1999_v47 = vpop.f32.mrb[20].mxu0 }
 0x4fa   : > { %v2001_v48 = vpop.f32.mrb[21].mxu0  ;;  %v6207_v2 = vadd.f32 %v1999_v47, %v1910_v63 }
 0x4fb   : > { %v6212_v16 = vadd.f32 %v2001_v48, %v1914_v54 }
 0x519   : > { %v2070_v49 = vpop.f32.mrb[22].mxu0 }
 0x51a   : > { %v3879_v50 = vpop.f32.mrb[23].mxu0  ;;  %v6223_v42 = vadd.f32 %v2070_v49, %v1918_v36 }
 0x539   : > { %v2156_v3 = vpop.f32.mrb[24].mxu0 }
 0x53a   : > { %v2157_v4 = vadd.f32 %v2156_v3, %v6201_v0  ;;  %v2158_v6 = vpop.f32.mrb[25].mxu0 }
 0x53b   : > { %v2159_v13 = vadd.f32 %v2158_v6, %v6204_v1 }
 0x53c   : > { %v2231_v15 = vadd.f32 %v2157_v4, %v6207_v2 }
 0x53d   : > { %v2238_v27 = vadd.f32 %v2159_v13, %v6212_v16 }
 0x53e   : > { %v3561_v20 = vmul.f32 -1.442695, %v2231_v15 }
 0x53f   : > { %v3562_v28 = vmul.f32 -1.442695, %v2238_v27 }
 0x540   : > { %5035 = vpow2.f32 %v3561_v20 }
 0x541   : > { %5037 = vpow2.f32 %v3562_v28 }
 0x54a   : > { %v5036_v30 = vpop.eup %5035 }
 0x54b   : > { %v2235_v31 = vadd.f32 1.0, %v5036_v30  ;;  %v5038_v35 = vpop.eup %5037 }
 0x54c   : > { %v2242_v38 = vadd.f32 1.0, %v5038_v35 }
 0x54d   : > { %5039 = vrcp.f32 %v2235_v31 }
 0x54e   : > { %5041 = vrcp.f32 %v2242_v38 }
 0x557   : > { %v5040_v41 = vpop.eup %5039 }
 0x558   : > { %v2245_v44 = vmul.f32 %v5040_v41, %v2228_v39  ;;  %v5042_v58 = vpop.eup %5041 }
 0x559   : > { %v2248_v24 = vsub.f32 1.0, %v5042_v58  ;;  %v2250_v50 = vmul.f32 0.0, %v5042_v58 }
 0x55a   : > { %v2246_v60 = vadd.f32 %v2245_v44, %v6223_v42 }
 0x55c   : > { %5043 = vtanh.f32 %v2246_v60 }
 0x566   : > { %v5044_v47 = vpop.eup %5043 }
 0x567   : > { %v2249_v48 = vmul.f32 %v5044_v47, %v2248_v24 }
 0x569   : > { %v6226_v56 = vadd.f32 %v2250_v50, %v2249_v48 }
 0x56b   : > { %2317 = vmatmul.mubr.f32.vlgmr.msra.gmra.mrb[26].mxu0 %v6226_v56  ;;  %3948 = vmatmul.mubr.f32.vlgmr.msra.gmra.mrb[10].mxu1 %v6226_v56  ;;  %v2422_v39 = vrot.slane %v6226_v56, 7 }
 0x56c   : > { %4597 = vmatpush1.bf16.msra.mxu0 %v6127_v59  ;;  %4628 = vmatpush3.bf16.msra.mxu1 %v6054_v9 }
 0x56d   : > { %4599 = vmatprep.subr.bf16.mxu0 %v6130_v62  ;;  %4629 = vmatprep.subr.bf16.mxu1 %v5531_v40 }
 0x56e   : > { %2493 = vmatprep.mubr.f32.mxu0 %v5530_v11  ;;  %3982 = vmatprep.mubr.msk.f32.mxu1 %vm5532_vm3, %v5530_v11 }
 0x570   : > { %4601 = vmatpush1.bf16.msra.mxu0 %v6133_v53  ;;  %4631 = vmatpush3.bf16.msra.mxu1 %v6058_v5 }
 0x571   : > { %4603 = vmatprep.subr.bf16.mxu0 %v6137_v17  ;;  %4632 = vmatprep.subr.bf16.mxu1 %v5531_v40 }
 0x574   : > { %4605 = vmatpush1.bf16.msra.mxu0 %v6140_v7  ;;  %4634 = vmatpush3.bf16.msra.mxu1 %v6061_v8 }
 0x575   : > { %4607 = vmatprep.subr.bf16.mxu0 %v6143_v10  ;;  %4635 = vmatprep.subr.bf16.mxu1 %v5531_v40 }
 0x578   : > { %4609 = vmatpush1.bf16.msra.mxu0 %v6146_v12  ;;  %4637 = vmatpush3.bf16.msra.mxu1 %v6065_v14 }
 0x579   : > { %4611 = vmatprep.subr.bf16.mxu0 %v6149_v23  ;;  %4638 = vmatprep.subr.bf16.mxu1 %v5531_v40 }
 0x57c   : > { %4613 = vmatpush1.bf16.msra.mxu0 %v6152_v32  ;;  %4640 = vmatpush3.bf16.msra.mxu1 %v6069_v18 }
 0x57d   : > { %4615 = vmatprep.subr.bf16.mxu0 %v6155_v33  ;;  %4641 = vmatprep.subr.bf16.mxu1 %v5531_v40 }
 0x580   : > { %4617 = vmatpush1.bf16.msra.mxu0 %v6158_v61  ;;  %4643 = vmatpush3.bf16.msra.mxu1 %v6073_v22 }
 0x581   : > { %4619 = vmatprep.subr.bf16.mxu0 %v6161_v37  ;;  %4644 = vmatprep.subr.bf16.mxu1 %v5531_v40 }
 0x584   : > { %4621 = vmatpush1.bf16.msra.mxu0 %v6164_v43  ;;  %4646 = vmatpush3.bf16.msra.mxu1 %v6077_v26 }
 0x585   : > { %4623 = vmatprep.subr.bf16.mxu0 %v6167_v19  ;;  %4647 = vmatprep.subr.bf16.mxu1 %v5531_v40 }
 0x588   : > { %4625 = vmatpush1.bf16.msra.mxu0 %v6170_v45  ;;  %4649 = vmatpush3.bf16.msra.mxu1 %v6081_v29 }
 0x589   : > { %4651 = vmatprep.subr.bf16.mxu0 %v6125_v51  ;;  %4682 = vmatprep.subr.bf16.mxu1 %v5531_v40 }
 0x63e   : > { %v2318_v46 = vpop.f32.mrb[26].mxu0  ;;  %v2389_v49 = vpop.f32.mrb[10].mxu1 }
 0x63f   : > { %v2319_v55 = vadd.f32 %v2318_v46, %v6201_v0  ;;  %v2320_v63 = vpop.f32.mrb[27].mxu0  ;;  %v3949_v54 = vpop.f32.mrb[11].mxu1  ;;  %v2390_v35 = vadd.f32 %v2389_v49, %v6219_v21 }
 0x640   : > { %v2321_v3 = vadd.f32 %v2320_v63, %v6204_v1 }
 0x641   : > { %v2394_v4 = vrot.slane %v2319_v55, 7  ;;  %v2414_v36 = vrot.slane %v2390_v35, 7  ;;  %v2784_v35 = vld [vmem:[#allocation14 + $0x30] sm:$0xff] }
 0x642   : > { %v2404_v6 = vrot.slane %v2321_v3, 7 }
 0x643   : > { %v2396_v13 = vadd.f32 %v2394_v4, %v6207_v2  ;;  %v2778_v4 = vld [vmem:[#allocation14] sm:$0xff] }
 0x644   : > { %v2406_v15 = vadd.f32 %v2404_v6, %v6212_v16 }
 0x645   : > { %v3563_v20 = vmul.f32 -1.442695, %v2396_v13  ;;  %v2781_v13 = vld [vmem:[#allocation14 + $0x18] sm:$0xff] }
 0x646   : > { %v3564_v27 = vmul.f32 -1.442695, %v2406_v15  ;;  %v2780_v15 = vld [vmem:[#allocation14 + $0x10] sm:$0xff] }
 0x647   : > { %5045 = vpow2.f32 %v3563_v20  ;;  %v2783_v20 = vld [vmem:[#allocation14 + $0x28] sm:$0xff] }
 0x648   : > { %5047 = vpow2.f32 %v3564_v27  ;;  %v2785_v27 = vld [vmem:[#allocation14 + $0x38] sm:$0xff] }
 0x651   : > { %v5046_v51 = vpop.eup %5045 }
 0x652   : > { %v5048_v28 = vpop.eup %5047  ;;  %v2400_v30 = vadd.f32 1.0, %v5046_v51  ;;  %v2788_v51 = vld [vmem:[#allocation14 + $0x50] sm:$0xff] }
 0x653   : > { %v2410_v31 = vadd.f32 1.0, %v5048_v28 }
 0x654   : > { %5049 = vrcp.f32 %v2400_v30  ;;  %v4708_v30 = vpack.c.bf16 %v2781_v13, %v2778_v4  ;;  %v2815_v4 = vld [vmem:[#allocation14 + $0x128] sm:$0xff] }
 0x655   : > { %5051 = vrcp.f32 %v2410_v31  ;;  %v4739_v31 = vpack.c.bf16 %v2783_v20, %v2780_v15  ;;  %v2814_v20 = vld [vmem:[#allocation14 + $0x120] sm:$0xff] }
 0x65e   : > { %v5050_v38 = vpop.eup %5049 }
 0x65f   : > { %v5052_v41 = vpop.eup %5051  ;;  %v2416_v44 = vmul.f32 %v5050_v38, %v2414_v36  ;;  %v4710_v38 = vpack.c.bf16 %v2788_v51, %v2785_v27  ;;  %v2817_v51 = vld [vmem:[#allocation14 + $0x138] sm:$0xff] }
 0x660   : > { %v2424_v60 = vmul.f32 %v5052_v41, %v2422_v39  ;;  %v2419_v24 = vsub.f32 1.0, %v5052_v41  ;;  %v2787_v39 = vld [vmem:[#allocation14 + $0x48] sm:$0xff]  ;;  %v2786_v41 = vld [vmem:[#allocation14 + $0x40] sm:$0xff] }
 0x661   : > { %v2417_v58 = vadd.f32 %v2416_v44, %v6223_v42  ;;  %v2789_v44 = vld [vmem:[#allocation14 + $0x58] sm:$0xff] }
 0x663   : > { %5053 = vtanh.f32 %v2417_v58  ;;  %v2794_v58 = vld [vmem:[#allocation14 + $0x80] sm:$0xff] }
 0x66d   : > { %v5054_v47 = vpop.eup %5053 }
 0x66e   : > { %v2420_v48 = vmul.f32 %v5054_v47, %v2419_v24  ;;  %v4712_v24 = vpack.c.bf16 %v2787_v39, %v2784_v35  ;;  %v4742_v47 = vpack.c.bf16 %v2789_v44, %v2786_v41  ;;  %v2821_v35 = vld [vmem:[#allocation14 + $0x158] sm:$0xff]  ;;  %v2820_v41 = vld [vmem:[#allocation14 + $0x150] sm:$0xff] }
 0x670   : > { %v6272_v50 = vadd.f32 %v2424_v60, %v2420_v48  ;;  %v2791_v60 = vld [vmem:[#allocation14 + $0x68] sm:$0xff]  ;;  %v2790_v48 = vld [vmem:[#allocation14 + $0x60] sm:$0xff] }
 0x672   : > { %v2427_v46 = vrot.slane %v6272_v50, 1 }
 0x674   : > { %2494 = vmatmul.mubr.f32.vlgmr.msra.gmra.mrb[28].mxu0 %v2427_v46  ;;  %3983 = vmatmul.mubr.f32.vlgmr.msra.gmra.mrb[12].mxu1 %v2427_v46  ;;  %v2793_v46 = vld [vmem:[#allocation14 + $0x78] sm:$0xff] }
 0x675   : > { %4653 = vmatpush1.bf16.msra.mxu0 %v6127_v59  ;;  %4684 = vmatpush3.bf16.msra.mxu1 %v6054_v9  ;;  %v2779_v9 = vld [vmem:[#allocation14 + $0x8] sm:$0xff] }
 0x676   : > { %4655 = vmatprep.subr.bf16.mxu0 %v6130_v62  ;;  %4685 = vmatprep.subr.bf16.mxu1 %v5531_v40 }
 0x677   : > { %2669 = vmatprep.mubr.f32.mxu0 %v5530_v11  ;;  %4017 = vmatprep.mubr.msk.f32.mxu1 %vm5532_vm3, %v5530_v11 }
 0x679   : > { %4657 = vmatpush1.bf16.msra.mxu0 %v6133_v53  ;;  %4687 = vmatpush3.bf16.msra.mxu1 %v6058_v5  ;;  %v2782_v5 = vld [vmem:[#allocation14 + $0x20] sm:$0xff] }
 0x67a   : > { %4659 = vmatprep.subr.bf16.mxu0 %v6137_v17  ;;  %4688 = vmatprep.subr.bf16.mxu1 %v5531_v40 }
 0x67d   : > { %4661 = vmatpush1.bf16.msra.mxu0 %v6140_v7  ;;  %4690 = vmatpush3.bf16.msra.mxu1 %v6061_v8  ;;  %v4706_v8 = vpack.c.bf16 %v2782_v5, %v2779_v9  ;;  %v2792_v9 = vld [vmem:[#allocation14 + $0x70] sm:$0xff]  ;;  %v2795_v5 = vld [vmem:[#allocation14 + $0x88] sm:$0xff] }
 0x67e   : > { %4663 = vmatprep.subr.bf16.mxu0 %v6143_v10  ;;  %4691 = vmatprep.subr.bf16.mxu1 %v5531_v40 }
 0x681   : > { %4665 = vmatpush1.bf16.msra.mxu0 %v6146_v12  ;;  %4693 = vmatpush3.bf16.msra.mxu1 %v6065_v14 }
 0x682   : > { %4667 = vmatprep.subr.bf16.mxu0 %v6149_v23  ;;  %4694 = vmatprep.subr.bf16.mxu1 %v5531_v40 }
 0x685   : > { %4669 = vmatpush1.bf16.msra.mxu0 %v6152_v32  ;;  %4696 = vmatpush3.bf16.msra.mxu1 %v6069_v18 }
 0x686   : > { %4671 = vmatprep.subr.bf16.mxu0 %v6155_v33  ;;  %4697 = vmatprep.subr.bf16.mxu1 %v5531_v40 }
 0x689   : > { %4673 = vmatpush1.bf16.msra.mxu0 %v6158_v61  ;;  %4699 = vmatpush3.bf16.msra.mxu1 %v6073_v22 }
 0x68a   : > { %4675 = vmatprep.subr.bf16.mxu0 %v6161_v37  ;;  %4700 = vmatprep.subr.bf16.mxu1 %v5531_v40 }
 0x68d   : > { %4677 = vmatpush1.bf16.msra.mxu0 %v6164_v43  ;;  %4702 = vmatpush3.bf16.msra.mxu1 %v6077_v26 }
 0x68e   : > { %4679 = vmatprep.subr.bf16.mxu0 %v6167_v19  ;;  %4703 = vmatprep.subr.bf16.mxu1 %v5531_v40 }
 0x691   : > { %4681 = vmatpush1.bf16.msra.mxu0 %v6170_v45  ;;  %4705 = vmatpush3.bf16.msra.mxu1 %v6081_v29  ;;  %v2598_v45 = vrot.slane %v6272_v50, 7  ;;  %v4714_v50 = vpack.c.bf16 %v2794_v58, %v2791_v60  ;;  %v2823_v60 = vld [vmem:[#allocation14 + $0x168] sm:$0xff]  ;;  %v2822_v58 = vld [vmem:[#allocation14 + $0x160] sm:$0xff] }
 0x692   : > { %4738 = vmatprep.subr.bf16.mxu1 %v5531_v40  ;;  %4707 = vmatprep.subr.bf16.mxu0 %v4706_v8  ;;  %v2797_v8 = vld [vmem:[#allocation14 + $0x98] sm:$0xff] }
 0x747   : > { %v2495_v14 = vpop.f32.mrb[28].mxu0  ;;  %v2566_v18 = vpop.f32.mrb[12].mxu1 }
 0x748   : > { %v2496_v22 = vadd.f32 %v2495_v14, %v6201_v0  ;;  %v2497_v59 = vpop.f32.mrb[29].mxu0  ;;  %v3984_v26 = vpop.f32.mrb[13].mxu1  ;;  %v2567_v37 = vadd.f32 %v2566_v18, %v6219_v21  ;;  %v2800_v14 = vld [vmem:[#allocation14 + $0xb0] sm:$0xff]  ;;  %v4716_v18 = vpack.c.bf16 %v2793_v46, %v2790_v48  ;;  %v2830_v48 = vld [vmem:[#allocation16 + $0x20] sm:$0xff] }
 0x749   : > { %v2498_v62 = vadd.f32 %v2497_v59, %v6204_v1  ;;  %v2796_v59 = vld [vmem:[#allocation14 + $0x90] sm:$0xff]  ;;  %v4718_v26 = vpack.c.bf16 %v2800_v14, %v2797_v8  ;;  %v2829_v8 = vld [vmem:[#allocation16 + $0x18] sm:$0xff] }
 0x74a   : > { %v2571_v53 = vrot.slane %v2496_v22, 6  ;;  %v2591_v43 = vrot.slane %v2567_v37, 6  ;;  %v4745_v22 = vpack.c.bf16 %v2795_v5, %v2792_v9  ;;  %v2807_v37 = vld [vmem:[#allocation14 + $0xe8] sm:$0xff]  ;;  %v2826_v9 = vld [vmem:[#allocation16] sm:$0xff]  ;;  %v2828_v14 = vld [vmem:[#allocation16 + $0x10] sm:$0xff] }
 0x74b   : > { %v2581_v17 = vrot.slane %v2498_v62, 6  ;;  %v2799_v62 = vld [vmem:[#allocation14 + $0xa8] sm:$0xff] }
 0x74c   : > { %v2573_v7 = vadd.f32 %v2571_v53, %v6207_v2  ;;  %v2798_v53 = vld [vmem:[#allocation14 + $0xa0] sm:$0xff] }
 0x74d   : > { %v2583_v29 = vadd.f32 %v2581_v17, %v6212_v16  ;;  %v2801_v17 = vld [vmem:[#allocation14 + $0xb8] sm:$0xff] }
 0x74e   : > { %v3565_v10 = vmul.f32 -1.442695, %v2573_v7  ;;  %v2803_v7 = vld [vmem:[#allocation14 + $0xc8] sm:$0xff] }
 0x74f   : > { %v3566_v12 = vmul.f32 -1.442695, %v2583_v29  ;;  %v2806_v29 = vld [vmem:[#allocation14 + $0xe0] sm:$0xff] }
 0x750   : > { %5055 = vpow2.f32 %v3565_v10  ;;  %v4720_v10 = vpack.c.bf16 %v2799_v62, %v2796_v59  ;;  %v2836_v59 = vld [vmem:[#allocation16 + $0x50] sm:$0xff] }
 0x751   : > { %5057 = vpow2.f32 %v3566_v12  ;;  %v4748_v12 = vpack.c.bf16 %v2801_v17, %v2798_v53  ;;  %v2832_v62 = vld [vmem:[#allocation16 + $0x30] sm:$0xff] }
 0x75a   : > { %v5056_v23 = vpop.eup %5055 }
 0x75b   : > { %v5058_v32 = vpop.eup %5057  ;;  %v2577_v33 = vadd.f32 1.0, %v5056_v23  ;;  %v2802_v23 = vld [vmem:[#allocation14 + $0xc0] sm:$0xff] }
 0x75c   : > { %v2587_v61 = vadd.f32 1.0, %v5058_v32  ;;  %v4722_v32 = vpack.c.bf16 %v2806_v29, %v2803_v7  ;;  %v2835_v7 = vld [vmem:[#allocation16 + $0x48] sm:$0xff]  ;;  %v2834_v29 = vld [vmem:[#allocation16 + $0x40] sm:$0xff] }
 0x75d   : > { %5059 = vrcp.f32 %v2577_v33  ;;  %v2805_v33 = vld [vmem:[#allocation14 + $0xd8] sm:$0xff] }
 0x75e   : > { %5061 = vrcp.f32 %v2587_v61  ;;  %v2804_v61 = vld [vmem:[#allocation14 + $0xd0] sm:$0xff] }
 0x767   : > { %v5060_v19 = vpop.eup %5059 }
 0x768   : > { %v5062_v56 = vpop.eup %5061  ;;  %v2593_v49 = vmul.f32 %v5060_v19, %v2591_v43  ;;  %v2809_v43 = vld [vmem:[#allocation14 + $0xf8] sm:$0xff]  ;;  %v2812_v19 = vld [vmem:[#allocation14 + $0x110] sm:$0xff] }
 0x769   : > { %v2600_v55 = vmul.f32 %v5062_v56, %v2598_v45  ;;  %v2596_v54 = vsub.f32 1.0, %v5062_v56  ;;  %v4724_v45 = vpack.c.bf16 %v2805_v33, %v2802_v23  ;;  %v4751_v56 = vpack.c.bf16 %v2807_v37, %v2804_v61  ;;  %v2842_v23 = vld [vmem:[#allocation16 + $0x80] sm:$0xff] }
 0x76a   : > { %v2594_v63 = vadd.f32 %v2593_v49, %v6223_v42  ;;  %v2808_v49 = vld [vmem:[#allocation14 + $0xf0] sm:$0xff]  ;;  %v2838_v33 = vld [vmem:[#allocation16 + $0x60] sm:$0xff] }
 0x76c   : > { %5063 = vtanh.f32 %v2594_v63  ;;  %v2811_v63 = vld [vmem:[#allocation14 + $0x108] sm:$0xff] }
 0x76d   : > { %v4728_v13 = vpack.c.bf16 %v2811_v63, %v2808_v49  ;;  %v2848_v49 = vld [vmem:[#allocation16 + $0xb0] sm:$0xff] }
 0x776   : > { %v5064_v3 = vpop.eup %5063 }
 0x777   : > { %v2597_v6 = vmul.f32 %v5064_v3, %v2596_v54  ;;  %v2810_v54 = vld [vmem:[#allocation14 + $0x100] sm:$0xff]  ;;  %v2813_v3 = vld [vmem:[#allocation14 + $0x118] sm:$0xff] }
 0x778   : > { %v4754_v15 = vpack.c.bf16 %v2813_v3, %v2810_v54  ;;  %v2847_v3 = vld [vmem:[#allocation16 + $0xa8] sm:$0xff] }
 0x779   : > { %v6316_v28 = vadd.f32 %v2600_v55, %v2597_v6  ;;  %v4726_v55 = vpack.c.bf16 %v2812_v19, %v2809_v43  ;;  %v2818_v6 = vld [vmem:[#allocation14 + $0x140] sm:$0xff]  ;;  %v2841_v43 = vld [vmem:[#allocation16 + $0x78] sm:$0xff]  ;;  %v2840_v19 = vld [vmem:[#allocation16 + $0x70] sm:$0xff] }
 0x77a   : > { %v4730_v27 = vpack.c.bf16 %v2818_v6, %v2815_v4  ;;  %v2846_v4 = vld [vmem:[#allocation16 + $0xa0] sm:$0xff]  ;;  %v2849_v6 = vld [vmem:[#allocation16 + $0xb8] sm:$0xff] }
 0x77b   : > { %v2603_v36 = vrot.slane %v6316_v28, 2 }
 0x77d   : > { %2670 = vmatmul.mubr.f32.vlgmr.msra.gmra.mrb[30].mxu0 %v2603_v36  ;;  %4018 = vmatmul.mubr.f32.vlgmr.msra.gmra.mrb[14].mxu1 %v2603_v36  ;;  %v2824_v36 = vld [vmem:[#allocation14 + $0x170] sm:$0xff] }
 0x77e   : > { %4709 = vmatpush1.bf16.msra.mxu0 %v4708_v30  ;;  %4740 = vmatpush3.bf16.msra.mxu1 %v4739_v31  ;;  %v2816_v30 = vld [vmem:[#allocation14 + $0x130] sm:$0xff]  ;;  %v2819_v31 = vld [vmem:[#allocation14 + $0x148] sm:$0xff]  ;;  %v4734_v44 = vpack.c.bf16 %v2824_v36, %v2821_v35 }
 0x77f   : > { %4711 = vmatprep.subr.bf16.mxu0 %v4710_v38  ;;  %4741 = vmatprep.subr.bf16.mxu1 %v5531_v40  ;;  %v4732_v38 = vpack.c.bf16 %v2817_v51, %v2814_v20  ;;  %v4757_v39 = vpack.c.bf16 %v2819_v31, %v2816_v30  ;;  %v4804_v51 = vpack.c.bf16 %v2849_v6, %v2846_v4  ;;  %v2853_v31 = vld [vmem:[#allocation16 + $0xd8] sm:$0xff]  ;;  %v2852_v35 = vld [vmem:[#allocation16 + $0xd0] sm:$0xff]  ;;  %v2855_v36 = vld [vmem:[#allocation16 + $0xe8] sm:$0xff] }
 0x780   : > { %2956 = vmatprep.mubr.f32.mxu0 %v5530_v11  ;;  %4052 = vmatprep.mubr.msk.f32.mxu1 %vm5532_vm3, %v5530_v11  ;;  %v3217_v6 = vld [vmem:[%s6570_s29 + $0x20] sm:$0xff] }
 0x782   : > { %4713 = vmatpush1.bf16.msra.mxu0 %v4712_v24  ;;  %4743 = vmatpush3.bf16.msra.mxu1 %v4742_v47  ;;  %v2825_v24 = vld [vmem:[#allocation14 + $0x178] sm:$0xff]  ;;  %v2827_v47 = vld [vmem:[#allocation16 + $0x8] sm:$0xff] }
 0x783   : > { %4715 = vmatprep.subr.bf16.mxu0 %v4714_v50  ;;  %4744 = vmatprep.subr.bf16.mxu1 %v5531_v40  ;;  %v4736_v50 = vpack.c.bf16 %v2823_v60, %v2820_v41  ;;  %v4760_v46 = vpack.c.bf16 %v2825_v24, %v2822_v58  ;;  %v4762_v5 = vpack.c.bf16 %v2830_v48, %v2827_v47  ;;  %v2859_v24 = vld [vmem:[#allocation16 + $0x108] sm:$0xff]  ;;  %v2858_v47 = vld [vmem:[#allocation16 + $0x100] sm:$0xff]  ;;  %v2861_v48 = vld [vmem:[#allocation16 + $0x118] sm:$0xff] }
 0x784   : > { %v4807_v60 = vpack.c.bf16 %v2855_v36, %v2852_v35  ;;  %v3237_v36 = vld [vmem:[%s6570_s29 + $0xc0] sm:$0xff] }
 0x786   : > { %4717 = vmatpush1.bf16.msra.mxu0 %v4716_v18  ;;  %4746 = vmatpush3.bf16.msra.mxu1 %v4745_v22  ;;  %v2831_v18 = vld [vmem:[#allocation16 + $0x28] sm:$0xff]  ;;  %v2833_v22 = vld [vmem:[#allocation16 + $0x38] sm:$0xff] }
 0x787   : > { %4719 = vmatprep.subr.bf16.mxu0 %v4718_v26  ;;  %4747 = vmatprep.subr.bf16.mxu1 %v5531_v40  ;;  %v4764_v26 = vpack.c.bf16 %v2829_v8, %v2826_v9  ;;  %v4795_v53 = vpack.c.bf16 %v2831_v18, %v2828_v14  ;;  %v4766_v17 = vpack.c.bf16 %v2836_v59, %v2833_v22  ;;  %v2865_v18 = vld [vmem:[#allocation16 + $0x138] sm:$0xff]  ;;  %v2864_v22 = vld [vmem:[#allocation16 + $0x130] sm:$0xff]  ;;  %v2867_v59 = vld [vmem:[#allocation16 + $0x148] sm:$0xff] }
 0x788   : > { %v4810_v8 = vpack.c.bf16 %v2861_v48, %v2858_v47  ;;  %v3223_v47 = vld [vmem:[%s6570_s29 + $0x50] sm:$0xff] }
 0x78a   : > { %4721 = vmatpush1.bf16.msra.mxu0 %v4720_v10  ;;  %4749 = vmatpush3.bf16.msra.mxu1 %v4748_v12  ;;  %v2837_v10 = vld [vmem:[#allocation16 + $0x58] sm:$0xff]  ;;  %v2839_v12 = vld [vmem:[#allocation16 + $0x68] sm:$0xff] }
 0x78b   : > { %4723 = vmatprep.subr.bf16.mxu0 %v4722_v32  ;;  %4750 = vmatprep.subr.bf16.mxu1 %v5531_v40  ;;  %v4768_v32 = vpack.c.bf16 %v2835_v7, %v2832_v62  ;;  %v4798_v61 = vpack.c.bf16 %v2837_v10, %v2834_v29  ;;  %v4770_v37 = vpack.c.bf16 %v2842_v23, %v2839_v12  ;;  %v2872_v62 = vld [vmem:[#allocation16 + $0x170] sm:$0xff]  ;;  %v2871_v10 = vld [vmem:[#allocation16 + $0x168] sm:$0xff]  ;;  %v2870_v12 = vld [vmem:[#allocation16 + $0x160] sm:$0xff] }
 0x78c   : > { %v4813_v7 = vpack.c.bf16 %v2867_v59, %v2864_v22  ;;  %v2873_v23 = vld [vmem:[#allocation16 + $0x178] sm:$0xff]  ;;  %v3243_v22 = vld [vmem:[%s6570_s29 + $0xf0] sm:$0xff]  ;;  %v3244_v59 = vld [vmem:[%s6570_s29 + $0xf8] sm:$0xff] }
 0x78e   : > { %4725 = vmatpush1.bf16.msra.mxu0 %v4724_v45  ;;  %4752 = vmatpush3.bf16.msra.mxu1 %v4751_v56  ;;  %v2843_v45 = vld [vmem:[#allocation16 + $0x88] sm:$0xff]  ;;  %v2845_v56 = vld [vmem:[#allocation16 + $0x98] sm:$0xff] }
 0x78f   : > { %4727 = vmatprep.subr.bf16.mxu0 %v4726_v55  ;;  %4753 = vmatprep.subr.bf16.mxu1 %v5531_v40  ;;  %v2844_v55 = vld [vmem:[#allocation16 + $0x90] sm:$0xff]  ;;  %v4801_v63 = vpack.c.bf16 %v2843_v45, %v2840_v19  ;;  %v4774_v54 = vpack.c.bf16 %v2848_v49, %v2845_v56 }
 0x790   : > { %v4776_v20 = vpack.c.bf16 %v2847_v3, %v2844_v55  ;;  %v3213_v19 = vld [vmem:[%s6570_s29] sm:$0xff]  ;;  %v3232_v56 = vld [vmem:[%s6570_s29 + $0x98] sm:$0xff]  ;;  %v3234_v3 = vld [vmem:[%s6570_s29 + $0xa8] sm:$0xff] }
 0x791   : > { %v3216_v55 = vld [vmem:[%s6570_s29 + $0x18] sm:$0xff] }
 0x792   : > { %4729 = vmatpush1.bf16.msra.mxu0 %v4728_v13  ;;  %4755 = vmatpush3.bf16.msra.mxu1 %v4754_v15  ;;  %v2851_v13 = vld [vmem:[#allocation16 + $0xc8] sm:$0xff]  ;;  %v2854_v15 = vld [vmem:[#allocation16 + $0xe0] sm:$0xff] }
 0x793   : > { %4731 = vmatprep.subr.bf16.mxu0 %v4730_v27  ;;  %4756 = vmatprep.subr.bf16.mxu1 %v5531_v40  ;;  %v2850_v27 = vld [vmem:[#allocation16 + $0xc0] sm:$0xff]  ;;  %v4778_v30 = vpack.c.bf16 %v2854_v15, %v2851_v13 }
 0x794   : > { %v4780_v41 = vpack.c.bf16 %v2853_v31, %v2850_v27  ;;  %v3218_v13 = vld [vmem:[%s6570_s29 + $0x28] sm:$0xff]  ;;  %v3236_v27 = vld [vmem:[%s6570_s29 + $0xb8] sm:$0xff] }
 0x795   : > { %v4828_v15 = vpack.c.bf16 %v3218_v13, %v3217_v6  ;;  %v3220_v31 = vld [vmem:[%s6570_s29 + $0x38] sm:$0xff] }
 0x796   : > { %4733 = vmatpush1.bf16.msra.mxu0 %v4732_v38  ;;  %4758 = vmatpush3.bf16.msra.mxu1 %v4757_v39  ;;  %v2857_v38 = vld [vmem:[#allocation16 + $0xf8] sm:$0xff]  ;;  %v2860_v39 = vld [vmem:[#allocation16 + $0x110] sm:$0xff] }
 0x797   : > { %4735 = vmatprep.subr.bf16.mxu0 %v4734_v44  ;;  %4759 = vmatprep.subr.bf16.mxu1 %v5531_v40  ;;  %v2856_v44 = vld [vmem:[#allocation16 + $0xf0] sm:$0xff]  ;;  %v4782_v58 = vpack.c.bf16 %v2860_v39, %v2857_v38  ;;  %v3238_v38 = vld [vmem:[%s6570_s29 + $0xc8] sm:$0xff] }
 0x798   : > { %v4784_v9 = vpack.c.bf16 %v2859_v24, %v2856_v44  ;;  %v4834_v39 = vpack.c.bf16 %v3238_v38, %v3237_v36  ;;  %v3222_v44 = vld [vmem:[%s6570_s29 + $0x48] sm:$0xff]  ;;  %v3240_v24 = vld [vmem:[%s6570_s29 + $0xd8] sm:$0xff] }
 0x79a   : > { %4737 = vmatpush1.bf16.msra.mxu0 %v4736_v50  ;;  %4761 = vmatpush3.bf16.msra.mxu1 %v4760_v46  ;;  %v2863_v50 = vld [vmem:[#allocation16 + $0x128] sm:$0xff]  ;;  %v2866_v46 = vld [vmem:[#allocation16 + $0x140] sm:$0xff] }
 0x79b   : > { %4763 = vmatprep.subr.bf16.mxu0 %v4762_v5  ;;  %4794 = vmatprep.subr.bf16.mxu1 %v5531_v40  ;;  %v2862_v5 = vld [vmem:[#allocation16 + $0x120] sm:$0xff]  ;;  %v4786_v14 = vpack.c.bf16 %v2866_v46, %v2863_v50  ;;  %v3224_v50 = vld [vmem:[%s6570_s29 + $0x58] sm:$0xff]  ;;  %v3241_v46 = vld [vmem:[%s6570_s29 + $0xe0] sm:$0xff] }
 0x79d   : > { %2957 = vmatmul.mubr.f32.vlgmr.msra.gmra.mrb[32].mxu0 %v6113_v25  ;;  %4053 = vmatmul.mubr.f32.vlgmr.msra.gmra.mrb[16].mxu1 %v6113_v25  ;;  %v4772_v25 = vpack.c.bf16 %v2841_v43, %v2838_v33  ;;  %v4816_v33 = vpack.c.bf16 %v2873_v23, %v2870_v12 }
 0x79e   : > { %4765 = vmatpush1.bf16.msra.mxu0 %v4764_v26  ;;  %4796 = vmatpush3.bf16.msra.mxu1 %v4795_v53  ;;  %v2869_v26 = vld [vmem:[#allocation16 + $0x158] sm:$0xff]  ;;  %v4788_v53 = vpack.c.bf16 %v2865_v18, %v2862_v5  ;;  %v4840_v5 = vpack.c.bf16 %v3224_v50, %v3223_v47 }
 0x79f   : > { %4767 = vmatprep.subr.bf16.mxu0 %v4766_v17  ;;  %4797 = vmatprep.subr.bf16.mxu1 %v5531_v40  ;;  %v2868_v17 = vld [vmem:[#allocation16 + $0x150] sm:$0xff]  ;;  %v4790_v29 = vpack.c.bf16 %v2872_v62, %v2869_v26  ;;  %v3226_v18 = vld [vmem:[%s6570_s29 + $0x68] sm:$0xff]  ;;  %v4846_v62 = vpack.c.bf16 %v3244_v59, %v3243_v22 }
 0x7a0   : > { %3113 = vmatprep.mubr.f32.mxu0 %v5530_v11  ;;  %4087 = vmatprep.mubr.msk.f32.mxu1 %vm5532_vm3, %v5530_v11 }
 0x7a2   : > { %4769 = vmatpush1.bf16.msra.mxu0 %v4768_v32  ;;  %4799 = vmatpush3.bf16.msra.mxu1 %v4798_v61  ;;  %v4792_v32 = vpack.c.bf16 %v2871_v10, %v2868_v17  ;;  %v3229_v61 = vld [vmem:[%s6570_s29 + $0x80] sm:$0xff]  ;;  %v3228_v17 = vld [vmem:[%s6570_s29 + $0x78] sm:$0xff] }
 0x7a3   : > { %4771 = vmatprep.subr.bf16.mxu0 %v4770_v37  ;;  %4800 = vmatprep.subr.bf16.mxu1 %v5531_v40  ;;  %v3230_v37 = vld [vmem:[%s6570_s29 + $0x88] sm:$0xff] }
 0x7a4   : > { %v4818_v43 = vpack.c.bf16 %v3230_v37, %v3229_v61 }
 0x7a6   : > { %4773 = vmatpush1.bf16.msra.mxu0 %v4772_v25  ;;  %4802 = vmatpush3.bf16.msra.mxu1 %v4801_v63  ;;  %v3215_v25 = vld [vmem:[%s6570_s29 + $0x10] sm:$0xff] }
 0x7a7   : > { %4775 = vmatprep.subr.bf16.mxu0 %v4774_v54  ;;  %4803 = vmatprep.subr.bf16.mxu1 %v5531_v40  ;;  %v4824_v63 = vpack.c.bf16 %v3216_v55, %v3215_v25  ;;  %v3233_v54 = vld [vmem:[%s6570_s29 + $0xa0] sm:$0xff] }
 0x7a8   : > { %v4826_v4 = vpack.c.bf16 %v3234_v3, %v3233_v54 }
 0x7aa   : > { %4777 = vmatpush1.bf16.msra.mxu0 %v4776_v20  ;;  %4805 = vmatpush3.bf16.msra.mxu1 %v4804_v51  ;;  %v3235_v20 = vld [vmem:[%s6570_s29 + $0xb0] sm:$0xff] }
 0x7ab   : > { %4779 = vmatprep.subr.bf16.mxu0 %v4778_v30  ;;  %4806 = vmatprep.subr.bf16.mxu1 %v5531_v40  ;;  %v4830_v51 = vpack.c.bf16 %v3236_v27, %v3235_v20  ;;  %v3219_v30 = vld [vmem:[%s6570_s29 + $0x30] sm:$0xff] }
 0x7ac   : > { %v4832_v35 = vpack.c.bf16 %v3220_v31, %v3219_v30  ;;  %v2874_v30 = vld [vmem:[#allocation17] sm:$0x7] }
 0x7ae   : > { %4781 = vmatpush1.bf16.msra.mxu0 %v4780_v41  ;;  %4808 = vmatpush3.bf16.msra.mxu1 %v4807_v60  ;;  %v3221_v41 = vld [vmem:[%s6570_s29 + $0x40] sm:$0xff] }
 0x7af   : > { %4783 = vmatprep.subr.bf16.mxu0 %v4782_v58  ;;  %4809 = vmatprep.subr.bf16.mxu1 %v5531_v40  ;;  %v4836_v60 = vpack.c.bf16 %v3222_v44, %v3221_v41  ;;  %v3239_v58 = vld [vmem:[%s6570_s29 + $0xd0] sm:$0xff] }
 0x7b0   : > { %v4838_v48 = vpack.c.bf16 %v3240_v24, %v3239_v58 }
 0x7b2   : > { %4785 = vmatpush1.bf16.msra.mxu0 %v4784_v9  ;;  %4811 = vmatpush3.bf16.msra.mxu1 %v4810_v8  ;;  %v3242_v9 = vld [vmem:[%s6570_s29 + $0xe8] sm:$0xff] }
 0x7b3   : > { %4787 = vmatprep.subr.bf16.mxu0 %v4786_v14  ;;  %4812 = vmatprep.subr.bf16.mxu1 %v5531_v40  ;;  %v4842_v8 = vpack.c.bf16 %v3242_v9, %v3241_v46  ;;  %v3225_v14 = vld [vmem:[%s6570_s29 + $0x60] sm:$0xff] }
 0x7b4   : > { %v4844_v26 = vpack.c.bf16 %v3226_v18, %v3225_v14 }
 0x7b6   : > { %4789 = vmatpush1.bf16.msra.mxu0 %v4788_v53  ;;  %4814 = vmatpush3.bf16.msra.mxu1 %v4813_v7  ;;  %v3227_v53 = vld [vmem:[%s6570_s29 + $0x70] sm:$0xff] }
 0x7b7   : > { %4791 = vmatprep.subr.bf16.mxu0 %v4790_v29  ;;  %4815 = vmatprep.subr.bf16.mxu1 %v5531_v40  ;;  %v3214_v40 = vld [vmem:[%s6570_s29 + $0x8] sm:$0xff]  ;;  %v4848_v7 = vpack.c.bf16 %v3228_v17, %v3227_v53 }
 0x7b8   : > { %v4820_v45 = vpack.c.bf16 %v3214_v40, %v3213_v19 }
 0x7ba   : > { %4793 = vmatpush1.bf16.msra.mxu0 %v4792_v32  ;;  %4817 = vmatpush3.bf16.msra.mxu1 %v4816_v33 }
 0x7bb   : > { %4819 = vmatprep.subr.bf16.mxu0 %v4818_v43 }
 0x7bd   : > { %3114 = vmatmul.mubr.f32.vlgmr.msra.gmra.mrb[32].mxu0 %v5530_v11  ;;  %4088 = vmatmul.mubr.f32.vlgmr.msra.gmra.mrb[18].mxu1 %v5530_v11  ;;  %v3231_v11 = vld [vmem:[%s6570_s29 + $0x90] sm:$0xff] }
 0x7be   : > { %4821 = vmatpush3.bf16.msra.mxu0 %v4820_v45  ;;  %v4822_v49 = vpack.c.bf16 %v3232_v56, %v3231_v11 }
 0x7c0   : > { %4823 = vmatprep.subr.bf16.mxu0 %v4822_v49 }
 0x7c2   : > { %4825 = vmatpush3.bf16.msra.mxu0 %v4824_v63  ;;  %v2774_v63 = vrot.slane %v6316_v28, 7  ;;  %v2884_v28 = vrot.slane %v2874_v30, %v6197_v57 }
 0x7c3   : > { %4827 = vmatprep.subr.bf16.mxu0 %v4826_v4 }
 0x7c6   : > { %4829 = vmatpush3.bf16.msra.mxu0 %v4828_v15 }
 0x7c7   : > { %4831 = vmatprep.subr.bf16.mxu0 %v4830_v51  ;;  %v2875_v51 = vld [vmem:[#allocation19] sm:$0x7] }
 0x7c8   : > { %v3037_v31 = vrot.slane %v2875_v51, %v6194_v52 }
 0x7ca   : > { %4833 = vmatpush3.bf16.msra.mxu0 %v4832_v35  ;;  %v3041_v35 = vrot.slane %v2875_v51, %v6197_v57  ;;  %v2888_v57 = vrot.slane %v2874_v30, %v6216_v34 }
 0x7cb   : > { %4835 = vmatprep.subr.bf16.mxu0 %v4834_v39 }
 0x7cc   : > { %v4852_v39 = vadd.f32 %v3041_v35, %v2884_v28 }
 0x7ce   : > { %4837 = vmatpush3.bf16.msra.mxu0 %v4836_v60 }
 0x7cf   : > { %4839 = vmatprep.subr.bf16.mxu0 %v4838_v48 }
 0x7d2   : > { %4841 = vmatpush3.bf16.msra.mxu0 %v4840_v5 }
 0x7d3   : > { %4843 = vmatprep.subr.bf16.mxu0 %v4842_v8 }
 0x7d6   : > { %4845 = vmatpush3.bf16.msra.mxu0 %v4844_v26 }
 0x7d7   : > { %4847 = vmatprep.subr.bf16.mxu0 %v4846_v62 }
 0x7da   : > { %4849 = vmatpush3.bf16.msra.mxu0 %v4848_v7 }
 0x850   : > { %v2671_v29 = vpop.f32.mrb[30].mxu0  ;;  %v2742_v10 = vpop.f32.mrb[14].mxu1 }
 0x851   : > { %v2672_v12 = vadd.f32 %v2671_v29, %v6201_v0  ;;  %v2673_v23 = vpop.f32.mrb[31].mxu0  ;;  %v4019_v32 = vpop.f32.mrb[15].mxu1  ;;  %v2743_v0 = vadd.f32 %v2742_v10, %v6219_v21  ;;  %v2880_v21 = vrot.slane %v2874_v30, %v6194_v52  ;;  %v3045_v52 = vrot.slane %v2875_v51, %v6216_v34  ;;  %v3245_v10 = vld [vmem:[#allocation20] sm:$0x1] }
 0x852   : > { %v2674_v33 = vadd.f32 %v2673_v23, %v6204_v1 }
 0x853   : > { %v2747_v61 = vrot.slane %v2672_v12, 5  ;;  %v2767_v55 = vrot.slane %v2743_v0, 5  ;;  %v4850_v36 = vadd.f32 %v3037_v31, %v2880_v21 }
 0x854   : > { %v2757_v37 = vrot.slane %v2674_v33, 5 }
 0x855   : > { %v2749_v43 = vadd.f32 %v2747_v61, %v6207_v2 }
 0x856   : > { %v2759_v19 = vadd.f32 %v2757_v37, %v6212_v16 }
 0x857   : > { %v3567_v40 = vmul.f32 -1.442695, %v2749_v43 }
 0x858   : > { %v3568_v45 = vmul.f32 -1.442695, %v2759_v19 }
 0x859   : > { %5065 = vpow2.f32 %v3567_v40 }
 0x85a   : > { %5067 = vpow2.f32 %v3568_v45 }
 0x863   : > { %v5066_v11 = vpop.eup %5065 }
 0x864   : > { %v5068_v56 = vpop.eup %5067  ;;  %v2753_v49 = vadd.f32 1.0, %v5066_v11 }
 0x865   : > { %v2763_v25 = vadd.f32 1.0, %v5068_v56 }
 0x866   : > { %5069 = vrcp.f32 %v2753_v49 }
 0x867   : > { %5071 = vrcp.f32 %v2763_v25 }
 0x870   : > { %v5070_v1 = vpop.eup %5069  ;;  %v3029_v54 = vpop.f32.mrb[16].mxu1 }
 0x871   : > { %v5072_v2 = vpop.eup %5071  ;;  %v2769_v3 = vmul.f32 %v5070_v1, %v2767_v55  ;;  %v4054_v16 = vpop.f32.mrb[17].mxu1  ;;  %v3030_v14 = vadd.f32 %v3029_v54, %v2888_v57 }
 0x872   : > { %v2776_v4 = vmul.f32 %v5072_v2, %v2774_v63  ;;  %v2772_v13 = vsub.f32 1.0, %v5072_v2 }
 0x873   : > { %v2770_v6 = vadd.f32 %v2769_v3, %v6223_v42 }
 0x875   : > { %5073 = vtanh.f32 %v2770_v6 }
 0x87f   : > { %v5074_v15 = vpop.eup %5073 }
 0x880   : > { %v2773_v20 = vmul.f32 %v5074_v15, %v2772_v13 }
 0x882   : > { %v2777_v27 = vadd.f32 %v2776_v4, %v2773_v20 }
 0x884   : > { %v3247_v29 = vrot.slane %v2777_v27, 3 }
 0x890   : > { %v3115_v38 = vpop.f32.mrb[32].mxu0  ;;  %v3186_v41 = vpop.f32.mrb[18].mxu1 }
 0x891   : > { %v4851_v42 = vadd.f32 %v4850_v36, %v3115_v38  ;;  %v3117_v44 = vpop.f32.mrb[33].mxu0  ;;  %v4089_v60 = vpop.f32.mrb[19].mxu1  ;;  %v3187_v5 = vadd.f32 %v3186_v41, %v3045_v52 }
 0x892   : > { %v4853_v24 = vadd.f32 %v4852_v39, %v3117_v44 }
 0x893   : > { %v3569_v58 = vmul.f32 -1.442695, %v4851_v42 }
 0x894   : > { %v3570_v47 = vmul.f32 -1.442695, %v4853_v24 }
 0x895   : > { %5075 = vpow2.f32 %v3569_v58 }
 0x896   : > { %5077 = vpow2.f32 %v3570_v47 }
 0x89f   : > { %v5076_v48 = vpop.eup %5075 }
 0x8a0   : > { %v3194_v50 = vadd.f32 1.0, %v5076_v48  ;;  %v5078_v46 = vpop.eup %5077 }
 0x8a1   : > { %v3201_v9 = vadd.f32 1.0, %v5078_v46 }
 0x8a2   : > { %5079 = vrcp.f32 %v3194_v50 }
 0x8a3   : > { %5081 = vrcp.f32 %v3201_v9 }
 0x8ac   : > { %v5080_v8 = vpop.eup %5079 }
 0x8ad   : > { %v3204_v18 = vmul.f32 %v5080_v8, %v3187_v5  ;;  %v5082_v59 = vpop.eup %5081 }
 0x8ae   : > { %v3207_v26 = vsub.f32 1.0, %v5082_v59  ;;  %v3209_v17 = vmul.f32 0.0, %v5082_v59 }
 0x8af   : > { %v3205_v22 = vadd.f32 %v3204_v18, %v3030_v14 }
 0x8b1   : > { %5083 = vtanh.f32 %v3205_v22 }
 0x8bb   : > { %v5084_v62 = vpop.eup %5083 }
 0x8bc   : > { %v3208_v53 = vmul.f32 %v5084_v62, %v3207_v26 }
 0x8be   : > { %v3210_v7 = vadd.f32 %v3209_v17, %v3208_v53 }
 0x8c0   : > { %3315 = vmatprep.mubr.f32.mxu0 %v3210_v7 }
 0x8c1   : > { %3316 = vmatmul.mubr.f32.vlgmr.msra.gmra.mrb[34].mxu0 %v3247_v29 }
 0x994   : > { %v3842_v34 = vpop.f32.mrb[34].mxu0 }
 0x995   : > { %v3843_v12 = vpop.f32.mrb[35].mxu0 }
 0x996   : > { %v3844_v23 = vadd.f32 %v3843_v12, %v3842_v34 }
 0x998   : > { %v3318_v32 = vadd.f32 %v3844_v23, %v3245_v10 }
 0x99a   : > { %3322 = vst.msk [vmem:[%s664_s28] sm:$0x1] %vm3321_vm10, %v3318_v32 }
 0x99b   : > { %5434 = shalt.err (!%p5431_p11)
}
 0x99c   : > { %s5435_s23 = scalar_lea.hbm %s6458_s24, 16  ;;  %s5439_s21 = scalar_lea.hbm %s6573_s27, 32 }
 0x99d   : > { %p5436_p13 = scmp.ne.s32.totalorder %s6458_s24, %s5435_s23  ;;  %p5440_p9 = scmp.lt.u32.totalorder %s6458_s24, %s6573_s27 }
 0x99e   : > { %p5441_p5 = scmp.lt.u32.totalorder %s5439_s21, %s5435_s23  ;;  %p5443_p10 = scmp.lt.u32.totalorder %s5435_s23, %s6458_s24 }
 0x99f   : > { %p5437_p1 = pnand %p5436_p13, %p6574_p2 }
 0x9a0   : > { %p5442_p0 = por %p5441_p5, %p5440_p9 }
 0x9a1   : > { %p5438_p6 = pneg %p5437_p1 }
 0x9a2   : > { %p5444_p3 = por %p5443_p10, %p5442_p0 }
 0x9a4   : > { %p5445_p4 = pnand %p5444_p3, %p5438_p6 }
 0x9a6   : > { %5448 = shalt.err (!%p5445_p4)
}
 0x9a7   : > { %4912 = dma.vmem_to_hbm [thread:$0]  (%p6574_p2), %s6460_s16, 16, %s6458_s24, %s3324_s13  }
 0x9a8 PF: > { %s6575_s28 = sld [smem:[#allocation34_spill]]  ;;  %s6576_s17 = sld [smem:[#allocation31_spill]] }
 0x9a9   : > { %s6577_s1 = sld [smem:[#allocation38_spill]] }
 0x9ae   : > { %p4979_p12 = scmp.ge.s32.totalorder %s6575_s28, 2  ;;  %s3348_s25 = sand.u32 1, %s6576_s17  }
 0x9af   : > { %p6578_p7 = scmp.ne.s32.totalorder %s6577_s1, 0  ;;  %s3349_s22 = scalar_lea.sflag [#allocation4], %s3348_s25 }
 0x9b1   : > { %p4952_p8 = pnand %p4979_p12, %p6578_p7 }
 0x9b3   : > { %5494 = dma.done.wait (!%p4952_p8), %s3349_s22, 16  }
 0x9b4   : > { %5496 = vsyncadd (!%p4952_p8), %s3349_s22, 4294967280  ;;  %s6579_s21 = sld [smem:[#allocation35_spill]]  ;;  %s6580_s18 = sld [smem:[#allocation32_spill]] }
 0x9b5   : > { %s6581_s19 = sld [smem:[#allocation33_spill]]  ;;  %s6582_s20 = sld [smem:[#allocation36_spill]] }
 0x9ba   : > { %p32_p11 = scmp.ge.s32.totalorder %s6579_s21, 4  }
 0x9bc   :  { %34 = sbr.rel (!%p32_p11) target bundleno = 15 (0xf), region = 167 }
 0x9c3   :  { %3353 = vsyncpa [#allocation3], 1 }
 0x9c4   :  { %3355 = vsyncpa [#allocation3 + $0x1], 1 }
 0x9c5   :  { %3356 = vsyncpa [#allocation6], 1 }
 0x9c6   :  { %3357 = vsyncpa [#allocation9], 1 }
 0x9c7   :  { %3358 = vsyncpa [#allocation12], 1 }
 0x9c8   :  { %3359 = vsyncpa [#allocation15], 1 }
 0x9c9   :  { %3360 = vsyncpa [#allocation18], 1 }
 0x9ca   :  { %3361 = vsyncpa [#allocation21], 1 }
 0x9cb   :  { %3362 = vsyncpa [#allocation4], 1 }
 0x9cc   :  { %3364 = vsyncpa [#allocation4 + $0x1], 1 }

</bundles_post_ra>
